<compile_context>
chip_gen: v7x
topology: tpu7x:2x2x1
jax: 0.10.0
libtpu: 0.0.40
codegen_flags: <defaults>
</compile_context>

<pallas_src>
import functools

import jax
import jax.numpy as jnp
from jax.experimental import pallas as pl
from jax.experimental.pallas import tpu as pltpu


# ------------------------- fused whole-network kernel -------------------------

def _predictor_kernel(x_ref, aT_ref, we_ref, be_ref,
                      wfg_ref, bfg_ref, wskip_ref, bskip_ref,
                      wmix_ref, bmix_ref, bns_ref, bnt_ref,
                      w1_ref, b1_ref, w2_ref, b2_ref,
                      o_ref, prop_scr,
                      *, n_n, t_in, t_final, ksize, dilations, edge_dim):
    """One batch element per grid step.  Activations are channels-first 2-D slabs
    [C, t*N] (lane index = t*N + n, time-major / node-minor)."""
    dot = functools.partial(jnp.dot, preferred_element_type=jnp.float32,
                            precision=jax.lax.Precision.HIGHEST)
    c_dil = wskip_ref.shape[2]
    m_pad = prop_scr.shape[1] // edge_dim

    # --- enter 1x1 conv: [C_res, F] @ [F, T*N]
    x = dot(we_ref[...], x_ref[0]) + be_ref[...]
    a_allT = aT_ref[...]                                   # [N, E*N], A^T stacked per support
    skip = jnp.zeros((w1_ref.shape[1], t_final * n_n), jnp.float32)

    t_cur = t_in
    for li, d in enumerate(dilations):
        t_out = t_cur - (ksize - 1) * d
        m = t_out * n_n

        # --- gated dilated temporal conv (filter|gate merged along rows), taps
        #     unrolled, bias added once at the end.
        acc = dot(wfg_ref[li, 0], x[:, 0:m])
        for k in range(1, ksize):
            off = k * d * n_n
            acc = acc + dot(wfg_ref[li, k], x[:, off:off + m])
        acc = acc + bfg_ref[li]
        gated = jnp.tanh(acc[:c_dil]) * (1.0 / (1.0 + jnp.exp(-acc[c_dil:])))  # [C_dil, m]

        # --- skip conv: only the trailing t_final steps ever reach the output head.
        tail = (t_out - t_final) * n_n
        skip = skip + dot(wskip_ref[li], gated[:, tail:]) + bskip_ref[li]

        # --- graph conv: identity mix + node propagation (real matmuls, all supports
        #     at once via stacked A^T) + per-support channel mix.
        gx = dot(wmix_ref[li, 0], gated) + bmix_ref[li]
        for t in range(t_out):
            p_t = dot(gated[:, t * n_n:(t + 1) * n_n], a_allT)     # [C_dil, E*N]
            for e in range(edge_dim):
                prop_scr[:, e * m_pad + t * n_n:e * m_pad + (t + 1) * n_n] = (
                    p_t[:, e * n_n:(e + 1) * n_n])
        for e in range(edge_dim):
            gx = gx + dot(wmix_ref[li, e + 1],
                          prop_scr[:, e * m_pad:e * m_pad + m])

        # --- dropout = identity (eval); residual add + folded eval-mode BatchNorm.
        res = x[:, (t_cur - t_out) * n_n:]
        x = (gx + res) * bns_ref[li] + bnt_ref[li]
        t_cur = t_out

    # --- output head: ReLU -> 1x1 conv -> ReLU -> 1x1 conv, all in VMEM.
    h = jnp.maximum(skip, 0.0)
    h = dot(w1_ref[...], h) + b1_ref[...]
    h = jnp.maximum(h, 0.0)
    o_ref[0] = dot(w2_ref[...], h) + b2_ref[...]


# ------------------------------ model wrapper ------------------------------

def predictor_forward(params, inputs, supports, cfg):
    """inputs: [B, T, N, F]; supports: [edge_dim, N, N]."""
    B, T, N, F = inputs.shape
    K, L, NB = cfg["kernel_size"], cfg["n_layers"], cfg["n_blocks"]
    E = cfg["edge_dim"]
    Cp = cfg["n_pred"] * cfg["n_out"]
    rf = NB * (K - 1) * (2 ** L - 1) + 1
    dilations = tuple(2 ** li for _ in range(NB) for li in range(L))

    # channels-first [B, F, T*N] (lane index = t*N + n), left-pad time to rf.
    x = jnp.transpose(inputs.astype(jnp.float32), (0, 3, 1, 2))        # [B, F, T, N]
    if T < rf:
        x = jnp.pad(x, ((0, 0), (0, 0), (rf - T, 0), (0, 0)))
    Tp = x.shape[2]
    Tf = Tp - (rf - 1)
    # receptive-field sanity: every layer's output length stays >= Tf >= 1
    t_chk = Tp
    for d in dilations:
        t_chk -= (K - 1) * d
        assert t_chk >= Tf >= 1
    assert t_chk == Tf
    x2 = x.reshape(B, F, Tp * N)

    # stacked transposed supports: a_allT[m, e*N + n] = supports[e, n, m]
    a_allT = jnp.transpose(supports.astype(jnp.float32), (2, 0, 1)).reshape(N, E * N)

    def full_spec(a):
        nd = a.ndim
        return pl.BlockSpec(a.shape, lambda b, _nd=nd: (0,) * _nd)

    kern = functools.partial(_predictor_kernel, n_n=N, t_in=Tp, t_final=Tf,
                             ksize=K, dilations=dilations, edge_dim=E)

    args = (x2, a_allT,
            params["w_enter"], params["b_enter"],
            params["wfg"], params["bfg"],
            params["wskip"], params["bskip"],
            params["wmix"], params["bmix"],
            params["bn_scale"], params["bn_shift"],
            params["w_out1"], params["b_out1"],
            params["w_out2"], params["b_out2"])
    in_specs = [pl.BlockSpec((1, F, Tp * N), lambda b: (b, 0, 0))]
    in_specs += [full_spec(a) for a in args[1:]]

    y = pl.pallas_call(
        kern,
        out_shape=jax.ShapeDtypeStruct((B, Cp, Tf * N), jnp.float32),
        grid=(B,),
        in_specs=in_specs,
        out_specs=pl.BlockSpec((1, Cp, Tf * N), lambda b: (b, 0, 0)),
        scratch_shapes=[pltpu.VMEM((cfg["n_dilations"], E * Tp * N), jnp.float32)],
        compiler_params=pltpu.CompilerParams(
            dimension_semantics=("parallel",),
            vmem_limit_bytes=32 * 1024 * 1024),
    )(*args)

    # exact reference output transform: [B,Cp,N,Tf] -> reshape -> swap last axes
    y = y.reshape(B, Cp, Tf, N)
    y_nchw = jnp.transpose(y, (0, 1, 3, 2))
    out = y_nchw.reshape(B, cfg["n_pred"], -1, N)
    return jnp.swapaxes(out, -1, -2)


# ------------------------- pure-JAX reference (for checking) -------------------------

def reference_forward(params, inputs, supports, cfg):
    B, T, N, F = inputs.shape
    K, L, NB = cfg["kernel_size"], cfg["n_layers"], cfg["n_blocks"]
    E = cfg["edge_dim"]
    Cdil = cfg["n_dilations"]
    rf = NB * (K - 1) * (2 ** L - 1) + 1
    ein = functools.partial(jnp.einsum, precision=jax.lax.Precision.HIGHEST)

    def cb(v):  # per-channel bias/scale [C,1] -> broadcastable over [B,C,N,T]
        return v[:, 0][None, :, None, None]

    x = jnp.transpose(inputs.astype(jnp.float32), (0, 3, 2, 1))        # [B, F, N, T]
    if T < rf:
        x = jnp.pad(x, ((0, 0), (0, 0), (0, 0), (rf - T, 0)))
    x = ein('oi,bint->bont', params["w_enter"], x) + cb(params["b_enter"])
    skip = jnp.zeros((B, cfg["n_skips"], N, x.shape[-1]), jnp.float32)

    li = 0
    for _ in range(NB):
        for lj in range(L):
            d = 2 ** lj
            residual = x
            t_out = x.shape[-1] - (K - 1) * d
            acc = sum(ein('oi,bint->bont', params["wfg"][li, k],
                          residual[..., k * d:k * d + t_out]) for k in range(K))
            acc = acc + cb(params["bfg"][li])
            gated = jnp.tanh(acc[:, :Cdil]) * (1.0 / (1.0 + jnp.exp(-acc[:, Cdil:])))
            s = ein('oi,bint->bont', params["wskip"][li], gated) + cb(params["bskip"][li])
            skip = skip[..., -t_out:] + s
            gx = ein('oi,bint->bont', params["wmix"][li, 0], gated)
            for e in range(E):
                prop = ein('nm,bimt->bint', supports[e].astype(jnp.float32), gated)
                gx = gx + ein('oi,bint->bont', params["wmix"][li, e + 1], prop)
            gx = gx + cb(params["bmix"][li])
            x = gx + residual[..., -t_out:]
            x = x * cb(params["bn_scale"][li]) + cb(params["bn_shift"][li])
            li += 1

    h = jnp.maximum(skip, 0.0)
    h = ein('oi,bint->bont', params["w_out1"], h) + cb(params["b_out1"])
    h = jnp.maximum(h, 0.0)
    y = ein('oi,bint->bont', params["w_out2"], h) + cb(params["b_out2"])
    out = y.reshape(B, cfg["n_pred"], -1, N)
    return jnp.swapaxes(out, -1, -2)


# ------------------------------ params ------------------------------

def init_params(key, cfg):
    K, Cres, Cdil = cfg["kernel_size"], cfg["n_residuals"], cfg["n_dilations"]
    E, Cskip, Cend = cfg["edge_dim"], cfg["n_skips"], cfg["n_ends"]
    Cp = cfg["n_pred"] * cfg["n_out"]
    NL = cfg["n_blocks"] * cfg["n_layers"]
    ks = iter(jax.random.split(key, 32))

    def rnd(shape):
        return 0.2 * jax.random.normal(next(ks), shape, jnp.float32)

    p = {
        "w_enter": rnd((Cres, cfg["n_in"])), "b_enter": rnd((Cres, 1)),
        # filter|gate merged along rows: [:Cdil] = filter tap, [Cdil:] = gate tap
        "wfg": rnd((NL, K, 2 * Cdil, Cres)), "bfg": rnd((NL, 2 * Cdil, 1)),
        "wskip": rnd((NL, Cskip, Cdil)), "bskip": rnd((NL, Cskip, 1)),
        # graph-conv 1x1 mix: slot 0 = identity branch, slot e+1 = support e
        "wmix": rnd((NL, E + 1, Cres, Cdil)), "bmix": rnd((NL, Cres, 1)),
        "w_out1": rnd((Cend, Cskip)), "b_out1": rnd((Cend, 1)),
        "w_out2": rnd((Cp, Cend)), "b_out2": rnd((Cp, 1)),
    }
    # eval-mode BatchNorm2d folded into per-channel scale/shift
    gamma = 1.0 + 0.1 * jax.random.normal(next(ks), (NL, Cres, 1), jnp.float32)
    beta = 0.1 * jax.random.normal(next(ks), (NL, Cres, 1), jnp.float32)
    rmean = 0.1 * jax.random.normal(next(ks), (NL, Cres, 1), jnp.float32)
    rvar = 1.0 + 0.1 * jnp.abs(jax.random.normal(next(ks), (NL, Cres, 1), jnp.float32))
    scale = gamma / jnp.sqrt(rvar + 1e-5)
    p["bn_scale"] = scale
    p["bn_shift"] = beta - rmean * scale
    return p


# ------------------------------ main ------------------------------

if __name__ == "__main__":
    cfg = dict(n_in=4, n_out=2, n_pred=3, edge_dim=2, n_residuals=8, n_dilations=8,
               n_skips=16, n_ends=16, kernel_size=2, n_blocks=2, n_layers=2, dropout=0.3)
    B, T, N = 2, 6, 8   # T < receptive_field (=7) so the left-pad path is exercised

    key = jax.random.PRNGKey(0)
    k_in, k_sup, k_par = jax.random.split(key, 3)
    inputs = jax.random.normal(k_in, (B, T, N, cfg["n_in"]), jnp.float32)
    supports = jax.nn.softmax(
        jax.random.normal(k_sup, (cfg["edge_dim"], N, N), jnp.float32), axis=-1)
    params = init_params(k_par, cfg)

    fwd = jax.jit(functools.partial(predictor_forward, cfg=cfg))
    out = jax.block_until_ready(fwd(params, inputs, supports))

    ref = jax.block_until_ready(
        jax.jit(functools.partial(reference_forward, cfg=cfg))(params, inputs, supports))

    assert out.shape[0] == B and out.shape[1] == cfg["n_pred"] and out.shape[2] == N
    assert out.shape == ref.shape
    assert bool(jnp.all(jnp.isfinite(out)))
    assert bool(jnp.allclose(out, ref, atol=1e-2, rtol=1e-2))
    print("KERNEL_OK")
</pallas_src>

<mosaic_0001>
module attributes {stable_mosaic.version = 11 : i64} {
  func.func @_predictor_kernel(%arg0: i32, %arg1: memref<1x4x56xf32, #tpu.memory_space<vmem>>, %arg2: memref<8x16xf32, #tpu.memory_space<vmem>>, %arg3: memref<8x4xf32, #tpu.memory_space<vmem>>, %arg4: memref<8x1xf32, #tpu.memory_space<vmem>>, %arg5: memref<4x2x16x8xf32, #tpu.memory_space<vmem>>, %arg6: memref<4x16x1xf32, #tpu.memory_space<vmem>>, %arg7: memref<4x16x8xf32, #tpu.memory_space<vmem>>, %arg8: memref<4x16x1xf32, #tpu.memory_space<vmem>>, %arg9: memref<4x3x8x8xf32, #tpu.memory_space<vmem>>, %arg10: memref<4x8x1xf32, #tpu.memory_space<vmem>>, %arg11: memref<4x8x1xf32, #tpu.memory_space<vmem>>, %arg12: memref<4x8x1xf32, #tpu.memory_space<vmem>>, %arg13: memref<16x16xf32, #tpu.memory_space<vmem>>, %arg14: memref<16x1xf32, #tpu.memory_space<vmem>>, %arg15: memref<6x16xf32, #tpu.memory_space<vmem>>, %arg16: memref<6x1xf32, #tpu.memory_space<vmem>>, %arg17: memref<1x6x8xf32, #tpu.memory_space<vmem>>, %arg18: memref<8x112xf32, #tpu.memory_space<vmem>>) attributes {dimension_semantics = [#tpu.dimension_semantics<parallel>], iteration_bounds = array<i64: 2>, scalar_prefetch = 0 : i64, scratch_operands = 1 : i64, tpu.core_type = #tpu.core_type<tc>, window_params = [{transform_indices = @transform_0, window_bounds = array<i64: 1, 4, 56>}, {pipeline_mode = #tpu.pipeline_mode<synchronous>, transform_indices = @transform_1, window_bounds = array<i64: 8, 16>}, {pipeline_mode = #tpu.pipeline_mode<synchronous>, transform_indices = @transform_2, window_bounds = array<i64: 8, 4>}, {pipeline_mode = #tpu.pipeline_mode<synchronous>, transform_indices = @transform_3, window_bounds = array<i64: 8, 1>}, {pipeline_mode = #tpu.pipeline_mode<synchronous>, transform_indices = @transform_4, window_bounds = array<i64: 4, 2, 16, 8>}, {pipeline_mode = #tpu.pipeline_mode<synchronous>, transform_indices = @transform_5, window_bounds = array<i64: 4, 16, 1>}, {pipeline_mode = #tpu.pipeline_mode<synchronous>, transform_indices = @transform_6, window_bounds = array<i64: 4, 16, 8>}, {pipeline_mode = #tpu.pipeline_mode<synchronous>, transform_indices = @transform_7, window_bounds = array<i64: 4, 16, 1>}, {pipeline_mode = #tpu.pipeline_mode<synchronous>, transform_indices = @transform_8, window_bounds = array<i64: 4, 3, 8, 8>}, {pipeline_mode = #tpu.pipeline_mode<synchronous>, transform_indices = @transform_9, window_bounds = array<i64: 4, 8, 1>}, {pipeline_mode = #tpu.pipeline_mode<synchronous>, transform_indices = @transform_10, window_bounds = array<i64: 4, 8, 1>}, {pipeline_mode = #tpu.pipeline_mode<synchronous>, transform_indices = @transform_11, window_bounds = array<i64: 4, 8, 1>}, {pipeline_mode = #tpu.pipeline_mode<synchronous>, transform_indices = @transform_12, window_bounds = array<i64: 16, 16>}, {pipeline_mode = #tpu.pipeline_mode<synchronous>, transform_indices = @transform_13, window_bounds = array<i64: 16, 1>}, {pipeline_mode = #tpu.pipeline_mode<synchronous>, transform_indices = @transform_14, window_bounds = array<i64: 6, 16>}, {pipeline_mode = #tpu.pipeline_mode<synchronous>, transform_indices = @transform_15, window_bounds = array<i64: 6, 1>}, {transform_indices = @transform_16, window_bounds = array<i64: 1, 6, 8>}]} {
    %c0 = arith.constant 0 : index
    %c0_0 = arith.constant 0 : index
    %0 = vector.load %arg3[%c0, %c0_0] : memref<8x4xf32, #tpu.memory_space<vmem>>, vector<8x4xf32>
    %c0_1 = arith.constant 0 : index
    %c0_2 = arith.constant 0 : index
    %c0_3 = arith.constant 0 : index
    %1 = vector.load %arg1[%c0_1, %c0_2, %c0_3] : memref<1x4x56xf32, #tpu.memory_space<vmem>>, vector<1x4x56xf32>
    %2 = vector.shape_cast %1 : vector<1x4x56xf32> to vector<4x56xf32>
    %cst = arith.constant dense<0.000000e+00> : vector<8x56xf32>
    %3 = tpu.matmul %0, %2, %cst {dimension_numbers = #tpu.dot_dimension_numbers<[1], [0], [0], [1], [0, 0, 1, 1], [], []>, precision = #tpu.contract_precision<fp32>} : vector<8x4xf32>, vector<4x56xf32>, vector<8x56xf32> -> vector<8x56xf32>
    %c0_4 = arith.constant 0 : index
    %c0_5 = arith.constant 0 : index
    %4 = vector.load %arg4[%c0_4, %c0_5] : memref<8x1xf32, #tpu.memory_space<vmem>>, vector<8x1xf32>
    %5 = vector.broadcast %4 : vector<8x1xf32> to vector<8x56xf32>
    %6 = arith.addf %3, %5 : vector<8x56xf32>
    %c0_6 = arith.constant 0 : index
    %c0_7 = arith.constant 0 : index
    %7 = vector.load %arg2[%c0_6, %c0_7] : memref<8x16xf32, #tpu.memory_space<vmem>>, vector<8x16xf32>
    %cst_8 = arith.constant 0.000000e+00 : f32
    %8 = vector.broadcast %cst_8 : f32 to vector<16x8xf32>
    %c0_9 = arith.constant 0 : index
    %c0_10 = arith.constant 0 : index
    %c0_11 = arith.constant 0 : index
    %c0_12 = arith.constant 0 : index
    %9 = vector.load %arg5[%c0_9, %c0_10, %c0_11, %c0_12] : memref<4x2x16x8xf32, #tpu.memory_space<vmem>>, vector<1x1x16x8xf32>
    %10 = vector.shape_cast %9 : vector<1x1x16x8xf32> to vector<16x8xf32>
    %11 = vector.extract_strided_slice %6 {offsets = [0, 0], sizes = [8, 48], strides = [1, 1]} : vector<8x56xf32> to vector<8x48xf32>
    %cst_13 = arith.constant dense<0.000000e+00> : vector<16x48xf32>
    %12 = tpu.matmul %10, %11, %cst_13 {dimension_numbers = #tpu.dot_dimension_numbers<[1], [0], [0], [1], [0, 0, 1, 1], [], []>, precision = #tpu.contract_precision<fp32>} : vector<16x8xf32>, vector<8x48xf32>, vector<16x48xf32> -> vector<16x48xf32>
    %c0_14 = arith.constant 0 : index
    %c1 = arith.constant 1 : index
    %c0_15 = arith.constant 0 : index
    %c0_16 = arith.constant 0 : index
    %13 = vector.load %arg5[%c0_14, %c1, %c0_15, %c0_16] : memref<4x2x16x8xf32, #tpu.memory_space<vmem>>, vector<1x1x16x8xf32>
    %14 = vector.shape_cast %13 : vector<1x1x16x8xf32> to vector<16x8xf32>
    %15 = vector.extract_strided_slice %6 {offsets = [0, 8], sizes = [8, 48], strides = [1, 1]} : vector<8x56xf32> to vector<8x48xf32>
    %cst_17 = arith.constant dense<0.000000e+00> : vector<16x48xf32>
    %16 = tpu.matmul %14, %15, %cst_17 {dimension_numbers = #tpu.dot_dimension_numbers<[1], [0], [0], [1], [0, 0, 1, 1], [], []>, precision = #tpu.contract_precision<fp32>} : vector<16x8xf32>, vector<8x48xf32>, vector<16x48xf32> -> vector<16x48xf32>
    %17 = arith.addf %12, %16 : vector<16x48xf32>
    %c0_18 = arith.constant 0 : index
    %c0_19 = arith.constant 0 : index
    %c0_20 = arith.constant 0 : index
    %18 = vector.load %arg6[%c0_18, %c0_19, %c0_20] : memref<4x16x1xf32, #tpu.memory_space<vmem>>, vector<1x16x1xf32>
    %19 = vector.shape_cast %18 : vector<1x16x1xf32> to vector<16x1xf32>
    %20 = vector.broadcast %19 : vector<16x1xf32> to vector<16x48xf32>
    %21 = arith.addf %17, %20 : vector<16x48xf32>
    %22 = vector.extract_strided_slice %21 {offsets = [0, 0], sizes = [8, 48], strides = [1, 1]} : vector<16x48xf32> to vector<8x48xf32>
    %23 = math.tanh %22 : vector<8x48xf32>
    %24 = vector.extract_strided_slice %21 {offsets = [8, 0], sizes = [8, 48], strides = [1, 1]} : vector<16x48xf32> to vector<8x48xf32>
    %cst_21 = arith.constant 0.000000e+00 : f32
    %25 = vector.broadcast %cst_21 : f32 to vector<8x48xf32>
    %26 = arith.subf %25, %24 : vector<8x48xf32>
    %27 = math.exp %26 : vector<8x48xf32>
    %cst_22 = arith.constant 1.000000e+00 : f32
    %28 = vector.broadcast %cst_22 : f32 to vector<8x48xf32>
    %29 = arith.addf %28, %27 : vector<8x48xf32>
    %cst_23 = arith.constant 1.000000e+00 : f32
    %30 = vector.broadcast %cst_23 : f32 to vector<8x48xf32>
    %31 = arith.divf %30, %29 : vector<8x48xf32>
    %32 = arith.mulf %23, %31 : vector<8x48xf32>
    %c0_24 = arith.constant 0 : index
    %c0_25 = arith.constant 0 : index
    %c0_26 = arith.constant 0 : index
    %33 = vector.load %arg7[%c0_24, %c0_25, %c0_26] : memref<4x16x8xf32, #tpu.memory_space<vmem>>, vector<1x16x8xf32>
    %34 = vector.shape_cast %33 : vector<1x16x8xf32> to vector<16x8xf32>
    %35 = vector.extract_strided_slice %32 {offsets = [0, 40], sizes = [8, 8], strides = [1, 1]} : vector<8x48xf32> to vector<8x8xf32>
    %cst_27 = arith.constant dense<0.000000e+00> : vector<16x8xf32>
    %36 = tpu.matmul %34, %35, %cst_27 {dimension_numbers = #tpu.dot_dimension_numbers<[1], [0], [0], [1], [0, 0, 1, 1], [], []>, precision = #tpu.contract_precision<fp32>} : vector<16x8xf32>, vector<8x8xf32>, vector<16x8xf32> -> vector<16x8xf32>
    %37 = arith.addf %8, %36 : vector<16x8xf32>
    %c0_28 = arith.constant 0 : index
    %c0_29 = arith.constant 0 : index
    %c0_30 = arith.constant 0 : index
    %38 = vector.load %arg8[%c0_28, %c0_29, %c0_30] : memref<4x16x1xf32, #tpu.memory_space<vmem>>, vector<1x16x1xf32>
    %39 = vector.shape_cast %38 : vector<1x16x1xf32> to vector<16x1xf32>
    %40 = vector.broadcast %39 : vector<16x1xf32> to vector<16x8xf32>
    %41 = arith.addf %37, %40 : vector<16x8xf32>
    %c0_31 = arith.constant 0 : index
    %c0_32 = arith.constant 0 : index
    %c0_33 = arith.constant 0 : index
    %c0_34 = arith.constant 0 : index
    %42 = vector.load %arg9[%c0_31, %c0_32, %c0_33, %c0_34] : memref<4x3x8x8xf32, #tpu.memory_space<vmem>>, vector<1x1x8x8xf32>
    %43 = vector.shape_cast %42 : vector<1x1x8x8xf32> to vector<8x8xf32>
    %cst_35 = arith.constant dense<0.000000e+00> : vector<8x48xf32>
    %44 = tpu.matmul %43, %32, %cst_35 {dimension_numbers = #tpu.dot_dimension_numbers<[1], [0], [0], [1], [0, 0, 1, 1], [], []>, precision = #tpu.contract_precision<fp32>} : vector<8x8xf32>, vector<8x48xf32>, vector<8x48xf32> -> vector<8x48xf32>
    %c0_36 = arith.constant 0 : index
    %c0_37 = arith.constant 0 : index
    %c0_38 = arith.constant 0 : index
    %45 = vector.load %arg10[%c0_36, %c0_37, %c0_38] : memref<4x8x1xf32, #tpu.memory_space<vmem>>, vector<1x8x1xf32>
    %46 = vector.shape_cast %45 : vector<1x8x1xf32> to vector<8x1xf32>
    %47 = vector.broadcast %46 : vector<8x1xf32> to vector<8x48xf32>
    %48 = arith.addf %44, %47 : vector<8x48xf32>
    %49 = vector.extract_strided_slice %32 {offsets = [0, 0], sizes = [8, 8], strides = [1, 1]} : vector<8x48xf32> to vector<8x8xf32>
    %cst_39 = arith.constant dense<0.000000e+00> : vector<8x16xf32>
    %50 = tpu.matmul %49, %7, %cst_39 {dimension_numbers = #tpu.dot_dimension_numbers<[1], [0], [0], [1], [0, 0, 1, 1], [], []>, precision = #tpu.contract_precision<fp32>} : vector<8x8xf32>, vector<8x16xf32>, vector<8x16xf32> -> vector<8x16xf32>
    %51 = vector.extract_strided_slice %50 {offsets = [0, 0], sizes = [8, 8], strides = [1, 1]} : vector<8x16xf32> to vector<8x8xf32>
    %c0_40 = arith.constant 0 : index
    %c0_41 = arith.constant 0 : index
    %52 = vector.load %arg18[%c0_40, %c0_41] : memref<8x112xf32, #tpu.memory_space<vmem>>, vector<8x8xf32>
    tpu.vector_store %arg18[%c0_40, %c0_41], %51 {strides = array<i32>} : memref<8x112xf32, #tpu.memory_space<vmem>>, vector<8x8xf32>,
    %53 = vector.extract_strided_slice %50 {offsets = [0, 8], sizes = [8, 8], strides = [1, 1]} : vector<8x16xf32> to vector<8x8xf32>
    %c0_42 = arith.constant 0 : index
    %c56 = arith.constant 56 : index
    %54 = vector.load %arg18[%c0_42, %c56] : memref<8x112xf32, #tpu.memory_space<vmem>>, vector<8x8xf32>
    tpu.vector_store %arg18[%c0_42, %c56], %53 {strides = array<i32>} : memref<8x112xf32, #tpu.memory_space<vmem>>, vector<8x8xf32>,
    %55 = vector.extract_strided_slice %32 {offsets = [0, 8], sizes = [8, 8], strides = [1, 1]} : vector<8x48xf32> to vector<8x8xf32>
    %cst_43 = arith.constant dense<0.000000e+00> : vector<8x16xf32>
    %56 = tpu.matmul %55, %7, %cst_43 {dimension_numbers = #tpu.dot_dimension_numbers<[1], [0], [0], [1], [0, 0, 1, 1], [], []>, precision = #tpu.contract_precision<fp32>} : vector<8x8xf32>, vector<8x16xf32>, vector<8x16xf32> -> vector<8x16xf32>
    %57 = vector.extract_strided_slice %56 {offsets = [0, 0], sizes = [8, 8], strides = [1, 1]} : vector<8x16xf32> to vector<8x8xf32>
    %c0_44 = arith.constant 0 : index
    %c8 = arith.constant 8 : index
    %58 = vector.load %arg18[%c0_44, %c8] : memref<8x112xf32, #tpu.memory_space<vmem>>, vector<8x8xf32>
    tpu.vector_store %arg18[%c0_44, %c8], %57 {strides = array<i32>} : memref<8x112xf32, #tpu.memory_space<vmem>>, vector<8x8xf32>,
    %59 = vector.extract_strided_slice %56 {offsets = [0, 8], sizes = [8, 8], strides = [1, 1]} : vector<8x16xf32> to vector<8x8xf32>
    %c0_45 = arith.constant 0 : index
    %c64 = arith.constant 64 : index
    %60 = vector.load %arg18[%c0_45, %c64] : memref<8x112xf32, #tpu.memory_space<vmem>>, vector<8x8xf32>
    tpu.vector_store %arg18[%c0_45, %c64], %59 {strides = array<i32>} : memref<8x112xf32, #tpu.memory_space<vmem>>, vector<8x8xf32>,
    %61 = vector.extract_strided_slice %32 {offsets = [0, 16], sizes = [8, 8], strides = [1, 1]} : vector<8x48xf32> to vector<8x8xf32>
    %cst_46 = arith.constant dense<0.000000e+00> : vector<8x16xf32>
    %62 = tpu.matmul %61, %7, %cst_46 {dimension_numbers = #tpu.dot_dimension_numbers<[1], [0], [0], [1], [0, 0, 1, 1], [], []>, precision = #tpu.contract_precision<fp32>} : vector<8x8xf32>, vector<8x16xf32>, vector<8x16xf32> -> vector<8x16xf32>
    %63 = vector.extract_strided_slice %62 {offsets = [0, 0], sizes = [8, 8], strides = [1, 1]} : vector<8x16xf32> to vector<8x8xf32>
    %c0_47 = arith.constant 0 : index
    %c16 = arith.constant 16 : index
    %64 = vector.load %arg18[%c0_47, %c16] : memref<8x112xf32, #tpu.memory_space<vmem>>, vector<8x8xf32>
    tpu.vector_store %arg18[%c0_47, %c16], %63 {strides = array<i32>} : memref<8x112xf32, #tpu.memory_space<vmem>>, vector<8x8xf32>,
    %65 = vector.extract_strided_slice %62 {offsets = [0, 8], sizes = [8, 8], strides = [1, 1]} : vector<8x16xf32> to vector<8x8xf32>
    %c0_48 = arith.constant 0 : index
    %c72 = arith.constant 72 : index
    %66 = vector.load %arg18[%c0_48, %c72] : memref<8x112xf32, #tpu.memory_space<vmem>>, vector<8x8xf32>
    tpu.vector_store %arg18[%c0_48, %c72], %65 {strides = array<i32>} : memref<8x112xf32, #tpu.memory_space<vmem>>, vector<8x8xf32>,
    %67 = vector.extract_strided_slice %32 {offsets = [0, 24], sizes = [8, 8], strides = [1, 1]} : vector<8x48xf32> to vector<8x8xf32>
    %cst_49 = arith.constant dense<0.000000e+00> : vector<8x16xf32>
    %68 = tpu.matmul %67, %7, %cst_49 {dimension_numbers = #tpu.dot_dimension_numbers<[1], [0], [0], [1], [0, 0, 1, 1], [], []>, precision = #tpu.contract_precision<fp32>} : vector<8x8xf32>, vector<8x16xf32>, vector<8x16xf32> -> vector<8x16xf32>
    %69 = vector.extract_strided_slice %68 {offsets = [0, 0], sizes = [8, 8], strides = [1, 1]} : vector<8x16xf32> to vector<8x8xf32>
    %c0_50 = arith.constant 0 : index
    %c24 = arith.constant 24 : index
    %70 = vector.load %arg18[%c0_50, %c24] : memref<8x112xf32, #tpu.memory_space<vmem>>, vector<8x8xf32>
    tpu.vector_store %arg18[%c0_50, %c24], %69 {strides = array<i32>} : memref<8x112xf32, #tpu.memory_space<vmem>>, vector<8x8xf32>,
    %71 = vector.extract_strided_slice %68 {offsets = [0, 8], sizes = [8, 8], strides = [1, 1]} : vector<8x16xf32> to vector<8x8xf32>
    %c0_51 = arith.constant 0 : index
    %c80 = arith.constant 80 : index
    %72 = vector.load %arg18[%c0_51, %c80] : memref<8x112xf32, #tpu.memory_space<vmem>>, vector<8x8xf32>
    tpu.vector_store %arg18[%c0_51, %c80], %71 {strides = array<i32>} : memref<8x112xf32, #tpu.memory_space<vmem>>, vector<8x8xf32>,
    %73 = vector.extract_strided_slice %32 {offsets = [0, 32], sizes = [8, 8], strides = [1, 1]} : vector<8x48xf32> to vector<8x8xf32>
    %cst_52 = arith.constant dense<0.000000e+00> : vector<8x16xf32>
    %74 = tpu.matmul %73, %7, %cst_52 {dimension_numbers = #tpu.dot_dimension_numbers<[1], [0], [0], [1], [0, 0, 1, 1], [], []>, precision = #tpu.contract_precision<fp32>} : vector<8x8xf32>, vector<8x16xf32>, vector<8x16xf32> -> vector<8x16xf32>
    %75 = vector.extract_strided_slice %74 {offsets = [0, 0], sizes = [8, 8], strides = [1, 1]} : vector<8x16xf32> to vector<8x8xf32>
    %c0_53 = arith.constant 0 : index
    %c32 = arith.constant 32 : index
    %76 = vector.load %arg18[%c0_53, %c32] : memref<8x112xf32, #tpu.memory_space<vmem>>, vector<8x8xf32>
    tpu.vector_store %arg18[%c0_53, %c32], %75 {strides = array<i32>} : memref<8x112xf32, #tpu.memory_space<vmem>>, vector<8x8xf32>,
    %77 = vector.extract_strided_slice %74 {offsets = [0, 8], sizes = [8, 8], strides = [1, 1]} : vector<8x16xf32> to vector<8x8xf32>
    %c0_54 = arith.constant 0 : index
    %c88 = arith.constant 88 : index
    %78 = vector.load %arg18[%c0_54, %c88] : memref<8x112xf32, #tpu.memory_space<vmem>>, vector<8x8xf32>
    tpu.vector_store %arg18[%c0_54, %c88], %77 {strides = array<i32>} : memref<8x112xf32, #tpu.memory_space<vmem>>, vector<8x8xf32>,
    %79 = vector.extract_strided_slice %32 {offsets = [0, 40], sizes = [8, 8], strides = [1, 1]} : vector<8x48xf32> to vector<8x8xf32>
    %cst_55 = arith.constant dense<0.000000e+00> : vector<8x16xf32>
    %80 = tpu.matmul %79, %7, %cst_55 {dimension_numbers = #tpu.dot_dimension_numbers<[1], [0], [0], [1], [0, 0, 1, 1], [], []>, precision = #tpu.contract_precision<fp32>} : vector<8x8xf32>, vector<8x16xf32>, vector<8x16xf32> -> vector<8x16xf32>
    %81 = vector.extract_strided_slice %80 {offsets = [0, 0], sizes = [8, 8], strides = [1, 1]} : vector<8x16xf32> to vector<8x8xf32>
    %c0_56 = arith.constant 0 : index
    %c40 = arith.constant 40 : index
    %82 = vector.load %arg18[%c0_56, %c40] : memref<8x112xf32, #tpu.memory_space<vmem>>, vector<8x8xf32>
    tpu.vector_store %arg18[%c0_56, %c40], %81 {strides = array<i32>} : memref<8x112xf32, #tpu.memory_space<vmem>>, vector<8x8xf32>,
    %83 = vector.extract_strided_slice %80 {offsets = [0, 8], sizes = [8, 8], strides = [1, 1]} : vector<8x16xf32> to vector<8x8xf32>
    %c0_57 = arith.constant 0 : index
    %c96 = arith.constant 96 : index
    %84 = vector.load %arg18[%c0_57, %c96] : memref<8x112xf32, #tpu.memory_space<vmem>>, vector<8x8xf32>
    tpu.vector_store %arg18[%c0_57, %c96], %83 {strides = array<i32>} : memref<8x112xf32, #tpu.memory_space<vmem>>, vector<8x8xf32>,
    %c0_58 = arith.constant 0 : index
    %c1_59 = arith.constant 1 : index
    %c0_60 = arith.constant 0 : index
    %c0_61 = arith.constant 0 : index
    %85 = vector.load %arg9[%c0_58, %c1_59, %c0_60, %c0_61] : memref<4x3x8x8xf32, #tpu.memory_space<vmem>>, vector<1x1x8x8xf32>
    %86 = vector.shape_cast %85 : vector<1x1x8x8xf32> to vector<8x8xf32>
    %c0_62 = arith.constant 0 : index
    %c0_63 = arith.constant 0 : index
    %87 = vector.load %arg18[%c0_62, %c0_63] : memref<8x112xf32, #tpu.memory_space<vmem>>, vector<8x48xf32>
    %cst_64 = arith.constant dense<0.000000e+00> : vector<8x48xf32>
    %88 = tpu.matmul %86, %87, %cst_64 {dimension_numbers = #tpu.dot_dimension_numbers<[1], [0], [0], [1], [0, 0, 1, 1], [], []>, precision = #tpu.contract_precision<fp32>} : vector<8x8xf32>, vector<8x48xf32>, vector<8x48xf32> -> vector<8x48xf32>
    %89 = arith.addf %48, %88 : vector<8x48xf32>
    %c0_65 = arith.constant 0 : index
    %c2 = arith.constant 2 : index
    %c0_66 = arith.constant 0 : index
    %c0_67 = arith.constant 0 : index
    %90 = vector.load %arg9[%c0_65, %c2, %c0_66, %c0_67] : memref<4x3x8x8xf32, #tpu.memory_space<vmem>>, vector<1x1x8x8xf32>
    %91 = vector.shape_cast %90 : vector<1x1x8x8xf32> to vector<8x8xf32>
    %c0_68 = arith.constant 0 : index
    %c56_69 = arith.constant 56 : index
    %92 = vector.load %arg18[%c0_68, %c56_69] : memref<8x112xf32, #tpu.memory_space<vmem>>, vector<8x48xf32>
    %cst_70 = arith.constant dense<0.000000e+00> : vector<8x48xf32>
    %93 = tpu.matmul %91, %92, %cst_70 {dimension_numbers = #tpu.dot_dimension_numbers<[1], [0], [0], [1], [0, 0, 1, 1], [], []>, precision = #tpu.contract_precision<fp32>} : vector<8x8xf32>, vector<8x48xf32>, vector<8x48xf32> -> vector<8x48xf32>
    %94 = arith.addf %89, %93 : vector<8x48xf32>
    %95 = vector.extract_strided_slice %6 {offsets = [0, 8], sizes = [8, 48], strides = [1, 1]} : vector<8x56xf32> to vector<8x48xf32>
    %96 = arith.addf %94, %95 : vector<8x48xf32>
    %c0_71 = arith.constant 0 : index
    %c0_72 = arith.constant 0 : index
    %c0_73 = arith.constant 0 : index
    %97 = vector.load %arg11[%c0_71, %c0_72, %c0_73] : memref<4x8x1xf32, #tpu.memory_space<vmem>>, vector<1x8x1xf32>
    %98 = vector.shape_cast %97 : vector<1x8x1xf32> to vector<8x1xf32>
    %99 = vector.broadcast %98 : vector<8x1xf32> to vector<8x48xf32>
    %100 = arith.mulf %96, %99 : vector<8x48xf32>
    %c0_74 = arith.constant 0 : index
    %c0_75 = arith.constant 0 : index
    %c0_76 = arith.constant 0 : index
    %101 = vector.load %arg12[%c0_74, %c0_75, %c0_76] : memref<4x8x1xf32, #tpu.memory_space<vmem>>, vector<1x8x1xf32>
    %102 = vector.shape_cast %101 : vector<1x8x1xf32> to vector<8x1xf32>
    %103 = vector.broadcast %102 : vector<8x1xf32> to vector<8x48xf32>
    %104 = arith.addf %100, %103 : vector<8x48xf32>
    %c1_77 = arith.constant 1 : index
    %c0_78 = arith.constant 0 : index
    %c0_79 = arith.constant 0 : index
    %c0_80 = arith.constant 0 : index
    %105 = vector.load %arg5[%c1_77, %c0_78, %c0_79, %c0_80] : memref<4x2x16x8xf32, #tpu.memory_space<vmem>>, vector<1x1x16x8xf32>
    %106 = vector.shape_cast %105 : vector<1x1x16x8xf32> to vector<16x8xf32>
    %107 = vector.extract_strided_slice %104 {offsets = [0, 0], sizes = [8, 32], strides = [1, 1]} : vector<8x48xf32> to vector<8x32xf32>
    %cst_81 = arith.constant dense<0.000000e+00> : vector<16x32xf32>
    %108 = tpu.matmul %106, %107, %cst_81 {dimension_numbers = #tpu.dot_dimension_numbers<[1], [0], [0], [1], [0, 0, 1, 1], [], []>, precision = #tpu.contract_precision<fp32>} : vector<16x8xf32>, vector<8x32xf32>, vector<16x32xf32> -> vector<16x32xf32>
    %c1_82 = arith.constant 1 : index
    %c1_83 = arith.constant 1 : index
    %c0_84 = arith.constant 0 : index
    %c0_85 = arith.constant 0 : index
    %109 = vector.load %arg5[%c1_82, %c1_83, %c0_84, %c0_85] : memref<4x2x16x8xf32, #tpu.memory_space<vmem>>, vector<1x1x16x8xf32>
    %110 = vector.shape_cast %109 : vector<1x1x16x8xf32> to vector<16x8xf32>
    %111 = vector.extract_strided_slice %104 {offsets = [0, 16], sizes = [8, 32], strides = [1, 1]} : vector<8x48xf32> to vector<8x32xf32>
    %cst_86 = arith.constant dense<0.000000e+00> : vector<16x32xf32>
    %112 = tpu.matmul %110, %111, %cst_86 {dimension_numbers = #tpu.dot_dimension_numbers<[1], [0], [0], [1], [0, 0, 1, 1], [], []>, precision = #tpu.contract_precision<fp32>} : vector<16x8xf32>, vector<8x32xf32>, vector<16x32xf32> -> vector<16x32xf32>
    %113 = arith.addf %108, %112 : vector<16x32xf32>
    %c1_87 = arith.constant 1 : index
    %c0_88 = arith.constant 0 : index
    %c0_89 = arith.constant 0 : index
    %114 = vector.load %arg6[%c1_87, %c0_88, %c0_89] : memref<4x16x1xf32, #tpu.memory_space<vmem>>, vector<1x16x1xf32>
    %115 = vector.shape_cast %114 : vector<1x16x1xf32> to vector<16x1xf32>
    %116 = vector.broadcast %115 : vector<16x1xf32> to vector<16x32xf32>
    %117 = arith.addf %113, %116 : vector<16x32xf32>
    %118 = vector.extract_strided_slice %117 {offsets = [0, 0], sizes = [8, 32], strides = [1, 1]} : vector<16x32xf32> to vector<8x32xf32>
    %119 = math.tanh %118 : vector<8x32xf32>
    %120 = vector.extract_strided_slice %117 {offsets = [8, 0], sizes = [8, 32], strides = [1, 1]} : vector<16x32xf32> to vector<8x32xf32>
    %cst_90 = arith.constant 0.000000e+00 : f32
    %121 = vector.broadcast %cst_90 : f32 to vector<8x32xf32>
    %122 = arith.subf %121, %120 : vector<8x32xf32>
    %123 = math.exp %122 : vector<8x32xf32>
    %cst_91 = arith.constant 1.000000e+00 : f32
    %124 = vector.broadcast %cst_91 : f32 to vector<8x32xf32>
    %125 = arith.addf %124, %123 : vector<8x32xf32>
    %cst_92 = arith.constant 1.000000e+00 : f32
    %126 = vector.broadcast %cst_92 : f32 to vector<8x32xf32>
    %127 = arith.divf %126, %125 : vector<8x32xf32>
    %128 = arith.mulf %119, %127 : vector<8x32xf32>
    %c1_93 = arith.constant 1 : index
    %c0_94 = arith.constant 0 : index
    %c0_95 = arith.constant 0 : index
    %129 = vector.load %arg7[%c1_93, %c0_94, %c0_95] : memref<4x16x8xf32, #tpu.memory_space<vmem>>, vector<1x16x8xf32>
    %130 = vector.shape_cast %129 : vector<1x16x8xf32> to vector<16x8xf32>
    %131 = vector.extract_strided_slice %128 {offsets = [0, 24], sizes = [8, 8], strides = [1, 1]} : vector<8x32xf32> to vector<8x8xf32>
    %cst_96 = arith.constant dense<0.000000e+00> : vector<16x8xf32>
    %132 = tpu.matmul %130, %131, %cst_96 {dimension_numbers = #tpu.dot_dimension_numbers<[1], [0], [0], [1], [0, 0, 1, 1], [], []>, precision = #tpu.contract_precision<fp32>} : vector<16x8xf32>, vector<8x8xf32>, vector<16x8xf32> -> vector<16x8xf32>
    %133 = arith.addf %41, %132 : vector<16x8xf32>
    %c1_97 = arith.constant 1 : index
    %c0_98 = arith.constant 0 : index
    %c0_99 = arith.constant 0 : index
    %134 = vector.load %arg8[%c1_97, %c0_98, %c0_99] : memref<4x16x1xf32, #tpu.memory_space<vmem>>, vector<1x16x1xf32>
    %135 = vector.shape_cast %134 : vector<1x16x1xf32> to vector<16x1xf32>
    %136 = vector.broadcast %135 : vector<16x1xf32> to vector<16x8xf32>
    %137 = arith.addf %133, %136 : vector<16x8xf32>
    %c1_100 = arith.constant 1 : index
    %c0_101 = arith.constant 0 : index
    %c0_102 = arith.constant 0 : index
    %c0_103 = arith.constant 0 : index
    %138 = vector.load %arg9[%c1_100, %c0_101, %c0_102, %c0_103] : memref<4x3x8x8xf32, #tpu.memory_space<vmem>>, vector<1x1x8x8xf32>
    %139 = vector.shape_cast %138 : vector<1x1x8x8xf32> to vector<8x8xf32>
    %cst_104 = arith.constant dense<0.000000e+00> : vector<8x32xf32>
    %140 = tpu.matmul %139, %128, %cst_104 {dimension_numbers = #tpu.dot_dimension_numbers<[1], [0], [0], [1], [0, 0, 1, 1], [], []>, precision = #tpu.contract_precision<fp32>} : vector<8x8xf32>, vector<8x32xf32>, vector<8x32xf32> -> vector<8x32xf32>
    %c1_105 = arith.constant 1 : index
    %c0_106 = arith.constant 0 : index
    %c0_107 = arith.constant 0 : index
    %141 = vector.load %arg10[%c1_105, %c0_106, %c0_107] : memref<4x8x1xf32, #tpu.memory_space<vmem>>, vector<1x8x1xf32>
    %142 = vector.shape_cast %141 : vector<1x8x1xf32> to vector<8x1xf32>
    %143 = vector.broadcast %142 : vector<8x1xf32> to vector<8x32xf32>
    %144 = arith.addf %140, %143 : vector<8x32xf32>
    %145 = vector.extract_strided_slice %128 {offsets = [0, 0], sizes = [8, 8], strides = [1, 1]} : vector<8x32xf32> to vector<8x8xf32>
    %cst_108 = arith.constant dense<0.000000e+00> : vector<8x16xf32>
    %146 = tpu.matmul %145, %7, %cst_108 {dimension_numbers = #tpu.dot_dimension_numbers<[1], [0], [0], [1], [0, 0, 1, 1], [], []>, precision = #tpu.contract_precision<fp32>} : vector<8x8xf32>, vector<8x16xf32>, vector<8x16xf32> -> vector<8x16xf32>
    %147 = vector.extract_strided_slice %146 {offsets = [0, 0], sizes = [8, 8], strides = [1, 1]} : vector<8x16xf32> to vector<8x8xf32>
    %c0_109 = arith.constant 0 : index
    %c0_110 = arith.constant 0 : index
    %148 = vector.load %arg18[%c0_109, %c0_110] : memref<8x112xf32, #tpu.memory_space<vmem>>, vector<8x8xf32>
    tpu.vector_store %arg18[%c0_109, %c0_110], %147 {strides = array<i32>} : memref<8x112xf32, #tpu.memory_space<vmem>>, vector<8x8xf32>,
    %149 = vector.extract_strided_slice %146 {offsets = [0, 8], sizes = [8, 8], strides = [1, 1]} : vector<8x16xf32> to vector<8x8xf32>
    %c0_111 = arith.constant 0 : index
    %c56_112 = arith.constant 56 : index
    %150 = vector.load %arg18[%c0_111, %c56_112] : memref<8x112xf32, #tpu.memory_space<vmem>>, vector<8x8xf32>
    tpu.vector_store %arg18[%c0_111, %c56_112], %149 {strides = array<i32>} : memref<8x112xf32, #tpu.memory_space<vmem>>, vector<8x8xf32>,
    %151 = vector.extract_strided_slice %128 {offsets = [0, 8], sizes = [8, 8], strides = [1, 1]} : vector<8x32xf32> to vector<8x8xf32>
    %cst_113 = arith.constant dense<0.000000e+00> : vector<8x16xf32>
    %152 = tpu.matmul %151, %7, %cst_113 {dimension_numbers = #tpu.dot_dimension_numbers<[1], [0], [0], [1], [0, 0, 1, 1], [], []>, precision = #tpu.contract_precision<fp32>} : vector<8x8xf32>, vector<8x16xf32>, vector<8x16xf32> -> vector<8x16xf32>
    %153 = vector.extract_strided_slice %152 {offsets = [0, 0], sizes = [8, 8], strides = [1, 1]} : vector<8x16xf32> to vector<8x8xf32>
    %c0_114 = arith.constant 0 : index
    %c8_115 = arith.constant 8 : index
    %154 = vector.load %arg18[%c0_114, %c8_115] : memref<8x112xf32, #tpu.memory_space<vmem>>, vector<8x8xf32>
    tpu.vector_store %arg18[%c0_114, %c8_115], %153 {strides = array<i32>} : memref<8x112xf32, #tpu.memory_space<vmem>>, vector<8x8xf32>,
    %155 = vector.extract_strided_slice %152 {offsets = [0, 8], sizes = [8, 8], strides = [1, 1]} : vector<8x16xf32> to vector<8x8xf32>
    %c0_116 = arith.constant 0 : index
    %c64_117 = arith.constant 64 : index
    %156 = vector.load %arg18[%c0_116, %c64_117] : memref<8x112xf32, #tpu.memory_space<vmem>>, vector<8x8xf32>
    tpu.vector_store %arg18[%c0_116, %c64_117], %155 {strides = array<i32>} : memref<8x112xf32, #tpu.memory_space<vmem>>, vector<8x8xf32>,
    %157 = vector.extract_strided_slice %128 {offsets = [0, 16], sizes = [8, 8], strides = [1, 1]} : vector<8x32xf32> to vector<8x8xf32>
    %cst_118 = arith.constant dense<0.000000e+00> : vector<8x16xf32>
    %158 = tpu.matmul %157, %7, %cst_118 {dimension_numbers = #tpu.dot_dimension_numbers<[1], [0], [0], [1], [0, 0, 1, 1], [], []>, precision = #tpu.contract_precision<fp32>} : vector<8x8xf32>, vector<8x16xf32>, vector<8x16xf32> -> vector<8x16xf32>
    %159 = vector.extract_strided_slice %158 {offsets = [0, 0], sizes = [8, 8], strides = [1, 1]} : vector<8x16xf32> to vector<8x8xf32>
    %c0_119 = arith.constant 0 : index
    %c16_120 = arith.constant 16 : index
    %160 = vector.load %arg18[%c0_119, %c16_120] : memref<8x112xf32, #tpu.memory_space<vmem>>, vector<8x8xf32>
    tpu.vector_store %arg18[%c0_119, %c16_120], %159 {strides = array<i32>} : memref<8x112xf32, #tpu.memory_space<vmem>>, vector<8x8xf32>,
    %161 = vector.extract_strided_slice %158 {offsets = [0, 8], sizes = [8, 8], strides = [1, 1]} : vector<8x16xf32> to vector<8x8xf32>
    %c0_121 = arith.constant 0 : index
    %c72_122 = arith.constant 72 : index
    %162 = vector.load %arg18[%c0_121, %c72_122] : memref<8x112xf32, #tpu.memory_space<vmem>>, vector<8x8xf32>
    tpu.vector_store %arg18[%c0_121, %c72_122], %161 {strides = array<i32>} : memref<8x112xf32, #tpu.memory_space<vmem>>, vector<8x8xf32>,
    %163 = vector.extract_strided_slice %128 {offsets = [0, 24], sizes = [8, 8], strides = [1, 1]} : vector<8x32xf32> to vector<8x8xf32>
    %cst_123 = arith.constant dense<0.000000e+00> : vector<8x16xf32>
    %164 = tpu.matmul %163, %7, %cst_123 {dimension_numbers = #tpu.dot_dimension_numbers<[1], [0], [0], [1], [0, 0, 1, 1], [], []>, precision = #tpu.contract_precision<fp32>} : vector<8x8xf32>, vector<8x16xf32>, vector<8x16xf32> -> vector<8x16xf32>
    %165 = vector.extract_strided_slice %164 {offsets = [0, 0], sizes = [8, 8], strides = [1, 1]} : vector<8x16xf32> to vector<8x8xf32>
    %c0_124 = arith.constant 0 : index
    %c24_125 = arith.constant 24 : index
    %166 = vector.load %arg18[%c0_124, %c24_125] : memref<8x112xf32, #tpu.memory_space<vmem>>, vector<8x8xf32>
    tpu.vector_store %arg18[%c0_124, %c24_125], %165 {strides = array<i32>} : memref<8x112xf32, #tpu.memory_space<vmem>>, vector<8x8xf32>,
    %167 = vector.extract_strided_slice %164 {offsets = [0, 8], sizes = [8, 8], strides = [1, 1]} : vector<8x16xf32> to vector<8x8xf32>
    %c0_126 = arith.constant 0 : index
    %c80_127 = arith.constant 80 : index
    %168 = vector.load %arg18[%c0_126, %c80_127] : memref<8x112xf32, #tpu.memory_space<vmem>>, vector<8x8xf32>
    tpu.vector_store %arg18[%c0_126, %c80_127], %167 {strides = array<i32>} : memref<8x112xf32, #tpu.memory_space<vmem>>, vector<8x8xf32>,
    %c1_128 = arith.constant 1 : index
    %c1_129 = arith.constant 1 : index
    %c0_130 = arith.constant 0 : index
    %c0_131 = arith.constant 0 : index
    %169 = vector.load %arg9[%c1_128, %c1_129, %c0_130, %c0_131] : memref<4x3x8x8xf32, #tpu.memory_space<vmem>>, vector<1x1x8x8xf32>
    %170 = vector.shape_cast %169 : vector<1x1x8x8xf32> to vector<8x8xf32>
    %c0_132 = arith.constant 0 : index
    %c0_133 = arith.constant 0 : index
    %171 = vector.load %arg18[%c0_132, %c0_133] : memref<8x112xf32, #tpu.memory_space<vmem>>, vector<8x32xf32>
    %cst_134 = arith.constant dense<0.000000e+00> : vector<8x32xf32>
    %172 = tpu.matmul %170, %171, %cst_134 {dimension_numbers = #tpu.dot_dimension_numbers<[1], [0], [0], [1], [0, 0, 1, 1], [], []>, precision = #tpu.contract_precision<fp32>} : vector<8x8xf32>, vector<8x32xf32>, vector<8x32xf32> -> vector<8x32xf32>
    %173 = arith.addf %144, %172 : vector<8x32xf32>
    %c1_135 = arith.constant 1 : index
    %c2_136 = arith.constant 2 : index
    %c0_137 = arith.constant 0 : index
    %c0_138 = arith.constant 0 : index
    %174 = vector.load %arg9[%c1_135, %c2_136, %c0_137, %c0_138] : memref<4x3x8x8xf32, #tpu.memory_space<vmem>>, vector<1x1x8x8xf32>
    %175 = vector.shape_cast %174 : vector<1x1x8x8xf32> to vector<8x8xf32>
    %c0_139 = arith.constant 0 : index
    %c56_140 = arith.constant 56 : index
    %176 = vector.load %arg18[%c0_139, %c56_140] : memref<8x112xf32, #tpu.memory_space<vmem>>, vector<8x32xf32>
    %cst_141 = arith.constant dense<0.000000e+00> : vector<8x32xf32>
    %177 = tpu.matmul %175, %176, %cst_141 {dimension_numbers = #tpu.dot_dimension_numbers<[1], [0], [0], [1], [0, 0, 1, 1], [], []>, precision = #tpu.contract_precision<fp32>} : vector<8x8xf32>, vector<8x32xf32>, vector<8x32xf32> -> vector<8x32xf32>
    %178 = arith.addf %173, %177 : vector<8x32xf32>
    %179 = vector.extract_strided_slice %104 {offsets = [0, 16], sizes = [8, 32], strides = [1, 1]} : vector<8x48xf32> to vector<8x32xf32>
    %180 = arith.addf %178, %179 : vector<8x32xf32>
    %c1_142 = arith.constant 1 : index
    %c0_143 = arith.constant 0 : index
    %c0_144 = arith.constant 0 : index
    %181 = vector.load %arg11[%c1_142, %c0_143, %c0_144] : memref<4x8x1xf32, #tpu.memory_space<vmem>>, vector<1x8x1xf32>
    %182 = vector.shape_cast %181 : vector<1x8x1xf32> to vector<8x1xf32>
    %183 = vector.broadcast %182 : vector<8x1xf32> to vector<8x32xf32>
    %184 = arith.mulf %180, %183 : vector<8x32xf32>
    %c1_145 = arith.constant 1 : index
    %c0_146 = arith.constant 0 : index
    %c0_147 = arith.constant 0 : index
    %185 = vector.load %arg12[%c1_145, %c0_146, %c0_147] : memref<4x8x1xf32, #tpu.memory_space<vmem>>, vector<1x8x1xf32>
    %186 = vector.shape_cast %185 : vector<1x8x1xf32> to vector<8x1xf32>
    %187 = vector.broadcast %186 : vector<8x1xf32> to vector<8x32xf32>
    %188 = arith.addf %184, %187 : vector<8x32xf32>
    %c2_148 = arith.constant 2 : index
    %c0_149 = arith.constant 0 : index
    %c0_150 = arith.constant 0 : index
    %c0_151 = arith.constant 0 : index
    %189 = vector.load %arg5[%c2_148, %c0_149, %c0_150, %c0_151] : memref<4x2x16x8xf32, #tpu.memory_space<vmem>>, vector<1x1x16x8xf32>
    %190 = vector.shape_cast %189 : vector<1x1x16x8xf32> to vector<16x8xf32>
    %191 = vector.extract_strided_slice %188 {offsets = [0, 0], sizes = [8, 24], strides = [1, 1]} : vector<8x32xf32> to vector<8x24xf32>
    %cst_152 = arith.constant dense<0.000000e+00> : vector<16x24xf32>
    %192 = tpu.matmul %190, %191, %cst_152 {dimension_numbers = #tpu.dot_dimension_numbers<[1], [0], [0], [1], [0, 0, 1, 1], [], []>, precision = #tpu.contract_precision<fp32>} : vector<16x8xf32>, vector<8x24xf32>, vector<16x24xf32> -> vector<16x24xf32>
    %c2_153 = arith.constant 2 : index
    %c1_154 = arith.constant 1 : index
    %c0_155 = arith.constant 0 : index
    %c0_156 = arith.constant 0 : index
    %193 = vector.load %arg5[%c2_153, %c1_154, %c0_155, %c0_156] : memref<4x2x16x8xf32, #tpu.memory_space<vmem>>, vector<1x1x16x8xf32>
    %194 = vector.shape_cast %193 : vector<1x1x16x8xf32> to vector<16x8xf32>
    %195 = vector.extract_strided_slice %188 {offsets = [0, 8], sizes = [8, 24], strides = [1, 1]} : vector<8x32xf32> to vector<8x24xf32>
    %cst_157 = arith.constant dense<0.000000e+00> : vector<16x24xf32>
    %196 = tpu.matmul %194, %195, %cst_157 {dimension_numbers = #tpu.dot_dimension_numbers<[1], [0], [0], [1], [0, 0, 1, 1], [], []>, precision = #tpu.contract_precision<fp32>} : vector<16x8xf32>, vector<8x24xf32>, vector<16x24xf32> -> vector<16x24xf32>
    %197 = arith.addf %192, %196 : vector<16x24xf32>
    %c2_158 = arith.constant 2 : index
    %c0_159 = arith.constant 0 : index
    %c0_160 = arith.constant 0 : index
    %198 = vector.load %arg6[%c2_158, %c0_159, %c0_160] : memref<4x16x1xf32, #tpu.memory_space<vmem>>, vector<1x16x1xf32>
    %199 = vector.shape_cast %198 : vector<1x16x1xf32> to vector<16x1xf32>
    %200 = vector.broadcast %199 : vector<16x1xf32> to vector<16x24xf32>
    %201 = arith.addf %197, %200 : vector<16x24xf32>
    %202 = vector.extract_strided_slice %201 {offsets = [0, 0], sizes = [8, 24], strides = [1, 1]} : vector<16x24xf32> to vector<8x24xf32>
    %203 = math.tanh %202 : vector<8x24xf32>
    %204 = vector.extract_strided_slice %201 {offsets = [8, 0], sizes = [8, 24], strides = [1, 1]} : vector<16x24xf32> to vector<8x24xf32>
    %cst_161 = arith.constant 0.000000e+00 : f32
    %205 = vector.broadcast %cst_161 : f32 to vector<8x24xf32>
    %206 = arith.subf %205, %204 : vector<8x24xf32>
    %207 = math.exp %206 : vector<8x24xf32>
    %cst_162 = arith.constant 1.000000e+00 : f32
    %208 = vector.broadcast %cst_162 : f32 to vector<8x24xf32>
    %209 = arith.addf %208, %207 : vector<8x24xf32>
    %cst_163 = arith.constant 1.000000e+00 : f32
    %210 = vector.broadcast %cst_163 : f32 to vector<8x24xf32>
    %211 = arith.divf %210, %209 : vector<8x24xf32>
    %212 = arith.mulf %203, %211 : vector<8x24xf32>
    %c2_164 = arith.constant 2 : index
    %c0_165 = arith.constant 0 : index
    %c0_166 = arith.constant 0 : index
    %213 = vector.load %arg7[%c2_164, %c0_165, %c0_166] : memref<4x16x8xf32, #tpu.memory_space<vmem>>, vector<1x16x8xf32>
    %214 = vector.shape_cast %213 : vector<1x16x8xf32> to vector<16x8xf32>
    %215 = vector.extract_strided_slice %212 {offsets = [0, 16], sizes = [8, 8], strides = [1, 1]} : vector<8x24xf32> to vector<8x8xf32>
    %cst_167 = arith.constant dense<0.000000e+00> : vector<16x8xf32>
    %216 = tpu.matmul %214, %215, %cst_167 {dimension_numbers = #tpu.dot_dimension_numbers<[1], [0], [0], [1], [0, 0, 1, 1], [], []>, precision = #tpu.contract_precision<fp32>} : vector<16x8xf32>, vector<8x8xf32>, vector<16x8xf32> -> vector<16x8xf32>
    %217 = arith.addf %137, %216 : vector<16x8xf32>
    %c2_168 = arith.constant 2 : index
    %c0_169 = arith.constant 0 : index
    %c0_170 = arith.constant 0 : index
    %218 = vector.load %arg8[%c2_168, %c0_169, %c0_170] : memref<4x16x1xf32, #tpu.memory_space<vmem>>, vector<1x16x1xf32>
    %219 = vector.shape_cast %218 : vector<1x16x1xf32> to vector<16x1xf32>
    %220 = vector.broadcast %219 : vector<16x1xf32> to vector<16x8xf32>
    %221 = arith.addf %217, %220 : vector<16x8xf32>
    %c2_171 = arith.constant 2 : index
    %c0_172 = arith.constant 0 : index
    %c0_173 = arith.constant 0 : index
    %c0_174 = arith.constant 0 : index
    %222 = vector.load %arg9[%c2_171, %c0_172, %c0_173, %c0_174] : memref<4x3x8x8xf32, #tpu.memory_space<vmem>>, vector<1x1x8x8xf32>
    %223 = vector.shape_cast %222 : vector<1x1x8x8xf32> to vector<8x8xf32>
    %cst_175 = arith.constant dense<0.000000e+00> : vector<8x24xf32>
    %224 = tpu.matmul %223, %212, %cst_175 {dimension_numbers = #tpu.dot_dimension_numbers<[1], [0], [0], [1], [0, 0, 1, 1], [], []>, precision = #tpu.contract_precision<fp32>} : vector<8x8xf32>, vector<8x24xf32>, vector<8x24xf32> -> vector<8x24xf32>
    %c2_176 = arith.constant 2 : index
    %c0_177 = arith.constant 0 : index
    %c0_178 = arith.constant 0 : index
    %225 = vector.load %arg10[%c2_176, %c0_177, %c0_178] : memref<4x8x1xf32, #tpu.memory_space<vmem>>, vector<1x8x1xf32>
    %226 = vector.shape_cast %225 : vector<1x8x1xf32> to vector<8x1xf32>
    %227 = vector.broadcast %226 : vector<8x1xf32> to vector<8x24xf32>
    %228 = arith.addf %224, %227 : vector<8x24xf32>
    %229 = vector.extract_strided_slice %212 {offsets = [0, 0], sizes = [8, 8], strides = [1, 1]} : vector<8x24xf32> to vector<8x8xf32>
    %cst_179 = arith.constant dense<0.000000e+00> : vector<8x16xf32>
    %230 = tpu.matmul %229, %7, %cst_179 {dimension_numbers = #tpu.dot_dimension_numbers<[1], [0], [0], [1], [0, 0, 1, 1], [], []>, precision = #tpu.contract_precision<fp32>} : vector<8x8xf32>, vector<8x16xf32>, vector<8x16xf32> -> vector<8x16xf32>
    %231 = vector.extract_strided_slice %230 {offsets = [0, 0], sizes = [8, 8], strides = [1, 1]} : vector<8x16xf32> to vector<8x8xf32>
    %c0_180 = arith.constant 0 : index
    %c0_181 = arith.constant 0 : index
    %232 = vector.load %arg18[%c0_180, %c0_181] : memref<8x112xf32, #tpu.memory_space<vmem>>, vector<8x8xf32>
    tpu.vector_store %arg18[%c0_180, %c0_181], %231 {strides = array<i32>} : memref<8x112xf32, #tpu.memory_space<vmem>>, vector<8x8xf32>,
    %233 = vector.extract_strided_slice %230 {offsets = [0, 8], sizes = [8, 8], strides = [1, 1]} : vector<8x16xf32> to vector<8x8xf32>
    %c0_182 = arith.constant 0 : index
    %c56_183 = arith.constant 56 : index
    %234 = vector.load %arg18[%c0_182, %c56_183] : memref<8x112xf32, #tpu.memory_space<vmem>>, vector<8x8xf32>
    tpu.vector_store %arg18[%c0_182, %c56_183], %233 {strides = array<i32>} : memref<8x112xf32, #tpu.memory_space<vmem>>, vector<8x8xf32>,
    %235 = vector.extract_strided_slice %212 {offsets = [0, 8], sizes = [8, 8], strides = [1, 1]} : vector<8x24xf32> to vector<8x8xf32>
    %cst_184 = arith.constant dense<0.000000e+00> : vector<8x16xf32>
    %236 = tpu.matmul %235, %7, %cst_184 {dimension_numbers = #tpu.dot_dimension_numbers<[1], [0], [0], [1], [0, 0, 1, 1], [], []>, precision = #tpu.contract_precision<fp32>} : vector<8x8xf32>, vector<8x16xf32>, vector<8x16xf32> -> vector<8x16xf32>
    %237 = vector.extract_strided_slice %236 {offsets = [0, 0], sizes = [8, 8], strides = [1, 1]} : vector<8x16xf32> to vector<8x8xf32>
    %c0_185 = arith.constant 0 : index
    %c8_186 = arith.constant 8 : index
    %238 = vector.load %arg18[%c0_185, %c8_186] : memref<8x112xf32, #tpu.memory_space<vmem>>, vector<8x8xf32>
    tpu.vector_store %arg18[%c0_185, %c8_186], %237 {strides = array<i32>} : memref<8x112xf32, #tpu.memory_space<vmem>>, vector<8x8xf32>,
    %239 = vector.extract_strided_slice %236 {offsets = [0, 8], sizes = [8, 8], strides = [1, 1]} : vector<8x16xf32> to vector<8x8xf32>
    %c0_187 = arith.constant 0 : index
    %c64_188 = arith.constant 64 : index
    %240 = vector.load %arg18[%c0_187, %c64_188] : memref<8x112xf32, #tpu.memory_space<vmem>>, vector<8x8xf32>
    tpu.vector_store %arg18[%c0_187, %c64_188], %239 {strides = array<i32>} : memref<8x112xf32, #tpu.memory_space<vmem>>, vector<8x8xf32>,
    %241 = vector.extract_strided_slice %212 {offsets = [0, 16], sizes = [8, 8], strides = [1, 1]} : vector<8x24xf32> to vector<8x8xf32>
    %cst_189 = arith.constant dense<0.000000e+00> : vector<8x16xf32>
    %242 = tpu.matmul %241, %7, %cst_189 {dimension_numbers = #tpu.dot_dimension_numbers<[1], [0], [0], [1], [0, 0, 1, 1], [], []>, precision = #tpu.contract_precision<fp32>} : vector<8x8xf32>, vector<8x16xf32>, vector<8x16xf32> -> vector<8x16xf32>
    %243 = vector.extract_strided_slice %242 {offsets = [0, 0], sizes = [8, 8], strides = [1, 1]} : vector<8x16xf32> to vector<8x8xf32>
    %c0_190 = arith.constant 0 : index
    %c16_191 = arith.constant 16 : index
    %244 = vector.load %arg18[%c0_190, %c16_191] : memref<8x112xf32, #tpu.memory_space<vmem>>, vector<8x8xf32>
    tpu.vector_store %arg18[%c0_190, %c16_191], %243 {strides = array<i32>} : memref<8x112xf32, #tpu.memory_space<vmem>>, vector<8x8xf32>,
    %245 = vector.extract_strided_slice %242 {offsets = [0, 8], sizes = [8, 8], strides = [1, 1]} : vector<8x16xf32> to vector<8x8xf32>
    %c0_192 = arith.constant 0 : index
    %c72_193 = arith.constant 72 : index
    %246 = vector.load %arg18[%c0_192, %c72_193] : memref<8x112xf32, #tpu.memory_space<vmem>>, vector<8x8xf32>
    tpu.vector_store %arg18[%c0_192, %c72_193], %245 {strides = array<i32>} : memref<8x112xf32, #tpu.memory_space<vmem>>, vector<8x8xf32>,
    %c2_194 = arith.constant 2 : index
    %c1_195 = arith.constant 1 : index
    %c0_196 = arith.constant 0 : index
    %c0_197 = arith.constant 0 : index
    %247 = vector.load %arg9[%c2_194, %c1_195, %c0_196, %c0_197] : memref<4x3x8x8xf32, #tpu.memory_space<vmem>>, vector<1x1x8x8xf32>
    %248 = vector.shape_cast %247 : vector<1x1x8x8xf32> to vector<8x8xf32>
    %c0_198 = arith.constant 0 : index
    %c0_199 = arith.constant 0 : index
    %249 = vector.load %arg18[%c0_198, %c0_199] : memref<8x112xf32, #tpu.memory_space<vmem>>, vector<8x24xf32>
    %cst_200 = arith.constant dense<0.000000e+00> : vector<8x24xf32>
    %250 = tpu.matmul %248, %249, %cst_200 {dimension_numbers = #tpu.dot_dimension_numbers<[1], [0], [0], [1], [0, 0, 1, 1], [], []>, precision = #tpu.contract_precision<fp32>} : vector<8x8xf32>, vector<8x24xf32>, vector<8x24xf32> -> vector<8x24xf32>
    %251 = arith.addf %228, %250 : vector<8x24xf32>
    %c2_201 = arith.constant 2 : index
    %c2_202 = arith.constant 2 : index
    %c0_203 = arith.constant 0 : index
    %c0_204 = arith.constant 0 : index
    %252 = vector.load %arg9[%c2_201, %c2_202, %c0_203, %c0_204] : memref<4x3x8x8xf32, #tpu.memory_space<vmem>>, vector<1x1x8x8xf32>
    %253 = vector.shape_cast %252 : vector<1x1x8x8xf32> to vector<8x8xf32>
    %c0_205 = arith.constant 0 : index
    %c56_206 = arith.constant 56 : index
    %254 = vector.load %arg18[%c0_205, %c56_206] : memref<8x112xf32, #tpu.memory_space<vmem>>, vector<8x24xf32>
    %cst_207 = arith.constant dense<0.000000e+00> : vector<8x24xf32>
    %255 = tpu.matmul %253, %254, %cst_207 {dimension_numbers = #tpu.dot_dimension_numbers<[1], [0], [0], [1], [0, 0, 1, 1], [], []>, precision = #tpu.contract_precision<fp32>} : vector<8x8xf32>, vector<8x24xf32>, vector<8x24xf32> -> vector<8x24xf32>
    %256 = arith.addf %251, %255 : vector<8x24xf32>
    %257 = vector.extract_strided_slice %188 {offsets = [0, 8], sizes = [8, 24], strides = [1, 1]} : vector<8x32xf32> to vector<8x24xf32>
    %258 = arith.addf %256, %257 : vector<8x24xf32>
    %c2_208 = arith.constant 2 : index
    %c0_209 = arith.constant 0 : index
    %c0_210 = arith.constant 0 : index
    %259 = vector.load %arg11[%c2_208, %c0_209, %c0_210] : memref<4x8x1xf32, #tpu.memory_space<vmem>>, vector<1x8x1xf32>
    %260 = vector.shape_cast %259 : vector<1x8x1xf32> to vector<8x1xf32>
    %261 = vector.broadcast %260 : vector<8x1xf32> to vector<8x24xf32>
    %262 = arith.mulf %258, %261 : vector<8x24xf32>
    %c2_211 = arith.constant 2 : index
    %c0_212 = arith.constant 0 : index
    %c0_213 = arith.constant 0 : index
    %263 = vector.load %arg12[%c2_211, %c0_212, %c0_213] : memref<4x8x1xf32, #tpu.memory_space<vmem>>, vector<1x8x1xf32>
    %264 = vector.shape_cast %263 : vector<1x8x1xf32> to vector<8x1xf32>
    %265 = vector.broadcast %264 : vector<8x1xf32> to vector<8x24xf32>
    %266 = arith.addf %262, %265 : vector<8x24xf32>
    %c3 = arith.constant 3 : index
    %c0_214 = arith.constant 0 : index
    %c0_215 = arith.constant 0 : index
    %c0_216 = arith.constant 0 : index
    %267 = vector.load %arg5[%c3, %c0_214, %c0_215, %c0_216] : memref<4x2x16x8xf32, #tpu.memory_space<vmem>>, vector<1x1x16x8xf32>
    %268 = vector.shape_cast %267 : vector<1x1x16x8xf32> to vector<16x8xf32>
    %269 = vector.extract_strided_slice %266 {offsets = [0, 0], sizes = [8, 8], strides = [1, 1]} : vector<8x24xf32> to vector<8x8xf32>
    %cst_217 = arith.constant dense<0.000000e+00> : vector<16x8xf32>
    %270 = tpu.matmul %268, %269, %cst_217 {dimension_numbers = #tpu.dot_dimension_numbers<[1], [0], [0], [1], [0, 0, 1, 1], [], []>, precision = #tpu.contract_precision<fp32>} : vector<16x8xf32>, vector<8x8xf32>, vector<16x8xf32> -> vector<16x8xf32>
    %c3_218 = arith.constant 3 : index
    %c1_219 = arith.constant 1 : index
    %c0_220 = arith.constant 0 : index
    %c0_221 = arith.constant 0 : index
    %271 = vector.load %arg5[%c3_218, %c1_219, %c0_220, %c0_221] : memref<4x2x16x8xf32, #tpu.memory_space<vmem>>, vector<1x1x16x8xf32>
    %272 = vector.shape_cast %271 : vector<1x1x16x8xf32> to vector<16x8xf32>
    %273 = vector.extract_strided_slice %266 {offsets = [0, 16], sizes = [8, 8], strides = [1, 1]} : vector<8x24xf32> to vector<8x8xf32>
    %cst_222 = arith.constant dense<0.000000e+00> : vector<16x8xf32>
    %274 = tpu.matmul %272, %273, %cst_222 {dimension_numbers = #tpu.dot_dimension_numbers<[1], [0], [0], [1], [0, 0, 1, 1], [], []>, precision = #tpu.contract_precision<fp32>} : vector<16x8xf32>, vector<8x8xf32>, vector<16x8xf32> -> vector<16x8xf32>
    %275 = arith.addf %270, %274 : vector<16x8xf32>
    %c3_223 = arith.constant 3 : index
    %c0_224 = arith.constant 0 : index
    %c0_225 = arith.constant 0 : index
    %276 = vector.load %arg6[%c3_223, %c0_224, %c0_225] : memref<4x16x1xf32, #tpu.memory_space<vmem>>, vector<1x16x1xf32>
    %277 = vector.shape_cast %276 : vector<1x16x1xf32> to vector<16x1xf32>
    %278 = vector.broadcast %277 : vector<16x1xf32> to vector<16x8xf32>
    %279 = arith.addf %275, %278 : vector<16x8xf32>
    %280 = vector.extract_strided_slice %279 {offsets = [0, 0], sizes = [8, 8], strides = [1, 1]} : vector<16x8xf32> to vector<8x8xf32>
    %281 = math.tanh %280 : vector<8x8xf32>
    %282 = vector.extract_strided_slice %279 {offsets = [8, 0], sizes = [8, 8], strides = [1, 1]} : vector<16x8xf32> to vector<8x8xf32>
    %cst_226 = arith.constant 0.000000e+00 : f32
    %283 = vector.broadcast %cst_226 : f32 to vector<8x8xf32>
    %284 = arith.subf %283, %282 : vector<8x8xf32>
    %285 = math.exp %284 : vector<8x8xf32>
    %cst_227 = arith.constant 1.000000e+00 : f32
    %286 = vector.broadcast %cst_227 : f32 to vector<8x8xf32>
    %287 = arith.addf %286, %285 : vector<8x8xf32>
    %cst_228 = arith.constant 1.000000e+00 : f32
    %288 = vector.broadcast %cst_228 : f32 to vector<8x8xf32>
    %289 = arith.divf %288, %287 : vector<8x8xf32>
    %290 = arith.mulf %281, %289 : vector<8x8xf32>
    %c3_229 = arith.constant 3 : index
    %c0_230 = arith.constant 0 : index
    %c0_231 = arith.constant 0 : index
    %291 = vector.load %arg7[%c3_229, %c0_230, %c0_231] : memref<4x16x8xf32, #tpu.memory_space<vmem>>, vector<1x16x8xf32>
    %292 = vector.shape_cast %291 : vector<1x16x8xf32> to vector<16x8xf32>
    %cst_232 = arith.constant dense<0.000000e+00> : vector<16x8xf32>
    %293 = tpu.matmul %292, %290, %cst_232 {dimension_numbers = #tpu.dot_dimension_numbers<[1], [0], [0], [1], [0, 0, 1, 1], [], []>, precision = #tpu.contract_precision<fp32>} : vector<16x8xf32>, vector<8x8xf32>, vector<16x8xf32> -> vector<16x8xf32>
    %294 = arith.addf %221, %293 : vector<16x8xf32>
    %c3_233 = arith.constant 3 : index
    %c0_234 = arith.constant 0 : index
    %c0_235 = arith.constant 0 : index
    %295 = vector.load %arg8[%c3_233, %c0_234, %c0_235] : memref<4x16x1xf32, #tpu.memory_space<vmem>>, vector<1x16x1xf32>
    %296 = vector.shape_cast %295 : vector<1x16x1xf32> to vector<16x1xf32>
    %297 = vector.broadcast %296 : vector<16x1xf32> to vector<16x8xf32>
    %298 = arith.addf %294, %297 : vector<16x8xf32>
    %cst_236 = arith.constant dense<0.000000e+00> : vector<8x16xf32>
    %299 = tpu.matmul %290, %7, %cst_236 {dimension_numbers = #tpu.dot_dimension_numbers<[1], [0], [0], [1], [0, 0, 1, 1], [], []>, precision = #tpu.contract_precision<fp32>} : vector<8x8xf32>, vector<8x16xf32>, vector<8x16xf32> -> vector<8x16xf32>
    %300 = vector.extract_strided_slice %299 {offsets = [0, 0], sizes = [8, 8], strides = [1, 1]} : vector<8x16xf32> to vector<8x8xf32>
    %c0_237 = arith.constant 0 : index
    %c0_238 = arith.constant 0 : index
    %301 = vector.load %arg18[%c0_237, %c0_238] : memref<8x112xf32, #tpu.memory_space<vmem>>, vector<8x8xf32>
    tpu.vector_store %arg18[%c0_237, %c0_238], %300 {strides = array<i32>} : memref<8x112xf32, #tpu.memory_space<vmem>>, vector<8x8xf32>,
    %302 = vector.extract_strided_slice %299 {offsets = [0, 8], sizes = [8, 8], strides = [1, 1]} : vector<8x16xf32> to vector<8x8xf32>
    %c0_239 = arith.constant 0 : index
    %c56_240 = arith.constant 56 : index
    %303 = vector.load %arg18[%c0_239, %c56_240] : memref<8x112xf32, #tpu.memory_space<vmem>>, vector<8x8xf32>
    tpu.vector_store %arg18[%c0_239, %c56_240], %302 {strides = array<i32>} : memref<8x112xf32, #tpu.memory_space<vmem>>, vector<8x8xf32>,
    %cst_241 = arith.constant 0.000000e+00 : f32
    %304 = vector.broadcast %cst_241 : f32 to vector<16x8xf32>
    %305 = arith.maximumf %298, %304 : vector<16x8xf32>
    %c0_242 = arith.constant 0 : index
    %c0_243 = arith.constant 0 : index
    %306 = vector.load %arg13[%c0_242, %c0_243] : memref<16x16xf32, #tpu.memory_space<vmem>>, vector<16x16xf32>
    %cst_244 = arith.constant dense<0.000000e+00> : vector<16x8xf32>
    %307 = tpu.matmul %306, %305, %cst_244 {dimension_numbers = #tpu.dot_dimension_numbers<[1], [0], [0], [1], [0, 0, 1, 1], [], []>, precision = #tpu.contract_precision<fp32>} : vector<16x16xf32>, vector<16x8xf32>, vector<16x8xf32> -> vector<16x8xf32>
    %c0_245 = arith.constant 0 : index
    %c0_246 = arith.constant 0 : index
    %308 = vector.load %arg14[%c0_245, %c0_246] : memref<16x1xf32, #tpu.memory_space<vmem>>, vector<16x1xf32>
    %309 = vector.broadcast %308 : vector<16x1xf32> to vector<16x8xf32>
    %310 = arith.addf %307, %309 : vector<16x8xf32>
    %cst_247 = arith.constant 0.000000e+00 : f32
    %311 = vector.broadcast %cst_247 : f32 to vector<16x8xf32>
    %312 = arith.maximumf %310, %311 : vector<16x8xf32>
    %c0_248 = arith.constant 0 : index
    %c0_249 = arith.constant 0 : index
    %313 = vector.load %arg15[%c0_248, %c0_249] : memref<6x16xf32, #tpu.memory_space<vmem>>, vector<6x16xf32>
    %cst_250 = arith.constant dense<0.000000e+00> : vector<6x8xf32>
    %314 = tpu.matmul %313, %312, %cst_250 {dimension_numbers = #tpu.dot_dimension_numbers<[1], [0], [0], [1], [0, 0, 1, 1], [], []>, precision = #tpu.contract_precision<fp32>} : vector<6x16xf32>, vector<16x8xf32>, vector<6x8xf32> -> vector<6x8xf32>
    %c0_251 = arith.constant 0 : index
    %c0_252 = arith.constant 0 : index
    %315 = vector.load %arg16[%c0_251, %c0_252] : memref<6x1xf32, #tpu.memory_space<vmem>>, vector<6x1xf32>
    %316 = vector.broadcast %315 : vector<6x1xf32> to vector<6x8xf32>
    %317 = arith.addf %314, %316 : vector<6x8xf32>
    %c0_253 = arith.constant 0 : index
    %c0_254 = arith.constant 0 : index
    %c0_255 = arith.constant 0 : index
    %318 = vector.load %arg17[%c0_253, %c0_254, %c0_255] : memref<1x6x8xf32, #tpu.memory_space<vmem>>, vector<1x6x8xf32>
    %319 = vector.shape_cast %318 : vector<1x6x8xf32> to vector<6x8xf32>
    %320 = vector.shape_cast %317 : vector<6x8xf32> to vector<1x6x8xf32>
    tpu.vector_store %arg17[%c0_253, %c0_254, %c0_255], %320 {strides = array<i32>} : memref<1x6x8xf32, #tpu.memory_space<vmem>>, vector<1x6x8xf32>,
    return
  }
  func.func @transform_0(%arg0: i32) -> (i32, i32, i32) {
    %c0_i32 = arith.constant 0 : i32
    %c0_i32_0 = arith.constant 0 : i32
    %c0_i32_1 = arith.constant 0 : i32
    return %arg0, %c0_i32, %c0_i32_0 : i32, i32, i32
  }
  func.func @transform_1(%arg0: i32) -> (i32, i32) {
    %c0_i32 = arith.constant 0 : i32
    %c0_i32_0 = arith.constant 0 : i32
    %c0_i32_1 = arith.constant 0 : i32
    return %c0_i32, %c0_i32_0 : i32, i32
  }
  func.func @transform_2(%arg0: i32) -> (i32, i32) {
    %c0_i32 = arith.constant 0 : i32
    %c0_i32_0 = arith.constant 0 : i32
    %c0_i32_1 = arith.constant 0 : i32
    return %c0_i32, %c0_i32_0 : i32, i32
  }
  func.func @transform_3(%arg0: i32) -> (i32, i32) {
    %c0_i32 = arith.constant 0 : i32
    %c0_i32_0 = arith.constant 0 : i32
    %c0_i32_1 = arith.constant 0 : i32
    return %c0_i32, %c0_i32_0 : i32, i32
  }
  func.func @transform_4(%arg0: i32) -> (i32, i32, i32, i32) {
    %c0_i32 = arith.constant 0 : i32
    %c0_i32_0 = arith.constant 0 : i32
    %c0_i32_1 = arith.constant 0 : i32
    %c0_i32_2 = arith.constant 0 : i32
    %c0_i32_3 = arith.constant 0 : i32
    return %c0_i32, %c0_i32_0, %c0_i32_1, %c0_i32_2 : i32, i32, i32, i32
  }
  func.func @transform_5(%arg0: i32) -> (i32, i32, i32) {
    %c0_i32 = arith.constant 0 : i32
    %c0_i32_0 = arith.constant 0 : i32
    %c0_i32_1 = arith.constant 0 : i32
    %c0_i32_2 = arith.constant 0 : i32
    return %c0_i32, %c0_i32_0, %c0_i32_1 : i32, i32, i32
  }
  func.func @transform_6(%arg0: i32) -> (i32, i32, i32) {
    %c0_i32 = arith.constant 0 : i32
    %c0_i32_0 = arith.constant 0 : i32
    %c0_i32_1 = arith.constant 0 : i32
    %c0_i32_2 = arith.constant 0 : i32
    return %c0_i32, %c0_i32_0, %c0_i32_1 : i32, i32, i32
  }
  func.func @transform_7(%arg0: i32) -> (i32, i32, i32) {
    %c0_i32 = arith.constant 0 : i32
    %c0_i32_0 = arith.constant 0 : i32
    %c0_i32_1 = arith.constant 0 : i32
    %c0_i32_2 = arith.constant 0 : i32
    return %c0_i32, %c0_i32_0, %c0_i32_1 : i32, i32, i32
  }
  func.func @transform_8(%arg0: i32) -> (i32, i32, i32, i32) {
    %c0_i32 = arith.constant 0 : i32
    %c0_i32_0 = arith.constant 0 : i32
    %c0_i32_1 = arith.constant 0 : i32
    %c0_i32_2 = arith.constant 0 : i32
    %c0_i32_3 = arith.constant 0 : i32
    return %c0_i32, %c0_i32_0, %c0_i32_1, %c0_i32_2 : i32, i32, i32, i32
  }
  func.func @transform_9(%arg0: i32) -> (i32, i32, i32) {
    %c0_i32 = arith.constant 0 : i32
    %c0_i32_0 = arith.constant 0 : i32
    %c0_i32_1 = arith.constant 0 : i32
    %c0_i32_2 = arith.constant 0 : i32
    return %c0_i32, %c0_i32_0, %c0_i32_1 : i32, i32, i32
  }
  func.func @transform_10(%arg0: i32) -> (i32, i32, i32) {
    %c0_i32 = arith.constant 0 : i32
    %c0_i32_0 = arith.constant 0 : i32
    %c0_i32_1 = arith.constant 0 : i32
    %c0_i32_2 = arith.constant 0 : i32
    return %c0_i32, %c0_i32_0, %c0_i32_1 : i32, i32, i32
  }
  func.func @transform_11(%arg0: i32) -> (i32, i32, i32) {
    %c0_i32 = arith.constant 0 : i32
    %c0_i32_0 = arith.constant 0 : i32
    %c0_i32_1 = arith.constant 0 : i32
    %c0_i32_2 = arith.constant 0 : i32
    return %c0_i32, %c0_i32_0, %c0_i32_1 : i32, i32, i32
  }
  func.func @transform_12(%arg0: i32) -> (i32, i32) {
    %c0_i32 = arith.constant 0 : i32
    %c0_i32_0 = arith.constant 0 : i32
    %c0_i32_1 = arith.constant 0 : i32
    return %c0_i32, %c0_i32_0 : i32, i32
  }
  func.func @transform_13(%arg0: i32) -> (i32, i32) {
    %c0_i32 = arith.constant 0 : i32
    %c0_i32_0 = arith.constant 0 : i32
    %c0_i32_1 = arith.constant 0 : i32
    return %c0_i32, %c0_i32_0 : i32, i32
  }
  func.func @transform_14(%arg0: i32) -> (i32, i32) {
    %c0_i32 = arith.constant 0 : i32
    %c0_i32_0 = arith.constant 0 : i32
    %c0_i32_1 = arith.constant 0 : i32
    return %c0_i32, %c0_i32_0 : i32, i32
  }
  func.func @transform_15(%arg0: i32) -> (i32, i32) {
    %c0_i32 = arith.constant 0 : i32
    %c0_i32_0 = arith.constant 0 : i32
    %c0_i32_1 = arith.constant 0 : i32
    return %c0_i32, %c0_i32_0 : i32, i32
  }
  func.func @transform_16(%arg0: i32) -> (i32, i32, i32) {
    %c0_i32 = arith.constant 0 : i32
    %c0_i32_0 = arith.constant 0 : i32
    %c0_i32_1 = arith.constant 0 : i32
    return %arg0, %c0_i32, %c0_i32_0 : i32, i32, i32
  }
}

</mosaic_0001>

<bundles_post_ra>
// kernel: predictor_forward.1
= control target key start
LH: loop header
LB: loop body
LE: loop exit
PB: predicated region body
PF: predicated region fallthrough
CT: control target
= control target key end

     0   :  { %s21034_s21 = smov 0   ;;  %s22170_s0 = inlined_call_operand.vmem [shape: f32[2,4,56], index: 0, kind: input, shape index: {}]   ;;  %s22171_s1 = inlined_call_operand.vmem [shape: f32[8,16], index: 1, kind: input, shape index: {}]   ;;  %s22172_s2 = inlined_call_operand.vmem [shape: f32[8,4], index: 2, kind: input, shape index: {}]   ;;  %s22173_s3 = inlined_call_operand.vmem [shape: f32[8,1], index: 3, kind: input, shape index: {}]   ;;  %s22174_s4 = inlined_call_operand.vmem [shape: f32[4,2,16,8], index: 4, kind: input, shape index: {}]   ;;  %s22175_s5 = inlined_call_operand.vmem [shape: f32[4,16,1], index: 5, kind: input, shape index: {}]   ;;  %s22176_s6 = inlined_call_operand.vmem [shape: f32[4,16,8], index: 6, kind: input, shape index: {}]   ;;  %s22177_s7 = inlined_call_operand.vmem [shape: f32[4,16,1], index: 7, kind: input, shape index: {}]   ;;  %s22178_s8 = inlined_call_operand.vmem [shape: f32[4,3,8,8], index: 8, kind: input, shape index: {}]   ;;  %s22179_s9 = inlined_call_operand.vmem [shape: f32[4,8,1], index: 9, kind: input, shape index: {}]   ;;  %s22180_s10 = inlined_call_operand.vmem [shape: f32[4,8,1], index: 10, kind: input, shape index: {}]   ;;  %s22181_s11 = inlined_call_operand.vmem [shape: f32[4,8,1], index: 11, kind: input, shape index: {}]   ;;  %s22182_s12 = inlined_call_operand.vmem [shape: f32[16,16], index: 12, kind: input, shape index: {}]   ;;  %s22183_s13 = inlined_call_operand.vmem [shape: f32[16,1], index: 13, kind: input, shape index: {}]   ;;  %s22184_s14 = inlined_call_operand.vmem [shape: f32[6,16], index: 14, kind: input, shape index: {}]   ;;  %s22185_s15 = inlined_call_operand.vmem [shape: f32[6,1], index: 15, kind: input, shape index: {}]   ;;  %s22186_s16 = inlined_call_operand.vmem [shape: f32[2,6,8], index: 16, kind: output, shape index: {}]  }
   0x1   :  { %22202 = sst [smem:[#allocation3_spill]] %s22170_s0 }
   0x2   :  { %22203 = sst [smem:[#allocation4_spill]] %s22171_s1 }
   0x3 LB: > { %s18748_s22 = sadd.s32 4294967295, %s20928_s21   ;;  %p18752_p0 = scmp.ge.s32.totalorder %s20928_s21, 1  ;;  %s20928_s21 = sphi %s21034_s21, %s26_s21  }
   0x4   : > { %p461_p1 = scmp.lt.s32.totalorder %s20928_s21, 3 }
   0x6   : > { %p462_p2 = pnand %p18752_p0, %p461_p1 }
   0x7   : > { %p509_p3 = scmp.lt.s32.totalorder (!%p462_p2), %s18748_s22, 1  ;;  %v517_v0 = vld [vmem:[%s22172_s2] sm:$0xff] (!%p462_p2)  ;;  %vm525_vm0 = vcmask (!%p462_p2), 31744   ;;  %v20930_v1 = vmov (!%p462_p2), 0.0   ;;  %vm20931_vm1 = vmmov (!%p462_p2), 0   ;;  %v20932_v5 = vmov (!%p462_p2), 0  }
   0x8   : > { %465 = sbr.rel (%p462_p2) target bundleno = 5667 (0x1623), region = 84  ;;  %19349 = vmatprep.subr.mxu0 (!%p462_p2), %v20930_v1  ;;  %19351 = vmatprep.mubr.msk.f32.mxu0 (!%p462_p2), %vm20931_vm1, %v20930_v1  ;;  %v527_v2 = vsel (!%p462_p2), %vm525_vm0, %v517_v0, 0  ;;  %v519_v3 = vld [vmem:[%s22173_s3] sm:$0xff] (!%p462_p2)  ;;  %vm529_vm2 = vcmask (!%p462_p2), 1043456   ;;  %s22204_s30 = sld [smem:[#allocation3_spill]] (!%p462_p2)  ;;  %v18755_v17 = vld [vmem:[%s22174_s4 + $0x10] sm:$0xff] (!%p462_p2) }
   0x9   : > { %v599_v4 = vand.u32 (!%p462_p2), 4294901760, %v527_v2  ;;  %20896 = vset.pattern.permute.xlu0 (!%p462_p2), %v20932_v5  ;;  %20897 = vset.pattern.permute.xlu1 (!%p462_p2), %v20932_v5  ;;  %vm989_vm3 = vcmask (!%p462_p2), 64512   ;;  %s22198_s19 = smov (!%p462_p2), 120   ;;  %v1981_v28 = vld [vmem:[%s22175_s5 + $0x8] sm:$0xff] (!%p462_p2)  ;;  %v1980_v29 = vld [vmem:[%s22175_s5] sm:$0xff] (!%p462_p2)  ;;  %v18756_v30 = vld [vmem:[%s22174_s4 + $0x18] sm:$0xff] (!%p462_p2) }
   0xa   : > { %522 = vperm.xlu0 (!%p462_p2), %20896, %v519_v3   ;;  %v991_v18 = vsel (!%p462_p2), %vm989_vm3, %v18755_v17, 0  ;;  %1989 = vperm.xlu1 (!%p462_p2), %20897, %v1981_v28   ;;  %v994_v31 = vsel (!%p462_p2), %vm989_vm3, %v18756_v30, 0  ;;  %v980_v43 = vld [vmem:[%s22174_s4] sm:$0xff] (!%p462_p2)  ;;  %v981_v46 = vld [vmem:[%s22174_s4 + $0x8] sm:$0xff] (!%p462_p2)  ;;  %s20934_s24 = smov (!%p462_p2), 88   ;;  %s20935_s25 = smov (!%p462_p2), 104  }
   0xb   : > { %v600_v6 = vsub.f32 (!%p462_p2), %v527_v2, %v599_v4  ;;  %v1062_v19 = vand.u32 (!%p462_p2), 4294901760, %v991_v18  ;;  %v1072_v32 = vand.u32 (!%p462_p2), 4294901760, %v994_v31  ;;  %v1486_v44 = vsel (!%p462_p2), %vm989_vm3, %v980_v43, 0  ;;  %s22200_s26 = smov (!%p462_p2), 112   ;;  %s22205_s1 = sld [smem:[#allocation4_spill]] (!%p462_p2) }
   0xc   : > { %v1557_v45 = vand.u32 (!%p462_p2), 4294901760, %v1486_v44  ;;  %v1489_v49 = vsel (!%p462_p2), %vm989_vm3, %v981_v46, 0  ;;  %s22190_s17 = smov (!%p462_p2), 56   ;;  %s22188_s18 = smov (!%p462_p2), 8   ;;  %vm3424_vm4 = vcmask (!%p462_p2), 523712   ;;  %vm3880_vm5 = vcmask (!%p462_p2), 130112  }
   0xd   : > { %v601_v8 = vand.u32 (!%p462_p2), 4294901760, %v600_v6  ;;  %v1063_v20 = vsub.f32 (!%p462_p2), %v991_v18, %v1062_v19  ;;  %v1073_v33 = vsub.f32 (!%p462_p2), %v994_v31, %v1072_v32  ;;  %v1567_v51 = vand.u32 (!%p462_p2), 4294901760, %v1489_v49  ;;  %v2515_v18 = vld [vmem:[%s22178_s8] sm:$0xff] (!%p462_p2)  ;;  %v2003_v31 = vld [vmem:[%s22176_s6 + $0x8] sm:$0xff] (!%p462_p2)  ;;  %s20940_s20 = smov (!%p462_p2), 72   ;;  %s22187_s23 = smov (!%p462_p2), 24  }
   0xe   : > { %1984 = vperm.xlu1 (!%p462_p2), %20897, %v1980_v29   ;;  %v1558_v48 = vsub.f32 (!%p462_p2), %v1486_v44, %v1557_v45  ;;  %s22192_s28 = smov (!%p462_p2), 64   ;;  %s22196_s29 = smov (!%p462_p2), 16   ;;  %vm3885_vm6 = vcmask (!%p462_p2), 589312   ;;  %vm4341_vm7 = vcmask (!%p462_p2), 195712   ;;  %vm4346_vm8 = vcmask (!%p462_p2), 654912  }
   0xf   : > { %s22215_s22 = smov (!%p509_p3, %s18748_s22), 1  ;;  %v602_v11 = vsub.f32 %v600_v6, %v601_v8  ;;  %v1064_v21 = vand.u32 4294901760, %v1063_v20  ;;  %v1074_v34 = vand.u32 4294901760, %v1073_v33  ;;  %v1568_v54 = vsub.f32 %v1489_v49, %v1567_v51 }
  0x10   : > { %s18753_s27 = sshll.u32 %s22215_s22, 2  ;;  %v1559_v52 = vand.u32 4294901760, %v1558_v48  ;;  %vm4802_vm9 = vcmask 261312   ;;  %vm4807_vm10 = vcmask 720512   ;;  %vm5263_vm11 = vcmask 326912  }
  0x11   : > { %s512_s0 = scalar_lea.vmem %s22204_s30, %s18753_s27  ;;  %v603_v13 = vand.u32 4294901760, %v602_v11  ;;  %v1065_v22 = vsub.f32 %v1063_v20, %v1064_v21  ;;  %v1075_v35 = vsub.f32 %v1073_v33, %v1074_v34  ;;  %v1569_v57 = vand.u32 4294901760, %v1568_v54  ;;  %s20937_s27 = smov 96   ;;  %v979_v29 = vld [vmem:[%s22205_s1] sm:$0xff] }
  0x12   : > { %v518_v7 = vld [vmem:[%s512_s0] sm:$0xf]  ;;  %v1560_v55 = vsub.f32 %v1558_v48, %v1559_v52  ;;  %v21161_v30 = vand.u32 4294901760, %v979_v29  ;;  %s20945_s30 = smov 80   ;;  %s20946_s0 = smov 32   ;;  %vm5268_vm12 = vcmask 786112  }
  0x13   : > { %v531_v9 = vsel %vm529_vm2, %v518_v7, 0  ;;  %v1066_v23 = vand.u32 4294901760, %v1065_v22  ;;  %v1076_v38 = vand.u32 4294901760, %v1075_v35  ;;  %v1570_v60 = vsub.f32 %v1568_v54, %v1569_v57 }
  0x14   : > { %v534_v10 = vand.u32 4294901760, %v531_v9  ;;  %v1561_v58 = vand.u32 4294901760, %v1560_v55  ;;  %vm5722_vm13 = vcmask 392512   ;;  %vm5727_vm14 = vcmask 851712  }
  0x15   : > { %19381 = vmatprep.mubr.f32.mxu1 %v1066_v23  ;;  %v1571_v61 = vand.u32 4294901760, %v1570_v60  ;;  %vm17713_vm15 = vcmask 130048   ;;  %vm18693_vm0 = vcmask 62464  }
  0x16   : > { %19350 = vmatpush3.msra.mxu0 %v534_v10  ;;  %v611_v12 = vsub.f32 %v531_v9, %v534_v10 }
  0x17   : > { %19354 = vmatprep.subr.mxu0 %v20930_v1  ;;  %19352 = vmatmul.mubr.f32.vlgmr.msra.gmra.mrb[0].mxu0 %v603_v13 }
  0x18   : > { %v612_v14 = vand.u32 4294901760, %v611_v12  ;;  %19356 = vmatprep.mubr.msk.f32.mxu0 %vm20931_vm1, %v20930_v1 }
  0x1a   : > { %v613_v15 = vsub.f32 %v611_v12, %v612_v14 }
  0x1c   : > { %v614_v16 = vand.u32 4294901760, %v613_v15 }
  0x1e   : > { %19355 = vmatpush3.msra.mxu0 %v614_v16 }
  0x1f   : > { %19359 = vmatprep.subr.mxu0 %v20930_v1  ;;  %19357 = vmatmul.mubr.f32.vlgmr.msra.gmra.mrb[0].mxu0 %v599_v4 }
  0x20   : > { %19360 = vmatpush3.msra.mxu0 %v611_v12  ;;  %19361 = vmatprep.mubr.msk.f32.mxu0 %vm20931_vm1, %v20930_v1 }
  0x21   : > { %19364 = vmatprep.subr.mxu0 %v20930_v1 }
  0x27   : > { %19362 = vmatmul.mubr.f32.vlgmr.msra.gmra.mrb[0].mxu0 %v600_v6  ;;  %v2002_v6 = vld [vmem:[%s22176_s6] sm:$0xff] }
  0x28   : > { %19365 = vmatpush3.msra.mxu0 %v534_v10  ;;  %19366 = vmatprep.mubr.msk.f32.mxu0 %vm20931_vm1, %v20930_v1  ;;  %v2021_v7 = vsel %vm989_vm3, %v2002_v6, 0 }
  0x29   : > { %19369 = vmatprep.subr.mxu0 %v20930_v1 }
  0x2f   : > { %19367 = vmatmul.mubr.f32.vlgmr.msra.gmra.mrb[0].mxu0 %v601_v8  ;;  %v21106_v8 = vand.u32 4294901760, %v2021_v7 }
  0x30   : > { %19370 = vmatpush3.msra.mxu0 %v612_v14  ;;  %19371 = vmatprep.mubr.msk.f32.mxu0 %vm20931_vm1, %v20930_v1 }
  0x31   : > { %19374 = vmatprep.subr.mxu0 %v20930_v1 }
  0x37   : > { %19372 = vmatmul.mubr.f32.vlgmr.msra.gmra.mrb[0].mxu0 %v599_v4 }
  0x38   : > { %19375 = vmatpush3.msra.mxu0 %v534_v10  ;;  %19376 = vmatprep.mubr.msk.f32.mxu0 %vm20931_vm1, %v20930_v1  ;;  %v21109_v10 = vsub.f32 %v2021_v7, %v21106_v8 }
  0x3a   : > { %v2094_v13 = vand.u32 4294901760, %v21109_v10 }
  0x3c   : > { %v2095_v14 = vsub.f32 %v21109_v10, %v2094_v13 }
  0x3e   : > { %v2096_v15 = vand.u32 4294901760, %v2095_v14 }
  0x3f   : > { %19377 = vmatmul.mubr.f32.vlgmr.msra.gmra.mrb[0].mxu0 %v599_v4 }
  0x40   : > { %19441 = vmatprep.mubr.f32.mxu0 %v2096_v15 }
  0x89   : > { %v523_v24 = vpop.permute.xlu0 %522  ;;  %v1990_v62 = vpop.permute.xlu1 %1989 }
  0x8d   : > { %v1985_v5 = vpop.permute.xlu1 %1984 }
 0x112   : > { %v975_v25 = vpop.f32.mrb[0].mxu0 }
 0x113   : > { %v20555_v26 = vadd.f32 %v975_v25, %v523_v24  ;;  %v19378_v27 = vpop.f32.mrb[1].mxu0 }
 0x115   : > { %986 = vrot.lane.b32.xlu0 %v20555_v26, %s22198_s19  ;;  %v1492_v47 = vand.u32 4294901760, %v20555_v26 }
 0x117   : > { %v1579_v50 = vsub.f32 %v20555_v26, %v1492_v47 }
 0x119   : > { %v1580_v53 = vand.u32 4294901760, %v1579_v50 }
 0x11b   : > { %v1581_v56 = vsub.f32 %v1579_v50, %v1580_v53 }
 0x11d   : > { %v1582_v59 = vand.u32 4294901760, %v1581_v56 }
 0x187   : > { %v21087_v36 = vpop.permute.xlu0 %986 }
 0x188   : > { %v997_v37 = vand.u32 4294901760, %v21087_v36 }
 0x18a   : > { %v1084_v39 = vsub.f32 %v21087_v36, %v997_v37  ;;  %19379 = vmatprep.subr.mxu1 %v997_v37 }
 0x18b   : > { %19380 = vmatpush3.msra.mxu1 %v997_v37 }
 0x18c   : > { %19382 = vmatmul.mubr.f32.vlgmr.msra.gmra.mrb[0].mxu1 %v1076_v38  ;;  %v1085_v40 = vand.u32 4294901760, %v1084_v39  ;;  %v21177_v38 = vsub.f32 %v979_v29, %v21161_v30 }
 0x18d   : > { %19386 = vmatprep.mubr.f32.mxu1 %v1062_v19 }
 0x18e   : > { %v1086_v41 = vsub.f32 %v1084_v39, %v1085_v40 }
 0x190   : > { %v1087_v42 = vand.u32 4294901760, %v1086_v41 }
 0x192   : > { %19384 = vmatprep.subr.mxu1 %v1087_v42 }
 0x193   : > { %19385 = vmatpush3.msra.mxu1 %v1087_v42 }
 0x194   : > { %19387 = vmatmul.mubr.f32.vlgmr.msra.gmra.mrb[0].mxu1 %v1072_v32  ;;  %19389 = vmatprep.subr.mxu1 %v1084_v39 }
 0x195   : > { %19390 = vmatpush3.msra.mxu1 %v1084_v39  ;;  %19391 = vmatprep.mubr.f32.mxu1 %v1063_v20 }
 0x196   : > { %19394 = vmatprep.subr.mxu1 %v997_v37 }
 0x19c   : > { %19392 = vmatmul.mubr.f32.vlgmr.msra.gmra.mrb[0].mxu1 %v1073_v33 }
 0x19d   : > { %19395 = vmatpush3.msra.mxu1 %v997_v37  ;;  %19396 = vmatprep.mubr.f32.mxu1 %v1064_v21  ;;  %v2523_v21 = vsel %vm989_vm3, %v2515_v18, 0 }
 0x19e   : > { %19399 = vmatprep.subr.mxu1 %v1085_v40  ;;  %v21132_v23 = vand.u32 4294901760, %v2523_v21 }
 0x1a0   : > { %v21143_v26 = vsub.f32 %v2523_v21, %v21132_v23 }
 0x1a2   : > { %v2593_v28 = vand.u32 4294901760, %v21143_v26 }
 0x1a4   : > { %19397 = vmatmul.mubr.f32.vlgmr.msra.gmra.mrb[0].mxu1 %v1074_v34  ;;  %v2594_v60 = vsub.f32 %v21143_v26, %v2593_v28 }
 0x1a5   : > { %19400 = vmatpush3.msra.mxu1 %v1085_v40  ;;  %19401 = vmatprep.mubr.f32.mxu1 %v1062_v19 }
 0x1a6   : > { %19404 = vmatprep.subr.mxu1 %v997_v37 }
 0x1ac   : > { %19402 = vmatmul.mubr.f32.vlgmr.msra.gmra.mrb[0].mxu1 %v1072_v32 }
 0x1ad   : > { %19405 = vmatpush3.msra.mxu1 %v997_v37  ;;  %19406 = vmatprep.mubr.f32.mxu1 %v1062_v19 }
 0x1ae   : > { %19409 = vmatprep.subr.mxu1 %v1492_v47 }
 0x1b4   : > { %19407 = vmatmul.mubr.f32.vlgmr.msra.gmra.mrb[0].mxu1 %v1072_v32  ;;  %v2024_v32 = vsel %vm989_vm3, %v2003_v31, 0 }
 0x1b5   : > { %19410 = vmatpush3.msra.mxu1 %v1492_v47  ;;  %19411 = vmatprep.mubr.f32.mxu1 %v1561_v58  ;;  %v21173_v33 = vand.u32 4294901760, %v2024_v32 }
 0x1b6   : > { %19414 = vmatprep.subr.mxu1 %v1582_v59 }
 0x1b7   : > { %v2103_v34 = vsub.f32 %v2024_v32, %v21173_v33 }
 0x1b9   : > { %v2104_v35 = vand.u32 4294901760, %v2103_v34 }
 0x1bb   : > { %v2105_v37 = vsub.f32 %v2103_v34, %v2104_v35 }
 0x1bc   : > { %19412 = vmatmul.mubr.f32.vlgmr.msra.gmra.mrb[0].mxu1 %v1571_v61 }
 0x1bd   : > { %19415 = vmatpush3.msra.mxu1 %v1582_v59  ;;  %19416 = vmatprep.mubr.f32.mxu1 %v1557_v45  ;;  %v2106_v43 = vand.u32 4294901760, %v2105_v37 }
 0x1be   : > { %19419 = vmatprep.subr.mxu1 %v1579_v50 }
 0x1c4   : > { %19417 = vmatmul.mubr.f32.vlgmr.msra.gmra.mrb[0].mxu1 %v1567_v51 }
 0x1c5   : > { %19420 = vmatpush3.msra.mxu1 %v1579_v50  ;;  %19421 = vmatprep.mubr.f32.mxu1 %v1558_v48 }
 0x1c6   : > { %19424 = vmatprep.subr.mxu1 %v1492_v47 }
 0x1cc   : > { %19422 = vmatmul.mubr.f32.vlgmr.msra.gmra.mrb[0].mxu1 %v1568_v54 }
 0x1cd   : > { %19425 = vmatpush3.msra.mxu1 %v1492_v47  ;;  %19426 = vmatprep.mubr.f32.mxu1 %v1559_v52 }
 0x1ce   : > { %19429 = vmatprep.subr.mxu1 %v1580_v53 }
 0x1d4   : > { %19427 = vmatmul.mubr.f32.vlgmr.msra.gmra.mrb[0].mxu1 %v1569_v57 }
 0x1d5   : > { %19430 = vmatpush3.msra.mxu1 %v1580_v53  ;;  %19431 = vmatprep.mubr.f32.mxu1 %v1557_v45 }
 0x1d6   : > { %19434 = vmatprep.subr.mxu1 %v1492_v47 }
 0x1dc   : > { %19432 = vmatmul.mubr.f32.vlgmr.msra.gmra.mrb[0].mxu1 %v1567_v51 }
 0x1dd   : > { %19435 = vmatpush3.msra.mxu1 %v1492_v47  ;;  %19436 = vmatprep.mubr.f32.mxu1 %v1557_v45  ;;  %v21186_v45 = vand.u32 4294901760, %v21177_v38 }
 0x1de   : > { %19474 = vmatprep.subr.mxu1 %v20930_v1 }
 0x1df   : > { %v3053_v50 = vsub.f32 %v21177_v38, %v21186_v45 }
 0x1e1   : > { %v21193_v55 = vand.u32 4294901760, %v3053_v50 }
 0x1e4   : > { %19437 = vmatmul.mubr.f32.vlgmr.msra.gmra.mrb[0].mxu1 %v1567_v51 }
 0x1e5   : > { %19476 = vmatprep.mubr.msk.f32.mxu1 %vm20931_vm1, %v20930_v1 }
 0x2b7   : > { %v19438_v63 = vpop.f32.mrb[0].mxu1 }
 0x2b8   : > { %v1993_v0 = vadd.f32 %v19438_v63, %v1990_v62  ;;  %v1970_v2 = vpop.f32.mrb[1].mxu1  ;;  %v2595_v63 = vand.u32 4294901760, %v2594_v60 }
 0x2b9   : > { %v1992_v9 = vadd.f32 %v1985_v5, %v1970_v2 }
 0x2ba   : > { %v1995_v3 = vsub.f32 0.0, %v1993_v0 }
 0x2bc   : > { %v1996_v4 = vmul.f32 1.442695, %v1995_v3 }
 0x2be   : > { %20898 = vpow2.f32 %v1996_v4 }
 0x2bf   : > { %20900 = vtanh.f32 %v1992_v9 }
 0x2c8   : > { %v20899_v11 = vpop.eup %20898 }
 0x2c9   : > { %v1998_v12 = vadd.f32 1.0, %v20899_v11  ;;  %v20901_v16 = vpop.eup %20900 }
 0x2cb   : > { %20902 = vrcp.f32 %v1998_v12 }
 0x2d5   : > { %v20903_v17 = vpop.eup %20902 }
 0x2d6   : > { %v21118_v19 = vmul.f32 %v20903_v17, %v20901_v16 }
 0x2d8   : > { %3426 = vrot.lane.b32.xlu1 %v21118_v19, %s22198_s19  ;;  %2017 = vrot.lane.b32.xlu0 %v21118_v19, %s20934_s24  ;;  %v21125_v20 = vand.u32 4294901760, %v21118_v19  ;;  %v2971_v59 = vsel %vm989_vm3, %v21118_v19, 0  ;;  %s22206_s19 = smov 120  }
 0x2d9   : > { %v21229_v62 = vand.u32 4294901760, %v2971_v59 }
 0x2da   : > { %v21130_v22 = vsub.f32 %v21118_v19, %v21125_v20 }
 0x2db   : > { %v3040_v2 = vsub.f32 %v2971_v59, %v21229_v62  ;;  %v18764_v59 = vld [vmem:[%s22175_s5 + $0x18] sm:$0xff] }
 0x2dc   : > { %4348 = vrot.lane.b32.xlu1 %v21118_v19, %s20935_s25  ;;  %3887 = vrot.lane.b32.xlu0 %v21118_v19, %s22200_s26  ;;  %v2604_v24 = vand.u32 4294901760, %v21130_v22 }
 0x2dd   : > { %v3041_v4 = vand.u32 4294901760, %v3040_v2 }
 0x2de   : > { %v2605_v25 = vsub.f32 %v21130_v22, %v2604_v24 }
 0x2df   : > { %v3042_v6 = vsub.f32 %v3040_v2, %v3041_v4 }
 0x2e0   : > { %4809 = vrot.lane.b32.xlu0 %v21118_v19, %s20937_s27  ;;  %v2606_v27 = vand.u32 4294901760, %v2605_v25  ;;  %s22194_s27 = smov 48  }
 0x2e1   : > { %v3043_v7 = vand.u32 4294901760, %v3042_v6 }
 0x2e2   : > { %19475 = vmatpush3.msra.mxu1 %v2606_v27 }
 0x2e3   : > { %19477 = vmatmul.mubr.f32.vlgmr.msra.gmra.mrb[2].mxu1 %v21132_v23  ;;  %19484 = vmatprep.subr.mxu1 %v20930_v1 }
 0x2e4   : > { %19485 = vmatpush3.msra.mxu1 %v21125_v20  ;;  %19486 = vmatprep.mubr.msk.f32.mxu1 %vm20931_vm1, %v20930_v1 }
 0x2e5   : > { %19494 = vmatprep.subr.mxu1 %v20930_v1 }
 0x2e7   : > { %19487 = vmatmul.mubr.f32.vlgmr.msra.gmra.mrb[4].mxu1 %v2593_v28 }
 0x2e8   : > { %19495 = vmatpush3.msra.mxu1 %v21125_v20  ;;  %19496 = vmatprep.mubr.msk.f32.mxu1 %vm20931_vm1, %v20930_v1 }
 0x2e9   : > { %19529 = vmatprep.subr.mxu1 %v20930_v1 }
 0x2eb   : > { %19497 = vmatmul.mubr.f32.vlgmr.msra.gmra.mrb[6].mxu1 %v21132_v23 }
 0x2ec   : > { %19530 = vmatpush3.msra.mxu1 %v21161_v30  ;;  %19531 = vmatprep.mubr.msk.f32.mxu1 %vm20931_vm1, %v20930_v1 }
 0x2ed   : > { %19534 = vmatprep.subr.mxu1 %v20930_v1 }
 0x34a   : > { %v3427_v39 = vpop.permute.xlu1 %3426  ;;  %v21179_v40 = vpop.permute.xlu0 %2017 }
 0x34b   : > { %v3428_v41 = vsel %vm989_vm3, %v3427_v39, 0  ;;  %v2027_v42 = vand.u32 4294901760, %v21179_v40 }
 0x34c   : > { %v21183_v44 = vand.u32 4294901760, %v3428_v41 }
 0x34d   : > { %v2114_v46 = vsub.f32 %v21179_v40, %v2027_v42  ;;  %19439 = vmatprep.subr.mxu0 %v2027_v42 }
 0x34e   : > { %v3497_v47 = vsub.f32 %v3428_v41, %v21183_v44  ;;  %19440 = vmatpush3.msra.mxu0 %v2027_v42  ;;  %v4349_v56 = vpop.permute.xlu1 %4348  ;;  %v3888_v9 = vpop.permute.xlu0 %3887 }
 0x34f   : > { %19442 = vmatmul.mubr.f32.vlgmr.msra.gmra.mrb[2].mxu0 %v2106_v43  ;;  %v2115_v48 = vand.u32 4294901760, %v2114_v46  ;;  %v4350_v57 = vsel %vm989_vm3, %v4349_v56, 0  ;;  %v3889_v11 = vsel %vm989_vm3, %v3888_v9, 0 }
 0x350   : > { %v3498_v49 = vand.u32 4294901760, %v3497_v47  ;;  %19446 = vmatprep.mubr.f32.mxu0 %v21106_v8  ;;  %v21216_v58 = vand.u32 4294901760, %v4350_v57 }
 0x351   : > { %v2116_v51 = vsub.f32 %v2114_v46, %v2115_v48 }
 0x352   : > { %v3499_v52 = vsub.f32 %v3497_v47, %v3498_v49  ;;  %v4419_v61 = vsub.f32 %v4350_v57, %v21216_v58  ;;  %v4810_v25 = vpop.permute.xlu0 %4809  ;;  %v2516_v57 = vld [vmem:[%s22179_s9] sm:$0xff] }
 0x353   : > { %v2117_v53 = vand.u32 4294901760, %v2116_v51 }
 0x354   : > { %v3500_v54 = vand.u32 4294901760, %v3499_v52  ;;  %v4420_v0 = vand.u32 4294901760, %v4419_v61 }
 0x355   : > { %19444 = vmatprep.subr.mxu0 %v2117_v53 }
 0x356   : > { %19445 = vmatpush3.msra.mxu0 %v2117_v53  ;;  %19532 = vmatmul.mubr.f32.vlgmr.msra.gmra.mrb[8].mxu1 %v3500_v54  ;;  %v4421_v3 = vsub.f32 %v4419_v61, %v4420_v0 }
 0x357   : > { %19447 = vmatmul.mubr.f32.vlgmr.msra.gmra.mrb[2].mxu0 %v21173_v33  ;;  %19449 = vmatprep.subr.mxu0 %v2114_v46 }
 0x358   : > { %19450 = vmatpush3.msra.mxu0 %v2114_v46  ;;  %19535 = vmatpush3.msra.mxu1 %v21193_v55  ;;  %v4422_v5 = vand.u32 4294901760, %v4421_v3 }
 0x359   : > { %19454 = vmatprep.subr.mxu0 %v2027_v42  ;;  %19536 = vmatprep.mubr.msk.f32.mxu1 %vm20931_vm1, %v20930_v1 }
 0x35a   : > { %19451 = vmatprep.mubr.f32.mxu0 %v21109_v10  ;;  %19539 = vmatprep.subr.mxu1 %v20930_v1 }
 0x35e   : > { %19537 = vmatmul.mubr.f32.vlgmr.msra.gmra.mrb[8].mxu1 %v21183_v44 }
 0x35f   : > { %19452 = vmatmul.mubr.f32.vlgmr.msra.gmra.mrb[2].mxu0 %v2103_v34  ;;  %19540 = vmatpush3.msra.mxu1 %v21177_v38 }
 0x360   : > { %19455 = vmatpush3.msra.mxu0 %v2027_v42  ;;  %19541 = vmatprep.mubr.msk.f32.mxu1 %vm20931_vm1, %v20930_v1 }
 0x361   : > { %19459 = vmatprep.subr.mxu0 %v2115_v48  ;;  %19456 = vmatprep.mubr.f32.mxu0 %v2094_v13  ;;  %v21301_v13 = vand.u32 4294901760, %v3889_v11 }
 0x362   : > { %19544 = vmatprep.subr.mxu1 %v20930_v1 }
 0x363   : > { %v3958_v15 = vsub.f32 %v3889_v11, %v21301_v13 }
 0x365   : > { %v3959_v17 = vand.u32 4294901760, %v3958_v15 }
 0x366   : > { %19542 = vmatmul.mubr.f32.vlgmr.msra.gmra.mrb[8].mxu1 %v3497_v47 }
 0x367   : > { %19457 = vmatmul.mubr.f32.vlgmr.msra.gmra.mrb[2].mxu0 %v2104_v35  ;;  %19545 = vmatpush3.msra.mxu1 %v21161_v30  ;;  %v3960_v19 = vsub.f32 %v3958_v15, %v3959_v17 }
 0x368   : > { %19460 = vmatpush3.msra.mxu0 %v2115_v48  ;;  %19546 = vmatprep.mubr.msk.f32.mxu1 %vm20931_vm1, %v20930_v1 }
 0x369   : > { %19464 = vmatprep.subr.mxu0 %v2027_v42  ;;  %19461 = vmatprep.mubr.f32.mxu0 %v21106_v8 }
 0x36a   : > { %19549 = vmatprep.subr.mxu1 %v20930_v1 }
 0x36e   : > { %19547 = vmatmul.mubr.f32.vlgmr.msra.gmra.mrb[8].mxu1 %v3498_v49 }
 0x36f   : > { %19462 = vmatmul.mubr.f32.vlgmr.msra.gmra.mrb[2].mxu0 %v21173_v33  ;;  %19550 = vmatpush3.msra.mxu1 %v21186_v45 }
 0x370   : > { %19465 = vmatpush3.msra.mxu0 %v2027_v42  ;;  %19551 = vmatprep.mubr.msk.f32.mxu1 %vm20931_vm1, %v20930_v1 }
 0x371   : > { %19466 = vmatprep.mubr.f32.mxu0 %v21106_v8  ;;  %19469 = vmatprep.subr.mxu0 %v20930_v1  ;;  %v5270_v8 = vsel %vm989_vm3, %v21179_v40, 0 }
 0x372   : > { %19554 = vmatprep.subr.mxu1 %v20930_v1  ;;  %v21293_v10 = vand.u32 4294901760, %v5270_v8 }
 0x374   : > { %v5339_v12 = vsub.f32 %v5270_v8, %v21293_v10 }
 0x376   : > { %19552 = vmatmul.mubr.f32.vlgmr.msra.gmra.mrb[8].mxu1 %v21183_v44  ;;  %v5340_v14 = vand.u32 4294901760, %v5339_v12 }
 0x377   : > { %19467 = vmatmul.mubr.f32.vlgmr.msra.gmra.mrb[2].mxu0 %v21173_v33  ;;  %19555 = vmatpush3.msra.mxu1 %v21161_v30 }
 0x378   : > { %19470 = vmatpush3.msra.mxu0 %v21125_v20  ;;  %19471 = vmatprep.mubr.msk.f32.mxu0 %vm20931_vm1, %v20930_v1  ;;  %v5341_v16 = vsub.f32 %v5339_v12, %v5340_v14  ;;  %v3961_v20 = vand.u32 4294901760, %v3960_v19 }
 0x379   : > { %19479 = vmatprep.subr.mxu0 %v20930_v1  ;;  %19556 = vmatprep.mubr.msk.f32.mxu1 %vm20931_vm1, %v20930_v1 }
 0x37a   : > { %19589 = vmatprep.subr.mxu1 %v20930_v1  ;;  %v5342_v18 = vand.u32 4294901760, %v5341_v16 }
 0x37b   : > { %19472 = vmatmul.mubr.f32.vlgmr.msra.gmra.mrb[4].mxu0 %v2595_v63 }
 0x37c   : > { %19480 = vmatpush3.msra.mxu0 %v21130_v22  ;;  %19481 = vmatprep.mubr.msk.f32.mxu0 %vm20931_vm1, %v20930_v1 }
 0x37d   : > { %19489 = vmatprep.subr.mxu0 %v20930_v1 }
 0x37e   : > { %19557 = vmatmul.mubr.f32.vlgmr.msra.gmra.mrb[8].mxu1 %v21183_v44 }
 0x37f   : > { %19482 = vmatmul.mubr.f32.vlgmr.msra.gmra.mrb[6].mxu0 %v21143_v26  ;;  %19590 = vmatpush3.msra.mxu1 %v21161_v30  ;;  %v4811_v26 = vsel %vm989_vm3, %v4810_v25, 0 }
 0x380   : > { %19490 = vmatpush3.msra.mxu0 %v2604_v24  ;;  %19591 = vmatprep.mubr.msk.f32.mxu1 %vm20931_vm1, %v20930_v1  ;;  %v4879_v27 = vand.u32 4294901760, %v4811_v26 }
 0x381   : > { %19491 = vmatprep.mubr.msk.f32.mxu0 %vm20931_vm1, %v20930_v1  ;;  %19499 = vmatprep.subr.mxu0 %v20930_v1 }
 0x382   : > { %19592 = vmatmul.mubr.f32.vlgmr.msra.gmra.mrb[10].mxu1 %v4422_v5  ;;  %19594 = vmatprep.subr.mxu1 %v20930_v1  ;;  %v4880_v31 = vsub.f32 %v4811_v26, %v4879_v27 }
 0x383   : > { %19492 = vmatmul.mubr.f32.vlgmr.msra.gmra.mrb[8].mxu0 %v21132_v23  ;;  %19595 = vmatpush3.msra.mxu1 %v21193_v55 }
 0x384   : > { %19500 = vmatpush3.msra.mxu0 %v21161_v30  ;;  %19501 = vmatprep.mubr.msk.f32.mxu0 %vm20931_vm1, %v20930_v1  ;;  %v4881_v32 = vand.u32 4294901760, %v4880_v31 }
 0x385   : > { %19596 = vmatprep.mubr.msk.f32.mxu1 %vm20931_vm1, %v20930_v1  ;;  %19504 = vmatprep.subr.mxu0 %v20930_v1 }
 0x386   : > { %19599 = vmatprep.subr.mxu1 %v20930_v1  ;;  %v4882_v33 = vsub.f32 %v4880_v31, %v4881_v32 }
 0x387   : > { %19502 = vmatmul.mubr.f32.vlgmr.msra.gmra.mrb[10].mxu0 %v3043_v7 }
 0x388   : > { %19505 = vmatpush3.msra.mxu0 %v21193_v55  ;;  %19506 = vmatprep.mubr.msk.f32.mxu0 %vm20931_vm1, %v20930_v1  ;;  %v4883_v34 = vand.u32 4294901760, %v4882_v33 }
 0x389   : > { %19509 = vmatprep.subr.mxu0 %v20930_v1 }
 0x38a   : > { %19597 = vmatmul.mubr.f32.vlgmr.msra.gmra.mrb[10].mxu1 %v21216_v58 }
 0x38b   : > { %19600 = vmatpush3.msra.mxu1 %v21177_v38  ;;  %19601 = vmatprep.mubr.msk.f32.mxu1 %vm20931_vm1, %v20930_v1 }
 0x38c   : > { %19604 = vmatprep.subr.mxu1 %v20930_v1 }
 0x38f   : > { %19507 = vmatmul.mubr.f32.vlgmr.msra.gmra.mrb[10].mxu0 %v21229_v62 }
 0x390   : > { %19510 = vmatpush3.msra.mxu0 %v21177_v38  ;;  %19511 = vmatprep.mubr.msk.f32.mxu0 %vm20931_vm1, %v20930_v1 }
 0x391   : > { %19514 = vmatprep.subr.mxu0 %v20930_v1 }
 0x392   : > { %19602 = vmatmul.mubr.f32.vlgmr.msra.gmra.mrb[10].mxu1 %v4419_v61 }
 0x393   : > { %19605 = vmatpush3.msra.mxu1 %v21161_v30  ;;  %19606 = vmatprep.mubr.msk.f32.mxu1 %vm20931_vm1, %v20930_v1 }
 0x394   : > { %19609 = vmatprep.subr.mxu1 %v20930_v1 }
 0x397   : > { %19512 = vmatmul.mubr.f32.vlgmr.msra.gmra.mrb[10].mxu0 %v3040_v2 }
 0x398   : > { %19515 = vmatpush3.msra.mxu0 %v21161_v30  ;;  %19516 = vmatprep.mubr.msk.f32.mxu0 %vm20931_vm1, %v20930_v1 }
 0x399   : > { %19519 = vmatprep.subr.mxu0 %v20930_v1 }
 0x39a   : > { %19607 = vmatmul.mubr.f32.vlgmr.msra.gmra.mrb[10].mxu1 %v4420_v0 }
 0x39b   : > { %19610 = vmatpush3.msra.mxu1 %v21186_v45  ;;  %19611 = vmatprep.mubr.msk.f32.mxu1 %vm20931_vm1, %v20930_v1 }
 0x39c   : > { %19614 = vmatprep.subr.mxu1 %v20930_v1 }
 0x39f   : > { %19517 = vmatmul.mubr.f32.vlgmr.msra.gmra.mrb[10].mxu0 %v3041_v4  ;;  %v18757_v4 = vld [vmem:[%s22178_s8 + $0x8] sm:$0xff] }
 0x3a0   : > { %19520 = vmatpush3.msra.mxu0 %v21186_v45  ;;  %19521 = vmatprep.mubr.msk.f32.mxu0 %vm20931_vm1, %v20930_v1  ;;  %v5733_v5 = vsel %vm989_vm3, %v18757_v4, 0 }
 0x3a1   : > { %19524 = vmatprep.subr.mxu0 %v20930_v1  ;;  %v5801_v6 = vand.u32 4294901760, %v5733_v5 }
 0x3a2   : > { %19612 = vmatmul.mubr.f32.vlgmr.msra.gmra.mrb[10].mxu1 %v21216_v58 }
 0x3a3   : > { %19615 = vmatpush3.msra.mxu1 %v21161_v30  ;;  %19616 = vmatprep.mubr.msk.f32.mxu1 %vm20931_vm1, %v20930_v1  ;;  %v5802_v9 = vsub.f32 %v5733_v5, %v5801_v6 }
 0x3a4   : > { %19649 = vmatprep.subr.mxu1 %v20930_v1 }
 0x3a7   : > { %19522 = vmatmul.mubr.f32.vlgmr.msra.gmra.mrb[10].mxu0 %v21229_v62 }
 0x3a8   : > { %19525 = vmatpush3.msra.mxu0 %v21161_v30  ;;  %19526 = vmatprep.mubr.msk.f32.mxu0 %vm20931_vm1, %v20930_v1 }
 0x3a9   : > { %19559 = vmatprep.subr.mxu0 %v20930_v1 }
 0x3aa   : > { %19617 = vmatmul.mubr.f32.vlgmr.msra.gmra.mrb[10].mxu1 %v21216_v58  ;;  %v6646_v58 = vld [vmem:[%s22181_s11] sm:$0xff] }
 0x3ab   : > { %19650 = vmatpush3.msra.mxu1 %v21161_v30  ;;  %19651 = vmatprep.mubr.msk.f32.mxu1 %vm20931_vm1, %v20930_v1 }
 0x3ac   : > { %19654 = vmatprep.subr.mxu1 %v20930_v1 }
 0x3ae   : > { %19652 = vmatmul.mubr.f32.vlgmr.msra.gmra.mrb[12].mxu1 %v5342_v18 }
 0x3af   : > { %19527 = vmatmul.mubr.f32.vlgmr.msra.gmra.mrb[10].mxu0 %v21229_v62  ;;  %19655 = vmatpush3.msra.mxu1 %v21193_v55 }
 0x3b0   : > { %19560 = vmatpush3.msra.mxu0 %v21161_v30  ;;  %19561 = vmatprep.mubr.msk.f32.mxu0 %vm20931_vm1, %v20930_v1 }
 0x3b1   : > { %19656 = vmatprep.mubr.msk.f32.mxu1 %vm20931_vm1, %v20930_v1  ;;  %19564 = vmatprep.subr.mxu0 %v20930_v1 }
 0x3b2   : > { %19659 = vmatprep.subr.mxu1 %v20930_v1 }
 0x3b3   : > { %19562 = vmatmul.mubr.f32.vlgmr.msra.gmra.mrb[12].mxu0 %v3961_v20 }
 0x3b4   : > { %19565 = vmatpush3.msra.mxu0 %v21193_v55  ;;  %19566 = vmatprep.mubr.msk.f32.mxu0 %vm20931_vm1, %v20930_v1 }
 0x3b5   : > { %19569 = vmatprep.subr.mxu0 %v20930_v1 }
 0x3b6   : > { %19657 = vmatmul.mubr.f32.vlgmr.msra.gmra.mrb[12].mxu1 %v21293_v10  ;;  %v21334_v21 = vpop.f32.mrb[2].mxu1 }
 0x3b7   : > { %19660 = vmatpush3.msra.mxu1 %v21177_v38  ;;  %19661 = vmatprep.mubr.msk.f32.mxu1 %vm20931_vm1, %v20930_v1  ;;  %v19478_v22 = vpop.f32.mrb[3].mxu1 }
 0x3b8   : > { %19664 = vmatprep.subr.mxu1 %v20930_v1 }
 0x3ba   : > { %v21340_v23 = vpop.f32.mrb[4].mxu1 }
 0x3bb   : > { %19567 = vmatmul.mubr.f32.vlgmr.msra.gmra.mrb[12].mxu0 %v21301_v13  ;;  %v19488_v24 = vpop.f32.mrb[5].mxu1 }
 0x3bc   : > { %19570 = vmatpush3.msra.mxu0 %v21177_v38  ;;  %19571 = vmatprep.mubr.msk.f32.mxu0 %vm20931_vm1, %v20930_v1 }
 0x3bd   : > { %19574 = vmatprep.subr.mxu0 %v20930_v1 }
 0x3be   : > { %19662 = vmatmul.mubr.f32.vlgmr.msra.gmra.mrb[12].mxu1 %v5339_v12  ;;  %v21368_v28 = vpop.f32.mrb[6].mxu1  ;;  %v5803_v12 = vand.u32 4294901760, %v5802_v9 }
 0x3bf   : > { %19665 = vmatpush3.msra.mxu1 %v21161_v30  ;;  %19666 = vmatprep.mubr.msk.f32.mxu1 %vm20931_vm1, %v20930_v1  ;;  %v19498_v29 = vpop.f32.mrb[7].mxu1 }
 0x3c0   : > { %19669 = vmatprep.subr.mxu1 %v20930_v1 }
 0x3c3   : > { %19572 = vmatmul.mubr.f32.vlgmr.msra.gmra.mrb[12].mxu0 %v3958_v15 }
 0x3c4   : > { %19575 = vmatpush3.msra.mxu0 %v21161_v30  ;;  %19576 = vmatprep.mubr.msk.f32.mxu0 %vm20931_vm1, %v20930_v1 }
 0x3c5   : > { %19579 = vmatprep.subr.mxu0 %v20930_v1 }
 0x3c6   : > { %19667 = vmatmul.mubr.f32.vlgmr.msra.gmra.mrb[12].mxu1 %v5340_v14 }
 0x3c7   : > { %19670 = vmatpush3.msra.mxu1 %v21186_v45  ;;  %19671 = vmatprep.mubr.msk.f32.mxu1 %vm20931_vm1, %v20930_v1 }
 0x3c8   : > { %19674 = vmatprep.subr.mxu1 %v20930_v1 }
 0x3cb   : > { %19577 = vmatmul.mubr.f32.vlgmr.msra.gmra.mrb[12].mxu0 %v3959_v17  ;;  %v6639_v17 = vld [vmem:[%s22180_s10] sm:$0xff] }
 0x3cc   : > { %19580 = vmatpush3.msra.mxu0 %v21186_v45  ;;  %19581 = vmatprep.mubr.msk.f32.mxu0 %vm20931_vm1, %v20930_v1 }
 0x3cd   : > { %19584 = vmatprep.subr.mxu0 %v20930_v1 }
 0x3ce   : > { %19672 = vmatmul.mubr.f32.vlgmr.msra.gmra.mrb[12].mxu1 %v21293_v10 }
 0x3cf   : > { %19675 = vmatpush3.msra.mxu1 %v21161_v30  ;;  %19676 = vmatprep.mubr.msk.f32.mxu1 %vm20931_vm1, %v20930_v1 }
 0x3d0   : > { %19684 = vmatprep.subr.mxu1 %v20930_v1 }
 0x3d3   : > { %19582 = vmatmul.mubr.f32.vlgmr.msra.gmra.mrb[12].mxu0 %v21301_v13 }
 0x3d4   : > { %19585 = vmatpush3.msra.mxu0 %v21161_v30  ;;  %19586 = vmatprep.mubr.msk.f32.mxu0 %vm20931_vm1, %v20930_v1 }
 0x3d5   : > { %19619 = vmatprep.subr.mxu0 %v20930_v1 }
 0x3d6   : > { %19677 = vmatmul.mubr.f32.vlgmr.msra.gmra.mrb[12].mxu1 %v21293_v10 }
 0x3d7   : > { %19686 = vmatprep.mubr.msk.f32.mxu1 %vm20931_vm1, %v20930_v1 }
 0x3db   : > { %19587 = vmatmul.mubr.f32.vlgmr.msra.gmra.mrb[12].mxu0 %v21301_v13  ;;  %v5804_v13 = vsub.f32 %v5802_v9, %v5803_v12 }
 0x3dc   : > { %19620 = vmatpush3.msra.mxu0 %v21161_v30  ;;  %19621 = vmatprep.mubr.msk.f32.mxu0 %vm20931_vm1, %v20930_v1 }
 0x3dd   : > { %19624 = vmatprep.subr.mxu0 %v20930_v1  ;;  %v5805_v15 = vand.u32 4294901760, %v5804_v13 }
 0x3df   : > { %19622 = vmatmul.mubr.f32.vlgmr.msra.gmra.mrb[14].mxu0 %v4883_v34 }
 0x3e0   : > { %19625 = vmatpush3.msra.mxu0 %v21193_v55  ;;  %19626 = vmatprep.mubr.msk.f32.mxu0 %vm20931_vm1, %v20930_v1 }
 0x3e1   : > { %19629 = vmatprep.subr.mxu0 %v20930_v1 }
 0x3e7   : > { %19627 = vmatmul.mubr.f32.vlgmr.msra.gmra.mrb[14].mxu0 %v4879_v27 }
 0x3e8   : > { %19630 = vmatpush3.msra.mxu0 %v21177_v38  ;;  %19631 = vmatprep.mubr.msk.f32.mxu0 %vm20931_vm1, %v20930_v1 }
 0x3e9   : > { %19634 = vmatprep.subr.mxu0 %v20930_v1 }
 0x3ef   : > { %19632 = vmatmul.mubr.f32.vlgmr.msra.gmra.mrb[14].mxu0 %v4880_v31 }
 0x3f0   : > { %19635 = vmatpush3.msra.mxu0 %v21161_v30  ;;  %19636 = vmatprep.mubr.msk.f32.mxu0 %vm20931_vm1, %v20930_v1 }
 0x3f1   : > { %19639 = vmatprep.subr.mxu0 %v20930_v1 }
 0x3f7   : > { %19637 = vmatmul.mubr.f32.vlgmr.msra.gmra.mrb[14].mxu0 %v4881_v32 }
 0x3f8   : > { %19640 = vmatpush3.msra.mxu0 %v21186_v45  ;;  %19641 = vmatprep.mubr.msk.f32.mxu0 %vm20931_vm1, %v20930_v1 }
 0x3f9   : > { %19644 = vmatprep.subr.mxu0 %v20930_v1 }
 0x3ff   : > { %19642 = vmatmul.mubr.f32.vlgmr.msra.gmra.mrb[14].mxu0 %v4879_v27 }
 0x400   : > { %19645 = vmatpush3.msra.mxu0 %v21161_v30  ;;  %19646 = vmatprep.mubr.msk.f32.mxu0 %vm20931_vm1, %v20930_v1 }
 0x401   : > { %19679 = vmatprep.subr.mxu0 %v20930_v1 }
 0x407   : > { %19647 = vmatmul.mubr.f32.vlgmr.msra.gmra.mrb[14].mxu0 %v4879_v27 }
 0x408   : > { %19681 = vmatprep.mubr.msk.f32.mxu0 %vm20931_vm1, %v20930_v1 }
 0x44e   : > { %v21406_v35 = vpop.f32.mrb[4].mxu0 }
 0x44f   : > { %v19473_v37 = vpop.f32.mrb[5].mxu0 }
 0x451   : > { %v3872_v39 = vpop.f32.mrb[8].mxu1 }
 0x452   : > { %3882 = vrot.lane.b32.xlu1 %v3872_v39, %s22190_s17  ;;  %3877 = vrot.lane.b32.xlu0 %v3872_v39, %s22188_s18  ;;  %v21410_v40 = vpop.f32.mrb[6].mxu0  ;;  %v19558_v41 = vpop.f32.mrb[9].mxu1  ;;  %s22207_s17 = smov 48   ;;  %s22208_s18 = smov 56  }
 0x453   : > { %v19483_v42 = vpop.f32.mrb[7].mxu0 }
 0x456   : > { %v21412_v43 = vpop.f32.mrb[8].mxu0 }
 0x457   : > { %v19493_v44 = vpop.f32.mrb[9].mxu0 }
 0x47d   : > { %v4794_v46 = vpop.f32.mrb[10].mxu1 }
 0x47e   : > { %4804 = vrot.lane.b32.xlu1 %v4794_v46, %s20940_s20  ;;  %4799 = vrot.lane.b32.xlu0 %v4794_v46, %s22187_s23  ;;  %v19618_v47 = vpop.f32.mrb[11].mxu1  ;;  %s20947_s23 = smov 40  }
 0x482   : > { %v3415_v48 = vpop.f32.mrb[10].mxu0 }
 0x483   : > { %3419 = vst.msk [vmem:[#allocation2] sm:$0xff] %vm989_vm3, %v3415_v48  ;;  %3421 = vrot.lane.b32.xlu1 %v3415_v48, %s22194_s27  ;;  %v19528_v49 = vpop.f32.mrb[11].mxu0  ;;  %s22210_s27 = smov 64  }
 0x4a9   : > { %v5714_v50 = vpop.f32.mrb[12].mxu1 }
 0x4aa   : > { %v19678_v51 = vpop.f32.mrb[13].mxu1 }
 0x4ae   : > { %v4333_v52 = vpop.f32.mrb[12].mxu0 }
 0x4af   : > { %4343 = vrot.lane.b32.xlu1 %v4333_v52, %s22192_s28  ;;  %4338 = vrot.lane.b32.xlu0 %v4333_v52, %s22196_s29  ;;  %v19588_v53 = vpop.f32.mrb[13].mxu0  ;;  %s22211_s28 = smov 16   ;;  %s22212_s29 = smov 24  }
 0x4c4   : > { %v3883_v60 = vpop.permute.xlu1 %3882  ;;  %v3878_v63 = vpop.permute.xlu0 %3877 }
 0x4da   : > { %v5255_v54 = vpop.f32.mrb[14].mxu0 }
 0x4db   : > { %5265 = vrot.lane.b32.xlu1 %v5255_v54, %s20945_s30  ;;  %5260 = vrot.lane.b32.xlu0 %v5255_v54, %s20946_s0  ;;  %v19648_v56 = vpop.f32.mrb[15].mxu0 }
 0x4df   : > { %5724 = vrot.lane.b32.xlu1 %v5714_v50, %s20934_s24  ;;  %5719 = vrot.lane.b32.xlu0 %v5714_v50, %s20947_s23  ;;  %s22209_s23 = smov 8   ;;  %s22213_s24 = smov 112  }
 0x4e3   : > { %2519 = vperm.xlu1 %20897, %v2516_v57  }
 0x4e7   : > { %6649 = vperm.xlu1 %20897, %v6646_v58  }
 0x4eb   : > { %7663 = vperm.xlu1 %20897, %v18764_v59  }
 0x4f0   : > { %v4805_v61 = vpop.permute.xlu1 %4804  ;;  %v4800_v0 = vpop.permute.xlu0 %4799 }
 0x4f5   : > { %v3422_v62 = vpop.permute.xlu1 %3421 }
 0x4f6   : > { %3425 = vst.msk [vmem:[#allocation2] sm:$0xff] %vm3424_vm4, %v3422_v62 }
 0x4f7   : > { %3881 = vst.msk [vmem:[#allocation2] sm:$0xff] %vm3880_vm5, %v3878_v63 }
 0x4f8   : > { %3886 = vst.msk [vmem:[#allocation2] sm:$0xff] %vm3885_vm6, %v3883_v60 }
 0x521   : > { %v4344_v2 = vpop.permute.xlu1 %4343  ;;  %v4339_v3 = vpop.permute.xlu0 %4338 }
 0x522   : > { %4342 = vst.msk [vmem:[#allocation2] sm:$0xff] %vm4341_vm7, %v4339_v3 }
 0x523   : > { %4347 = vst.msk [vmem:[#allocation2] sm:$0xff] %vm4346_vm8, %v4344_v2 }
 0x524   : > { %4803 = vst.msk [vmem:[#allocation2] sm:$0xff] %vm4802_vm9, %v4800_v0 }
 0x525   : > { %4808 = vst.msk [vmem:[#allocation2] sm:$0xff] %vm4807_vm10, %v4805_v61 }
 0x54d   : > { %v5266_v7 = vpop.permute.xlu1 %5265  ;;  %v5261_v8 = vpop.permute.xlu0 %5260 }
 0x54e   : > { %5264 = vst.msk [vmem:[#allocation2] sm:$0xff] %vm5263_vm11, %v5261_v8 }
 0x54f   : > { %5269 = vst.msk [vmem:[#allocation2] sm:$0xff] %vm5268_vm12, %v5266_v7 }
 0x551   : > { %v5725_v10 = vpop.permute.xlu1 %5724  ;;  %v5720_v11 = vpop.permute.xlu0 %5719 }
 0x552   : > { %5723 = vst.msk [vmem:[#allocation2] sm:$0xff] %vm5722_vm13, %v5720_v11 }
 0x553   : > { %5728 = vst.msk [vmem:[#allocation2] sm:$0xff] %vm5727_vm14, %v5725_v10 }
 0x55a   : > { %v5731_v14 = vld [vmem:[#allocation2] sm:$0xff] }
 0x55b   : > { %6185 = vrot.lane.b32.xlu0 %v5731_v14, %s20940_s20  ;;  %v5736_v16 = vand.u32 4294901760, %v5731_v14 }
 0x55d   : > { %19680 = vmatpush3.msra.mxu0 %v5736_v16  ;;  %v5813_v18 = vsub.f32 %v5731_v14, %v5736_v16 }
 0x55e   : > { %19682 = vmatmul.mubr.f32.vlgmr.msra.gmra.mrb[16].mxu0 %v5805_v15  ;;  %19689 = vmatprep.subr.mxu0 %v20930_v1 }
 0x55f   : > { %6642 = vperm.xlu0 %20896, %v6639_v17   ;;  %19690 = vmatpush3.msra.mxu0 %v5813_v18  ;;  %v5814_v19 = vand.u32 4294901760, %v5813_v18 }
 0x560   : > { %19691 = vmatprep.mubr.msk.f32.mxu0 %vm20931_vm1, %v20930_v1  ;;  %19699 = vmatprep.subr.mxu0 %v20930_v1 }
 0x561   : > { %v5815_v20 = vsub.f32 %v5813_v18, %v5814_v19 }
 0x562   : > { %v2520_v22 = vpop.permute.xlu1 %2519  ;;  %19692 = vmatmul.mubr.f32.vlgmr.msra.gmra.mrb[18].mxu0 %v5802_v9 }
 0x563   : > { %v2598_v24 = vadd.f32 %v21406_v35, %v2520_v22  ;;  %19700 = vmatpush3.msra.mxu0 %v5814_v19  ;;  %v5816_v25 = vand.u32 4294901760, %v5815_v20  ;;  %19701 = vmatprep.mubr.msk.f32.mxu0 %vm20931_vm1, %v20930_v1 }
 0x564   : > { %19709 = vmatprep.subr.mxu0 %v20930_v1 }
 0x565   : > { %v2674_v26 = vadd.f32 %v21334_v21, %v2598_v24  ;;  %19685 = vmatpush3.msra.mxu1 %v5816_v25 }
 0x566   : > { %19687 = vmatmul.mubr.f32.vlgmr.msra.gmra.mrb[14].mxu1 %v5801_v6  ;;  %19694 = vmatprep.subr.mxu1 %v20930_v1 }
 0x567   : > { %v2748_v27 = vadd.f32 %v21410_v40, %v2674_v26  ;;  %19695 = vmatpush3.msra.mxu1 %v5736_v16  ;;  %19696 = vmatprep.mubr.msk.f32.mxu1 %vm20931_vm1, %v20930_v1 }
 0x568   : > { %19704 = vmatprep.subr.mxu1 %v20930_v1  ;;  %19702 = vmatmul.mubr.f32.vlgmr.msra.gmra.mrb[20].mxu0 %v5801_v6 }
 0x569   : > { %v2822_v29 = vadd.f32 %v21340_v23, %v2748_v27  ;;  %19711 = vmatprep.mubr.msk.f32.mxu0 %vm20931_vm1, %v20930_v1  ;;  %v18758_v23 = vld [vmem:[%s22178_s8 + $0x10] sm:$0xff] }
 0x56a   : > { %19697 = vmatmul.mubr.f32.vlgmr.msra.gmra.mrb[16].mxu1 %v5803_v12  ;;  %v6189_v32 = vsel %vm989_vm3, %v18758_v23, 0 }
 0x56b   : > { %19705 = vmatpush3.msra.mxu1 %v5736_v16  ;;  %19706 = vmatprep.mubr.msk.f32.mxu1 %vm20931_vm1, %v20930_v1  ;;  %v2896_v21 = vadd.f32 %v21412_v43, %v2822_v29  ;;  %v6257_v33 = vand.u32 4294901760, %v6189_v32 }
 0x56c   : > { %19714 = vmatprep.subr.mxu1 %v20930_v1 }
 0x56d   : > { %v2968_v31 = vadd.f32 %v21368_v28, %v2896_v21  ;;  %v6258_v34 = vsub.f32 %v6189_v32, %v6257_v33  ;;  %v6650_v32 = vpop.permute.xlu1 %6649 }
 0x56e   : > { %19707 = vmatmul.mubr.f32.vlgmr.msra.gmra.mrb[18].mxu1 %v5801_v6  ;;  %v18761_v6 = vld [vmem:[%s22174_s4 + $0x30] sm:$0xff] }
 0x56f   : > { %19716 = vmatprep.mubr.msk.f32.mxu1 %vm20931_vm1, %v20930_v1  ;;  %v6259_v35 = vand.u32 4294901760, %v6258_v34  ;;  %v6664_v7 = vsel %vm989_vm3, %v18761_v6, 0 }
 0x570   : > { %v21492_v9 = vand.u32 4294901760, %v6664_v7 }
 0x571   : > { %v6260_v37 = vsub.f32 %v6258_v34, %v6259_v35  ;;  %v7664_v6 = vpop.permute.xlu1 %7663 }
 0x572   : > { %v6736_v13 = vsub.f32 %v6664_v7, %v21492_v9 }
 0x573   : > { %v6261_v40 = vand.u32 4294901760, %v6260_v37 }
 0x574   : > { %v6737_v17 = vand.u32 4294901760, %v6736_v13 }
 0x576   : > { %v6738_v20 = vsub.f32 %v6736_v13, %v6737_v17 }
 0x578   : > { %v6739_v25 = vand.u32 4294901760, %v6738_v20 }
 0x5cd   : > { %v6186_v39 = vpop.permute.xlu0 %6185 }
 0x5ce   : > { %v6192_v41 = vand.u32 4294901760, %v6186_v39 }
 0x5d0   : > { %v6269_v42 = vsub.f32 %v6186_v39, %v6192_v41  ;;  %19710 = vmatpush3.msra.mxu0 %v6192_v41 }
 0x5d1   : > { %19712 = vmatmul.mubr.f32.vlgmr.msra.gmra.mrb[22].mxu0 %v6261_v40  ;;  %19719 = vmatprep.subr.mxu0 %v20930_v1 }
 0x5d2   : > { %v6270_v28 = vand.u32 4294901760, %v6269_v42  ;;  %19720 = vmatpush3.msra.mxu0 %v6269_v42  ;;  %19721 = vmatprep.mubr.msk.f32.mxu0 %vm20931_vm1, %v20930_v1 }
 0x5d3   : > { %19729 = vmatprep.subr.mxu0 %v20930_v1 }
 0x5d4   : > { %v6271_v43 = vsub.f32 %v6269_v42, %v6270_v28 }
 0x5d5   : > { %19722 = vmatmul.mubr.f32.vlgmr.msra.gmra.mrb[24].mxu0 %v6258_v34  ;;  %v18763_v34 = vld [vmem:[%s22175_s5 + $0x10] sm:$0xff] }
 0x5d6   : > { %v6272_v44 = vand.u32 4294901760, %v6271_v43  ;;  %19730 = vmatpush3.msra.mxu0 %v6270_v28  ;;  %19731 = vmatprep.mubr.msk.f32.mxu0 %vm20931_vm1, %v20930_v1 }
 0x5d8   : > { %19715 = vmatpush3.msra.mxu1 %v6272_v44 }
 0x5d9   : > { %19717 = vmatmul.mubr.f32.vlgmr.msra.gmra.mrb[20].mxu1 %v6257_v33  ;;  %19724 = vmatprep.subr.mxu1 %v20930_v1 }
 0x5da   : > { %19725 = vmatpush3.msra.mxu1 %v6192_v41  ;;  %19726 = vmatprep.mubr.msk.f32.mxu1 %vm20931_vm1, %v20930_v1 }
 0x5db   : > { %19734 = vmatprep.subr.mxu1 %v20930_v1  ;;  %19732 = vmatmul.mubr.f32.vlgmr.msra.gmra.mrb[26].mxu0 %v6257_v33 }
 0x5dc   : > { %19741 = vmatprep.mubr.f32.mxu0 %v6739_v25 }
 0x5dd   : > { %19727 = vmatmul.mubr.f32.vlgmr.msra.gmra.mrb[22].mxu1 %v6259_v35  ;;  %v18762_v35 = vld [vmem:[%s22174_s4 + $0x38] sm:$0xff] }
 0x5de   : > { %19735 = vmatpush3.msra.mxu1 %v6192_v41  ;;  %19736 = vmatprep.mubr.msk.f32.mxu1 %vm20931_vm1, %v20930_v1  ;;  %v6667_v37 = vsel %vm989_vm3, %v18762_v35, 0 }
 0x5df   : > { %19829 = vmatprep.subr.mxu1 %v20930_v1  ;;  %v6745_v39 = vand.u32 4294901760, %v6667_v37 }
 0x5e1   : > { %19737 = vmatmul.mubr.f32.vlgmr.msra.gmra.mrb[24].mxu1 %v6257_v33  ;;  %v6746_v40 = vsub.f32 %v6667_v37, %v6745_v39 }
 0x5e2   : > { %19831 = vmatprep.mubr.msk.f32.mxu1 %vm20931_vm1, %v20930_v1 }
 0x631   : > { %v5807_v46 = vpop.f32.mrb[16].mxu0 }
 0x632   : > { %v19683_v47 = vpop.f32.mrb[17].mxu0 }
 0x635   : > { %v5957_v48 = vpop.f32.mrb[18].mxu0 }
 0x636   : > { %v19693_v49 = vpop.f32.mrb[19].mxu0 }
 0x637   : > { %v18759_v49 = vld [vmem:[%s22174_s4 + $0x20] sm:$0xff] }
 0x639   : > { %v5883_v50 = vpop.f32.mrb[14].mxu1 }
 0x63a   : > { %v5884_v51 = vadd.f32 %v5883_v50, %v5807_v46  ;;  %v19688_v52 = vpop.f32.mrb[15].mxu1  ;;  %v7159_v50 = vsel %vm989_vm3, %v18759_v49, 0 }
 0x63b   : > { %v6105_v53 = vpop.f32.mrb[20].mxu0  ;;  %v18760_v52 = vld [vmem:[%s22174_s4 + $0x28] sm:$0xff] }
 0x63c   : > { %v5958_v54 = vadd.f32 %v5957_v48, %v5884_v51  ;;  %v19703_v56 = vpop.f32.mrb[21].mxu0  ;;  %v7230_v51 = vand.u32 4294901760, %v7159_v50 }
 0x63d   : > { %v6031_v57 = vpop.f32.mrb[16].mxu1  ;;  %v7162_v56 = vsel %vm989_vm3, %v18760_v52, 0 }
 0x63e   : > { %v6032_v58 = vadd.f32 %v6031_v57, %v5958_v54  ;;  %v19698_v59 = vpop.f32.mrb[17].mxu1  ;;  %v7231_v54 = vsub.f32 %v7159_v50, %v7230_v51 }
 0x640   : > { %v6106_v60 = vadd.f32 %v6105_v53, %v6032_v58  ;;  %v7240_v58 = vand.u32 4294901760, %v7162_v56  ;;  %v7232_v59 = vand.u32 4294901760, %v7231_v54 }
 0x641   : > { %v6177_v61 = vpop.f32.mrb[18].mxu1 }
 0x642   : > { %v6178_v62 = vadd.f32 %v6177_v61, %v6106_v60  ;;  %v19708_v63 = vpop.f32.mrb[19].mxu1  ;;  %v7241_v61 = vsub.f32 %v7162_v56, %v7240_v58 }
 0x644   : > { %v6181_v0 = vadd.f32 %v6178_v62, %v2968_v31  ;;  %v6643_v31 = vpop.permute.xlu0 %6642  ;;  %v7233_v62 = vsub.f32 %v7231_v54, %v7232_v59 }
 0x6a4   : > { %v6263_v2 = vpop.f32.mrb[22].mxu0 }
 0x6a5   : > { %v19713_v3 = vpop.f32.mrb[23].mxu0 }
 0x6a8   : > { %v6413_v4 = vpop.f32.mrb[24].mxu0 }
 0x6a9   : > { %v19723_v5 = vpop.f32.mrb[25].mxu0 }
 0x6ac   : > { %v6339_v8 = vpop.f32.mrb[20].mxu1 }
 0x6ad   : > { %v6340_v10 = vadd.f32 %v6339_v8, %v6263_v2  ;;  %v19718_v11 = vpop.f32.mrb[21].mxu1  ;;  %v7234_v2 = vand.u32 4294901760, %v7233_v62 }
 0x6ae   : > { %v6561_v12 = vpop.f32.mrb[26].mxu0 }
 0x6af   : > { %v6414_v14 = vadd.f32 %v6413_v4, %v6340_v10  ;;  %v19733_v15 = vpop.f32.mrb[27].mxu0 }
 0x6b0   : > { %v6487_v16 = vpop.f32.mrb[22].mxu1 }
 0x6b1   : > { %v6488_v18 = vadd.f32 %v6487_v16, %v6414_v14  ;;  %v19728_v19 = vpop.f32.mrb[23].mxu1 }
 0x6b3   : > { %v6562_v22 = vadd.f32 %v6561_v12, %v6488_v18  ;;  %v18769_v12 = vld [vmem:[%s22178_s8 + $0x18] sm:$0xff] }
 0x6b4   : > { %v6633_v24 = vpop.f32.mrb[24].mxu1  ;;  %v8205_v14 = vsel %vm989_vm3, %v18769_v12, 0 }
 0x6b5   : > { %v6634_v26 = vadd.f32 %v6633_v24, %v6562_v22  ;;  %v19738_v27 = vpop.f32.mrb[25].mxu1  ;;  %v8273_v19 = vand.u32 4294901760, %v8205_v14 }
 0x6b7   : > { %v6637_v29 = vadd.f32 %v6634_v26, %v6181_v0  ;;  %v7242_v0 = vand.u32 4294901760, %v7241_v61  ;;  %v8274_v26 = vsub.f32 %v8205_v14, %v8273_v19 }
 0x6b9   : > { %v6638_v21 = vadd.f32 %v6637_v29, %v21087_v36  ;;  %v6747_v36 = vand.u32 4294901760, %v6746_v40  ;;  %v7243_v4 = vsub.f32 %v7241_v61, %v7242_v0 }
 0x6bb   : > { %v6645_v23 = vmul.f32 %v6643_v31, %v6638_v21  ;;  %v6748_v41 = vsub.f32 %v6746_v40, %v6747_v36  ;;  %v7244_v5 = vand.u32 4294901760, %v7243_v4  ;;  %v8275_v21 = vand.u32 4294901760, %v8274_v26 }
 0x6bd   : > { %v6652_v33 = vadd.f32 %v6650_v32, %v6645_v23  ;;  %v6749_v43 = vand.u32 4294901760, %v6748_v41  ;;  %v8276_v31 = vsub.f32 %v8274_v26, %v8275_v21 }
 0x6bf   : > { %6660 = vrot.lane.b32.xlu0 %v6652_v33, %s22200_s26  ;;  %v7165_v53 = vand.u32 4294901760, %v6652_v33 }
 0x6c1   : > { %v7252_v57 = vsub.f32 %v6652_v33, %v7165_v53 }
 0x6c3   : > { %7658 = vperm.xlu0 %20896, %v18763_v34   ;;  %v7253_v60 = vand.u32 4294901760, %v7252_v57  ;;  %v8277_v34 = vand.u32 4294901760, %v8276_v31 }
 0x6c5   : > { %v7254_v63 = vsub.f32 %v7252_v57, %v7253_v60 }
 0x6c7   : > { %v7255_v3 = vand.u32 4294901760, %v7254_v63 }
 0x731   : > { %v21504_v42 = vpop.permute.xlu0 %6660 }
 0x732   : > { %v6670_v28 = vand.u32 4294901760, %v21504_v42 }
 0x734   : > { %v6757_v44 = vsub.f32 %v21504_v42, %v6670_v28  ;;  %19739 = vmatprep.subr.mxu0 %v6670_v28 }
 0x735   : > { %19740 = vmatpush3.msra.mxu0 %v6670_v28 }
 0x736   : > { %19742 = vmatmul.mubr.f32.vlgmr.msra.gmra.mrb[28].mxu0 %v6749_v43  ;;  %v6758_v46 = vand.u32 4294901760, %v6757_v44 }
 0x737   : > { %19746 = vmatprep.mubr.f32.mxu0 %v21492_v9 }
 0x738   : > { %v6759_v47 = vsub.f32 %v6757_v44, %v6758_v46 }
 0x73a   : > { %v6760_v48 = vand.u32 4294901760, %v6759_v47 }
 0x73c   : > { %19744 = vmatprep.subr.mxu0 %v6760_v48 }
 0x73d   : > { %19745 = vmatpush3.msra.mxu0 %v6760_v48  ;;  %v18766_v48 = vld [vmem:[%s22176_s6 + $0x18] sm:$0xff] }
 0x73e   : > { %19747 = vmatmul.mubr.f32.vlgmr.msra.gmra.mrb[28].mxu0 %v6745_v39  ;;  %19749 = vmatprep.subr.mxu0 %v6757_v44  ;;  %v7687_v49 = vsel %vm989_vm3, %v18766_v48, 0 }
 0x73f   : > { %19750 = vmatpush3.msra.mxu0 %v6757_v44  ;;  %19751 = vmatprep.mubr.f32.mxu0 %v6736_v13  ;;  %v18765_v13 = vld [vmem:[%s22176_s6 + $0x10] sm:$0xff]  ;;  %v21588_v50 = vand.u32 4294901760, %v7687_v49 }
 0x740   : > { %19754 = vmatprep.subr.mxu0 %v6670_v28  ;;  %v7684_v15 = vsel %vm989_vm3, %v18765_v13, 0 }
 0x742   : > { %v7659_v16 = vpop.permute.xlu0 %7658 }
 0x746   : > { %19752 = vmatmul.mubr.f32.vlgmr.msra.gmra.mrb[28].mxu0 %v6746_v40 }
 0x747   : > { %19755 = vmatpush3.msra.mxu0 %v6670_v28  ;;  %19756 = vmatprep.mubr.f32.mxu0 %v6737_v17  ;;  %v21527_v17 = vand.u32 4294901760, %v7684_v15 }
 0x748   : > { %19759 = vmatprep.subr.mxu0 %v6758_v46 }
 0x749   : > { %v21530_v20 = vsub.f32 %v7684_v15, %v21527_v17 }
 0x74b   : > { %v7757_v25 = vand.u32 4294901760, %v21530_v20 }
 0x74d   : > { %v7758_v27 = vsub.f32 %v21530_v20, %v7757_v25 }
 0x74e   : > { %19757 = vmatmul.mubr.f32.vlgmr.msra.gmra.mrb[28].mxu0 %v6747_v36 }
 0x74f   : > { %19760 = vmatpush3.msra.mxu0 %v6758_v46  ;;  %19761 = vmatprep.mubr.f32.mxu0 %v21492_v9  ;;  %v7759_v29 = vand.u32 4294901760, %v7758_v27 }
 0x750   : > { %19764 = vmatprep.subr.mxu0 %v6670_v28 }
 0x756   : > { %19762 = vmatmul.mubr.f32.vlgmr.msra.gmra.mrb[28].mxu0 %v6745_v39 }
 0x757   : > { %19765 = vmatpush3.msra.mxu0 %v6670_v28  ;;  %19766 = vmatprep.mubr.f32.mxu0 %v21492_v9 }
 0x758   : > { %19769 = vmatprep.subr.mxu0 %v7165_v53 }
 0x75e   : > { %19767 = vmatmul.mubr.f32.vlgmr.msra.gmra.mrb[28].mxu0 %v6745_v39 }
 0x75f   : > { %19770 = vmatpush3.msra.mxu0 %v7165_v53  ;;  %19771 = vmatprep.mubr.f32.mxu0 %v7234_v2 }
 0x760   : > { %19774 = vmatprep.subr.mxu0 %v7255_v3 }
 0x766   : > { %19772 = vmatmul.mubr.f32.vlgmr.msra.gmra.mrb[28].mxu0 %v7244_v5 }
 0x767   : > { %19775 = vmatpush3.msra.mxu0 %v7255_v3  ;;  %19776 = vmatprep.mubr.f32.mxu0 %v7230_v51 }
 0x768   : > { %19779 = vmatprep.subr.mxu0 %v7252_v57 }
 0x76e   : > { %19777 = vmatmul.mubr.f32.vlgmr.msra.gmra.mrb[28].mxu0 %v7240_v58 }
 0x76f   : > { %19780 = vmatpush3.msra.mxu0 %v7252_v57  ;;  %19781 = vmatprep.mubr.f32.mxu0 %v7231_v54 }
 0x770   : > { %19784 = vmatprep.subr.mxu0 %v7165_v53 }
 0x776   : > { %19782 = vmatmul.mubr.f32.vlgmr.msra.gmra.mrb[28].mxu0 %v7241_v61 }
 0x777   : > { %19785 = vmatpush3.msra.mxu0 %v7165_v53  ;;  %19786 = vmatprep.mubr.f32.mxu0 %v7232_v59 }
 0x778   : > { %19789 = vmatprep.subr.mxu0 %v7253_v60 }
 0x77e   : > { %19787 = vmatmul.mubr.f32.vlgmr.msra.gmra.mrb[28].mxu0 %v7242_v0 }
 0x77f   : > { %19790 = vmatpush3.msra.mxu0 %v7253_v60  ;;  %19791 = vmatprep.mubr.f32.mxu0 %v7230_v51 }
 0x780   : > { %19794 = vmatprep.subr.mxu0 %v7165_v53 }
 0x786   : > { %19792 = vmatmul.mubr.f32.vlgmr.msra.gmra.mrb[28].mxu0 %v7240_v58 }
 0x787   : > { %19795 = vmatpush3.msra.mxu0 %v7165_v53  ;;  %19796 = vmatprep.mubr.f32.mxu0 %v7230_v51  ;;  %v7766_v51 = vsub.f32 %v7687_v49, %v21588_v50  ;;  %v18771_v49 = vld [vmem:[%s22178_s8 + $0x20] sm:$0xff] }
 0x789   : > { %v7767_v52 = vand.u32 4294901760, %v7766_v51 }
 0x78b   : > { %v7768_v53 = vsub.f32 %v7766_v51, %v7767_v52 }
 0x78d   : > { %v7769_v59 = vand.u32 4294901760, %v7768_v53 }
 0x78e   : > { %19797 = vmatmul.mubr.f32.vlgmr.msra.gmra.mrb[28].mxu0 %v7240_v58 }
 0x78f   : > { %19801 = vmatprep.mubr.f32.mxu0 %v7759_v29 }
 0x861   : > { %v19798_v7 = vpop.f32.mrb[28].mxu0 }
 0x862   : > { %v7667_v8 = vadd.f32 %v19798_v7, %v7664_v6  ;;  %v7643_v9 = vpop.f32.mrb[29].mxu0 }
 0x863   : > { %v7666_v18 = vadd.f32 %v7659_v16, %v7643_v9 }
 0x864   : > { %v7669_v10 = vsub.f32 0.0, %v7667_v8 }
 0x866   : > { %v7670_v11 = vmul.f32 1.442695, %v7669_v10 }
 0x868   : > { %20904 = vpow2.f32 %v7670_v11 }
 0x869   : > { %20906 = vtanh.f32 %v7666_v18 }
 0x872   : > { %v20905_v22 = vpop.eup %20904 }
 0x873   : > { %v7672_v24 = vadd.f32 1.0, %v20905_v22  ;;  %v20907_v23 = vpop.eup %20906 }
 0x875   : > { %20908 = vrcp.f32 %v7672_v24 }
 0x87f   : > { %v20909_v32 = vpop.eup %20908 }
 0x880   : > { %v7675_v33 = vmul.f32 %v20909_v32, %v20907_v23 }
 0x882   : > { %7680 = vrot.lane.b32.xlu0 %v7675_v33, %s20935_s25  ;;  %9107 = vrot.lane.b32.xlu1 %v7675_v33, %s22206_s19  ;;  %v8208_v35 = vand.u32 4294901760, %v7675_v33  ;;  %v8653_v41 = vsel %vm989_vm3, %v7675_v33, 0 }
 0x883   : > { %v8721_v28 = vand.u32 4294901760, %v8653_v41 }
 0x884   : > { %19830 = vmatpush3.msra.mxu1 %v8208_v35  ;;  %v8285_v37 = vsub.f32 %v7675_v33, %v8208_v35 }
 0x885   : > { %19832 = vmatmul.mubr.f32.vlgmr.msra.gmra.mrb[26].mxu1 %v8277_v34  ;;  %19834 = vmatprep.subr.mxu1 %v20930_v1  ;;  %v8722_v43 = vsub.f32 %v8653_v41, %v8721_v28 }
 0x886   : > { %9566 = vrot.lane.b32.xlu1 %v7675_v33, %s22200_s26  ;;  %v8286_v39 = vand.u32 4294901760, %v8285_v37  ;;  %19836 = vmatprep.mubr.msk.f32.mxu1 %vm20931_vm1, %v20930_v1 }
 0x887   : > { %v8723_v44 = vand.u32 4294901760, %v8722_v43 }
 0x888   : > { %v8287_v40 = vsub.f32 %v8285_v37, %v8286_v39 }
 0x889   : > { %v8724_v46 = vsub.f32 %v8722_v43, %v8723_v44 }
 0x88a   : > { %v8288_v36 = vand.u32 4294901760, %v8287_v40 }
 0x88b   : > { %v8725_v47 = vand.u32 4294901760, %v8724_v46  ;;  %v18780_v46 = vld [vmem:[%s22175_s5 + $0x28] sm:$0xff] }
 0x88c   : > { %19835 = vmatpush3.msra.mxu1 %v8288_v36 }
 0x88d   : > { %19837 = vmatmul.mubr.f32.vlgmr.msra.gmra.mrb[28].mxu1 %v8273_v19  ;;  %19839 = vmatprep.subr.mxu1 %v20930_v1 }
 0x88e   : > { %19840 = vmatpush3.msra.mxu1 %v8285_v37  ;;  %19841 = vmatprep.mubr.msk.f32.mxu1 %vm20931_vm1, %v20930_v1 }
 0x88f   : > { %19844 = vmatprep.subr.mxu1 %v20930_v1 }
 0x891   : > { %19842 = vmatmul.mubr.f32.vlgmr.msra.gmra.mrb[30].mxu1 %v8274_v26 }
 0x892   : > { %19845 = vmatpush3.msra.mxu1 %v8208_v35  ;;  %19846 = vmatprep.mubr.msk.f32.mxu1 %vm20931_vm1, %v20930_v1 }
 0x893   : > { %19849 = vmatprep.subr.mxu1 %v20930_v1 }
 0x895   : > { %19847 = vmatmul.mubr.f32.vlgmr.msra.gmra.mrb[32].mxu1 %v8275_v21 }
 0x896   : > { %19850 = vmatpush3.msra.mxu1 %v8286_v39  ;;  %19851 = vmatprep.mubr.msk.f32.mxu1 %vm20931_vm1, %v20930_v1 }
 0x897   : > { %19854 = vmatprep.subr.mxu1 %v20930_v1 }
 0x899   : > { %19852 = vmatmul.mubr.f32.vlgmr.msra.gmra.mrb[34].mxu1 %v8273_v19 }
 0x89a   : > { %19855 = vmatpush3.msra.mxu1 %v8208_v35  ;;  %19856 = vmatprep.mubr.msk.f32.mxu1 %vm20931_vm1, %v20930_v1 }
 0x89b   : > { %19859 = vmatprep.subr.mxu1 %v20930_v1 }
 0x89d   : > { %19857 = vmatmul.mubr.f32.vlgmr.msra.gmra.mrb[36].mxu1 %v8273_v19 }
 0x89e   : > { %19860 = vmatpush3.msra.mxu1 %v21161_v30  ;;  %19861 = vmatprep.mubr.msk.f32.mxu1 %vm20931_vm1, %v20930_v1 }
 0x89f   : > { %19864 = vmatprep.subr.mxu1 %v20930_v1 }
 0x8a1   : > { %19862 = vmatmul.mubr.f32.vlgmr.msra.gmra.mrb[38].mxu1 %v8725_v47 }
 0x8a2   : > { %19865 = vmatpush3.msra.mxu1 %v21193_v55  ;;  %19866 = vmatprep.mubr.msk.f32.mxu1 %vm20931_vm1, %v20930_v1 }
 0x8a3   : > { %19869 = vmatprep.subr.mxu1 %v20930_v1 }
 0x8a9   : > { %19867 = vmatmul.mubr.f32.vlgmr.msra.gmra.mrb[38].mxu1 %v8721_v28 }
 0x8aa   : > { %19870 = vmatpush3.msra.mxu1 %v21177_v38  ;;  %19871 = vmatprep.mubr.msk.f32.mxu1 %vm20931_vm1, %v20930_v1 }
 0x8ab   : > { %19874 = vmatprep.subr.mxu1 %v20930_v1 }
 0x8b1   : > { %19872 = vmatmul.mubr.f32.vlgmr.msra.gmra.mrb[38].mxu1 %v8722_v43  ;;  %v18770_v43 = vld [vmem:[%s22179_s9 + $0x8] sm:$0xff] }
 0x8b2   : > { %19875 = vmatpush3.msra.mxu1 %v21161_v30  ;;  %19876 = vmatprep.mubr.msk.f32.mxu1 %vm20931_vm1, %v20930_v1 }
 0x8b3   : > { %19879 = vmatprep.subr.mxu1 %v20930_v1 }
 0x8b9   : > { %19877 = vmatmul.mubr.f32.vlgmr.msra.gmra.mrb[38].mxu1 %v8723_v44  ;;  %v18774_v44 = vld [vmem:[%s22181_s11 + $0x8] sm:$0xff] }
 0x8ba   : > { %19880 = vmatpush3.msra.mxu1 %v21186_v45  ;;  %19881 = vmatprep.mubr.msk.f32.mxu1 %vm20931_vm1, %v20930_v1 }
 0x8bb   : > { %19884 = vmatprep.subr.mxu1 %v20930_v1 }
 0x8c1   : > { %19882 = vmatmul.mubr.f32.vlgmr.msra.gmra.mrb[38].mxu1 %v8721_v28 }
 0x8c2   : > { %19885 = vmatpush3.msra.mxu1 %v21161_v30  ;;  %19886 = vmatprep.mubr.msk.f32.mxu1 %vm20931_vm1, %v20930_v1 }
 0x8c3   : > { %19889 = vmatprep.subr.mxu1 %v20930_v1 }
 0x8c9   : > { %19887 = vmatmul.mubr.f32.vlgmr.msra.gmra.mrb[38].mxu1 %v8721_v28 }
 0x8ca   : > { %19890 = vmatpush3.msra.mxu1 %v21161_v30  ;;  %19891 = vmatprep.mubr.msk.f32.mxu1 %vm20931_vm1, %v20930_v1 }
 0x8cb   : > { %19894 = vmatprep.subr.mxu1 %v20930_v1 }
 0x8f4   : > { %v7681_v54 = vpop.permute.xlu0 %7680  ;;  %v9108_v56 = vpop.permute.xlu1 %9107 }
 0x8f5   : > { %v7690_v57 = vand.u32 4294901760, %v7681_v54  ;;  %v9109_v58 = vsel %vm989_vm3, %v9108_v56, 0  ;;  %v10025_v9 = vsel %vm989_vm3, %v7681_v54, 0 }
 0x8f6   : > { %v21592_v60 = vand.u32 4294901760, %v9109_v58  ;;  %v21621_v11 = vand.u32 4294901760, %v10025_v9 }
 0x8f7   : > { %v7777_v61 = vsub.f32 %v7681_v54, %v7690_v57  ;;  %19799 = vmatprep.subr.mxu0 %v7690_v57 }
 0x8f8   : > { %v9178_v62 = vsub.f32 %v9109_v58, %v21592_v60  ;;  %19800 = vmatpush3.msra.mxu0 %v7690_v57  ;;  %v9567_v6 = vpop.permute.xlu1 %9566  ;;  %v10094_v13 = vsub.f32 %v10025_v9, %v21621_v11 }
 0x8f9   : > { %19802 = vmatmul.mubr.f32.vlgmr.msra.gmra.mrb[2].mxu0 %v7769_v59  ;;  %v7778_v63 = vand.u32 4294901760, %v7777_v61  ;;  %v9568_v7 = vsel %vm989_vm3, %v9567_v6, 0 }
 0x8fa   : > { %v9179_v0 = vand.u32 4294901760, %v9178_v62  ;;  %19806 = vmatprep.mubr.f32.mxu0 %v21527_v17  ;;  %v21613_v8 = vand.u32 4294901760, %v9568_v7  ;;  %v10095_v15 = vand.u32 4294901760, %v10094_v13 }
 0x8fb   : > { %v7779_v2 = vsub.f32 %v7777_v61, %v7778_v63 }
 0x8fc   : > { %v9180_v3 = vsub.f32 %v9178_v62, %v9179_v0  ;;  %v9637_v10 = vsub.f32 %v9568_v7, %v21613_v8 }
 0x8fd   : > { %v7780_v4 = vand.u32 4294901760, %v7779_v2 }
 0x8fe   : > { %v9181_v5 = vand.u32 4294901760, %v9180_v3  ;;  %v9638_v12 = vand.u32 4294901760, %v9637_v10 }
 0x8ff   : > { %19804 = vmatprep.subr.mxu0 %v7780_v4 }
 0x900   : > { %19805 = vmatpush3.msra.mxu0 %v7780_v4  ;;  %19892 = vmatmul.mubr.f32.vlgmr.msra.gmra.mrb[40].mxu1 %v9181_v5  ;;  %v9639_v14 = vsub.f32 %v9637_v10, %v9638_v12 }
 0x901   : > { %19807 = vmatmul.mubr.f32.vlgmr.msra.gmra.mrb[2].mxu0 %v21588_v50  ;;  %19809 = vmatprep.subr.mxu0 %v7777_v61 }
 0x902   : > { %19810 = vmatpush3.msra.mxu0 %v7777_v61  ;;  %19895 = vmatpush3.msra.mxu1 %v21193_v55  ;;  %v9640_v16 = vand.u32 4294901760, %v9639_v14 }
 0x903   : > { %19814 = vmatprep.subr.mxu0 %v7690_v57  ;;  %19896 = vmatprep.mubr.msk.f32.mxu1 %vm20931_vm1, %v20930_v1 }
 0x904   : > { %19811 = vmatprep.mubr.f32.mxu0 %v21530_v20  ;;  %19899 = vmatprep.subr.mxu1 %v20930_v1 }
 0x908   : > { %19897 = vmatmul.mubr.f32.vlgmr.msra.gmra.mrb[40].mxu1 %v21592_v60 }
 0x909   : > { %19812 = vmatmul.mubr.f32.vlgmr.msra.gmra.mrb[2].mxu0 %v7766_v51  ;;  %19900 = vmatpush3.msra.mxu1 %v21177_v38 }
 0x90a   : > { %19815 = vmatpush3.msra.mxu0 %v7690_v57  ;;  %19901 = vmatprep.mubr.msk.f32.mxu1 %vm20931_vm1, %v20930_v1 }
 0x90b   : > { %19819 = vmatprep.subr.mxu0 %v7778_v63  ;;  %19816 = vmatprep.mubr.f32.mxu0 %v7757_v25 }
 0x90c   : > { %19904 = vmatprep.subr.mxu1 %v20930_v1 }
 0x910   : > { %19902 = vmatmul.mubr.f32.vlgmr.msra.gmra.mrb[40].mxu1 %v9178_v62 }
 0x911   : > { %19817 = vmatmul.mubr.f32.vlgmr.msra.gmra.mrb[2].mxu0 %v7767_v52  ;;  %19905 = vmatpush3.msra.mxu1 %v21161_v30 }
 0x912   : > { %19820 = vmatpush3.msra.mxu0 %v7778_v63  ;;  %19906 = vmatprep.mubr.msk.f32.mxu1 %vm20931_vm1, %v20930_v1  ;;  %v18773_v63 = vld [vmem:[%s22180_s10 + $0x8] sm:$0xff] }
 0x913   : > { %19824 = vmatprep.subr.mxu0 %v7690_v57  ;;  %19821 = vmatprep.mubr.f32.mxu0 %v21527_v17 }
 0x914   : > { %19909 = vmatprep.subr.mxu1 %v20930_v1 }
 0x918   : > { %19907 = vmatmul.mubr.f32.vlgmr.msra.gmra.mrb[40].mxu1 %v9179_v0 }
 0x919   : > { %19822 = vmatmul.mubr.f32.vlgmr.msra.gmra.mrb[2].mxu0 %v21588_v50  ;;  %19910 = vmatpush3.msra.mxu1 %v21186_v45 }
 0x91a   : > { %19825 = vmatpush3.msra.mxu0 %v7690_v57  ;;  %19911 = vmatprep.mubr.msk.f32.mxu1 %vm20931_vm1, %v20930_v1 }
 0x91b   : > { %19826 = vmatprep.mubr.f32.mxu0 %v21527_v17  ;;  %19919 = vmatprep.subr.mxu0 %v20930_v1  ;;  %v10096_v17 = vsub.f32 %v10094_v13, %v10095_v15 }
 0x91c   : > { %19914 = vmatprep.subr.mxu1 %v20930_v1 }
 0x91d   : > { %v10097_v18 = vand.u32 4294901760, %v10096_v17 }
 0x920   : > { %19912 = vmatmul.mubr.f32.vlgmr.msra.gmra.mrb[40].mxu1 %v21592_v60 }
 0x921   : > { %19827 = vmatmul.mubr.f32.vlgmr.msra.gmra.mrb[2].mxu0 %v21588_v50  ;;  %19915 = vmatpush3.msra.mxu1 %v21161_v30  ;;  %v10486_v50 = vsel %vm989_vm3, %v18771_v49, 0 }
 0x922   : > { %19920 = vmatpush3.msra.mxu0 %v21161_v30  ;;  %19921 = vmatprep.mubr.msk.f32.mxu0 %vm20931_vm1, %v20930_v1  ;;  %v10554_v53 = vand.u32 4294901760, %v10486_v50 }
 0x923   : > { %19916 = vmatprep.mubr.msk.f32.mxu1 %vm20931_vm1, %v20930_v1  ;;  %19949 = vmatprep.subr.mxu1 %v20930_v1 }
 0x924   : > { %19924 = vmatprep.subr.mxu0 %v20930_v1  ;;  %v10555_v54 = vsub.f32 %v10486_v50, %v10554_v53 }
 0x925   : > { %19922 = vmatmul.mubr.f32.vlgmr.msra.gmra.mrb[30].mxu0 %v9640_v16 }
 0x926   : > { %19925 = vmatpush3.msra.mxu0 %v21193_v55  ;;  %19926 = vmatprep.mubr.msk.f32.mxu0 %vm20931_vm1, %v20930_v1  ;;  %v10556_v58 = vand.u32 4294901760, %v10555_v54 }
 0x927   : > { %19929 = vmatprep.subr.mxu0 %v20930_v1 }
 0x928   : > { %19917 = vmatmul.mubr.f32.vlgmr.msra.gmra.mrb[40].mxu1 %v21592_v60  ;;  %v10557_v59 = vsub.f32 %v10555_v54, %v10556_v58 }
 0x929   : > { %19950 = vmatpush3.msra.mxu1 %v21161_v30  ;;  %19951 = vmatprep.mubr.msk.f32.mxu1 %vm20931_vm1, %v20930_v1 }
 0x92a   : > { %19954 = vmatprep.subr.mxu1 %v20930_v1  ;;  %v10558_v61 = vand.u32 4294901760, %v10557_v59 }
 0x92c   : > { %19952 = vmatmul.mubr.f32.vlgmr.msra.gmra.mrb[42].mxu1 %v10097_v18 }
 0x92d   : > { %19927 = vmatmul.mubr.f32.vlgmr.msra.gmra.mrb[30].mxu0 %v21613_v8  ;;  %19955 = vmatpush3.msra.mxu1 %v21193_v55 }
 0x92e   : > { %19956 = vmatprep.mubr.msk.f32.mxu1 %vm20931_vm1, %v20930_v1  ;;  %19930 = vmatpush3.msra.mxu0 %v21177_v38 }
 0x92f   : > { %19931 = vmatprep.mubr.msk.f32.mxu0 %vm20931_vm1, %v20930_v1  ;;  %19959 = vmatprep.subr.mxu1 %v20930_v1 }
 0x930   : > { %19934 = vmatprep.subr.mxu0 %v20930_v1 }
 0x934   : > { %19957 = vmatmul.mubr.f32.vlgmr.msra.gmra.mrb[42].mxu1 %v21621_v11 }
 0x935   : > { %19932 = vmatmul.mubr.f32.vlgmr.msra.gmra.mrb[30].mxu0 %v9637_v10  ;;  %19960 = vmatpush3.msra.mxu1 %v21177_v38 }
 0x936   : > { %19961 = vmatprep.mubr.msk.f32.mxu1 %vm20931_vm1, %v20930_v1  ;;  %19935 = vmatpush3.msra.mxu0 %v21161_v30 }
 0x937   : > { %19936 = vmatprep.mubr.msk.f32.mxu0 %vm20931_vm1, %v20930_v1  ;;  %19964 = vmatprep.subr.mxu1 %v20930_v1 }
 0x938   : > { %19939 = vmatprep.subr.mxu0 %v20930_v1 }
 0x93c   : > { %19962 = vmatmul.mubr.f32.vlgmr.msra.gmra.mrb[42].mxu1 %v10094_v13 }
 0x93d   : > { %19937 = vmatmul.mubr.f32.vlgmr.msra.gmra.mrb[30].mxu0 %v9638_v12  ;;  %19965 = vmatpush3.msra.mxu1 %v21161_v30  ;;  %v18772_v12 = vld [vmem:[%s22178_s8 + $0x28] sm:$0xff] }
 0x93e   : > { %19966 = vmatprep.mubr.msk.f32.mxu1 %vm20931_vm1, %v20930_v1  ;;  %19940 = vmatpush3.msra.mxu0 %v21186_v45  ;;  %v10942_v13 = vsel %vm989_vm3, %v18772_v12, 0 }
 0x93f   : > { %19941 = vmatprep.mubr.msk.f32.mxu0 %vm20931_vm1, %v20930_v1  ;;  %19969 = vmatprep.subr.mxu1 %v20930_v1  ;;  %v11010_v14 = vand.u32 4294901760, %v10942_v13 }
 0x940   : > { %19944 = vmatprep.subr.mxu0 %v20930_v1 }
 0x944   : > { %19967 = vmatmul.mubr.f32.vlgmr.msra.gmra.mrb[42].mxu1 %v10095_v15  ;;  %v11011_v15 = vsub.f32 %v10942_v13, %v11010_v14 }
 0x945   : > { %19942 = vmatmul.mubr.f32.vlgmr.msra.gmra.mrb[30].mxu0 %v21613_v8  ;;  %19970 = vmatpush3.msra.mxu1 %v21186_v45 }
 0x946   : > { %19971 = vmatprep.mubr.msk.f32.mxu1 %vm20931_vm1, %v20930_v1  ;;  %19945 = vmatpush3.msra.mxu0 %v21161_v30  ;;  %v11012_v16 = vand.u32 4294901760, %v11011_v15 }
 0x947   : > { %19946 = vmatprep.mubr.msk.f32.mxu0 %vm20931_vm1, %v20930_v1  ;;  %19974 = vmatprep.subr.mxu1 %v20930_v1 }
 0x948   : > { %19979 = vmatprep.subr.mxu0 %v20930_v1  ;;  %v11013_v17 = vsub.f32 %v11011_v15, %v11012_v16 }
 0x94c   : > { %19972 = vmatmul.mubr.f32.vlgmr.msra.gmra.mrb[42].mxu1 %v21621_v11 }
 0x94d   : > { %19947 = vmatmul.mubr.f32.vlgmr.msra.gmra.mrb[30].mxu0 %v21613_v8  ;;  %19975 = vmatpush3.msra.mxu1 %v21161_v30 }
 0x94e   : > { %19976 = vmatprep.mubr.msk.f32.mxu1 %vm20931_vm1, %v20930_v1  ;;  %19981 = vmatprep.mubr.msk.f32.mxu0 %vm20931_vm1, %v20930_v1 }
 0x94f   : > { %19984 = vmatprep.subr.mxu1 %v20930_v1 }
 0x954   : > { %19977 = vmatmul.mubr.f32.vlgmr.msra.gmra.mrb[42].mxu1 %v21621_v11 }
 0x955   : > { %19986 = vmatprep.mubr.msk.f32.mxu1 %vm20931_vm1, %v20930_v1 }
 0x958   : > { %v21694_v19 = vpop.f32.mrb[26].mxu1 }
 0x959   : > { %v19833_v20 = vpop.f32.mrb[27].mxu1 }
 0x960   : > { %v21696_v22 = vpop.f32.mrb[28].mxu1 }
 0x961   : > { %v19838_v24 = vpop.f32.mrb[29].mxu1 }
 0x964   : > { %v21698_v25 = vpop.f32.mrb[30].mxu1 }
 0x965   : > { %v19843_v26 = vpop.f32.mrb[31].mxu1 }
 0x968   : > { %v21700_v27 = vpop.f32.mrb[32].mxu1 }
 0x969   : > { %v19848_v29 = vpop.f32.mrb[33].mxu1 }
 0x96c   : > { %v21702_v21 = vpop.f32.mrb[34].mxu1 }
 0x96d   : > { %v19853_v31 = vpop.f32.mrb[35].mxu1 }
 0x970   : > { %v21704_v23 = vpop.f32.mrb[36].mxu1 }
 0x971   : > { %v19858_v32 = vpop.f32.mrb[37].mxu1 }
 0x99c   : > { %v9097_v33 = vpop.f32.mrb[38].mxu1 }
 0x99d   : > { %9101 = vst.msk [vmem:[#allocation2] sm:$0xff] %vm989_vm3, %v9097_v33  ;;  %9103 = vrot.lane.b32.xlu0 %v9097_v33, %s22207_s17  ;;  %v19888_v34 = vpop.f32.mrb[39].mxu1 }
 0x9fb   : > { %v9553_v35 = vpop.f32.mrb[40].mxu1 }
 0x9fc   : > { %9562 = vrot.lane.b32.xlu0 %v9553_v35, %s22208_s18  ;;  %9558 = vrot.lane.b32.xlu1 %v9553_v35, %s22209_s23  ;;  %v19918_v37 = vpop.f32.mrb[41].mxu1 }
 0xa0f   : > { %v9104_v39 = vpop.permute.xlu0 %9103 }
 0xa10   : > { %9106 = vst.msk [vmem:[#allocation2] sm:$0xff] %vm3424_vm4, %v9104_v39 }
 0xa20   : > { %v10012_v40 = vpop.f32.mrb[30].mxu0 }
 0xa21   : > { %v19948_v36 = vpop.f32.mrb[31].mxu0  ;;  %10021 = vrot.lane.b32.xlu0 %v10012_v40, %s22210_s27  ;;  %10017 = vrot.lane.b32.xlu1 %v10012_v40, %s22211_s28 }
 0xa27   : > { %v10469_v41 = vpop.f32.mrb[42].mxu1 }
 0xa28   : > { %10478 = vrot.lane.b32.xlu0 %v10469_v41, %s20940_s20  ;;  %10474 = vrot.lane.b32.xlu1 %v10469_v41, %s22212_s29  ;;  %v19978_v28 = vpop.f32.mrb[43].mxu1 }
 0xa2c   : > { %8201 = vperm.xlu0 %20896, %v18770_v43  }
 0xa30   : > { %11404 = vperm.xlu0 %20896, %v18774_v44  }
 0xa34   : > { %12418 = vperm.xlu0 %20896, %v18780_v46  }
 0xa6e   : > { %v9563_v47 = vpop.permute.xlu0 %9562  ;;  %v9559_v48 = vpop.permute.xlu1 %9558 }
 0xa6f   : > { %9561 = vst.msk [vmem:[#allocation2] sm:$0xff] %vm3880_vm5, %v9559_v48 }
 0xa70   : > { %9565 = vst.msk [vmem:[#allocation2] sm:$0xff] %vm3885_vm6, %v9563_v47 }
 0xa93   : > { %v10022_v51 = vpop.permute.xlu0 %10021  ;;  %v10018_v52 = vpop.permute.xlu1 %10017 }
 0xa94   : > { %10020 = vst.msk [vmem:[#allocation2] sm:$0xff] %vm4341_vm7, %v10018_v52 }
 0xa95   : > { %10024 = vst.msk [vmem:[#allocation2] sm:$0xff] %vm4346_vm8, %v10022_v51  ;;  %v18777_v51 = vld [vmem:[%s22174_s4 + $0x50] sm:$0xff] }
 0xa96   : > { %v11419_v52 = vsel %vm989_vm3, %v18777_v51, 0 }
 0xa9a   : > { %v10479_v56 = vpop.permute.xlu0 %10478  ;;  %v10475_v57 = vpop.permute.xlu1 %10474 }
 0xa9b   : > { %10477 = vst.msk [vmem:[#allocation2] sm:$0xff] %vm4802_vm9, %v10475_v57 }
 0xa9c   : > { %10481 = vst.msk [vmem:[#allocation2] sm:$0xff] %vm4807_vm10, %v10479_v56 }
 0xaa3   : > { %v10484_v60 = vld [vmem:[#allocation2] sm:$0xff] }
 0xaa4   : > { %10938 = vrot.lane.b32.xlu1 %v10484_v60, %s20940_s20  ;;  %v10489_v62 = vand.u32 4294901760, %v10484_v60 }
 0xaa6   : > { %19980 = vmatpush3.msra.mxu0 %v10489_v62  ;;  %v10566_v0 = vsub.f32 %v10484_v60, %v10489_v62 }
 0xaa7   : > { %19982 = vmatmul.mubr.f32.vlgmr.msra.gmra.mrb[32].mxu0 %v10558_v61  ;;  %19989 = vmatprep.subr.mxu0 %v20930_v1 }
 0xaa8   : > { %11396 = vperm.xlu1 %20897, %v18773_v63   ;;  %19990 = vmatpush3.msra.mxu0 %v10566_v0  ;;  %v10567_v2 = vand.u32 4294901760, %v10566_v0 }
 0xaa9   : > { %19991 = vmatprep.mubr.msk.f32.mxu0 %vm20931_vm1, %v20930_v1  ;;  %19999 = vmatprep.subr.mxu0 %v20930_v1 }
 0xaaa   : > { %v10568_v3 = vsub.f32 %v10566_v0, %v10567_v2 }
 0xaab   : > { %v8202_v4 = vpop.permute.xlu0 %8201  ;;  %19992 = vmatmul.mubr.f32.vlgmr.msra.gmra.mrb[34].mxu0 %v10555_v54  ;;  %v21785_v54 = vand.u32 4294901760, %v11419_v52 }
 0xaac   : > { %v8280_v5 = vadd.f32 %v21694_v19, %v8202_v4  ;;  %20000 = vmatpush3.msra.mxu0 %v10567_v2  ;;  %v10569_v6 = vand.u32 4294901760, %v10568_v3  ;;  %20001 = vmatprep.mubr.msk.f32.mxu0 %vm20931_vm1, %v20930_v1  ;;  %v11014_v19 = vand.u32 4294901760, %v11013_v17 }
 0xaad   : > { %20009 = vmatprep.subr.mxu0 %v20930_v1  ;;  %v11491_v59 = vsub.f32 %v11419_v52, %v21785_v54 }
 0xaae   : > { %v8356_v7 = vadd.f32 %v21696_v22, %v8280_v5  ;;  %19985 = vmatpush3.msra.mxu1 %v10569_v6 }
 0xaaf   : > { %19987 = vmatmul.mubr.f32.vlgmr.msra.gmra.mrb[44].mxu1 %v10554_v53  ;;  %19994 = vmatprep.subr.mxu1 %v20930_v1  ;;  %v11492_v63 = vand.u32 4294901760, %v11491_v59  ;;  %v11405_v13 = vpop.permute.xlu0 %11404 }
 0xab0   : > { %v8430_v8 = vadd.f32 %v21698_v25, %v8356_v7  ;;  %19995 = vmatpush3.msra.mxu1 %v10489_v62  ;;  %19996 = vmatprep.mubr.msk.f32.mxu1 %vm20931_vm1, %v20930_v1 }
 0xab1   : > { %20004 = vmatprep.subr.mxu1 %v20930_v1  ;;  %20002 = vmatmul.mubr.f32.vlgmr.msra.gmra.mrb[36].mxu0 %v10554_v53  ;;  %v11493_v3 = vsub.f32 %v11491_v59, %v11492_v63 }
 0xab2   : > { %v8504_v9 = vadd.f32 %v21700_v27, %v8430_v8  ;;  %20011 = vmatprep.mubr.msk.f32.mxu0 %vm20931_vm1, %v20930_v1 }
 0xab3   : > { %19997 = vmatmul.mubr.f32.vlgmr.msra.gmra.mrb[46].mxu1 %v10556_v58  ;;  %v11494_v6 = vand.u32 4294901760, %v11493_v3  ;;  %v12419_v51 = vpop.permute.xlu0 %12418 }
 0xab4   : > { %20005 = vmatpush3.msra.mxu1 %v10489_v62  ;;  %20006 = vmatprep.mubr.msk.f32.mxu1 %vm20931_vm1, %v20930_v1  ;;  %v8578_v10 = vadd.f32 %v21702_v21, %v8504_v9 }
 0xab5   : > { %20014 = vmatprep.subr.mxu1 %v20930_v1 }
 0xab6   : > { %v8650_v11 = vadd.f32 %v21704_v23, %v8578_v10 }
 0xab7   : > { %20007 = vmatmul.mubr.f32.vlgmr.msra.gmra.mrb[48].mxu1 %v10554_v53 }
 0xab8   : > { %20016 = vmatprep.mubr.msk.f32.mxu1 %vm20931_vm1, %v20930_v1 }
 0xb16   : > { %v10939_v18 = vpop.permute.xlu1 %10938 }
 0xb17   : > { %v10945_v20 = vand.u32 4294901760, %v10939_v18 }
 0xb19   : > { %v11022_v22 = vsub.f32 %v10939_v18, %v10945_v20  ;;  %20010 = vmatpush3.msra.mxu0 %v10945_v20 }
 0xb1a   : > { %20012 = vmatmul.mubr.f32.vlgmr.msra.gmra.mrb[38].mxu0 %v11014_v19  ;;  %20019 = vmatprep.subr.mxu0 %v20930_v1 }
 0xb1b   : > { %v11023_v24 = vand.u32 4294901760, %v11022_v22  ;;  %20020 = vmatpush3.msra.mxu0 %v11022_v22  ;;  %20021 = vmatprep.mubr.msk.f32.mxu0 %vm20931_vm1, %v20930_v1 }
 0xb1c   : > { %20029 = vmatprep.subr.mxu0 %v20930_v1 }
 0xb1d   : > { %v11024_v25 = vsub.f32 %v11022_v22, %v11023_v24 }
 0xb1e   : > { %20022 = vmatmul.mubr.f32.vlgmr.msra.gmra.mrb[40].mxu0 %v11011_v15  ;;  %v18779_v15 = vld [vmem:[%s22175_s5 + $0x20] sm:$0xff] }
 0xb1f   : > { %v11025_v26 = vand.u32 4294901760, %v11024_v25  ;;  %20030 = vmatpush3.msra.mxu0 %v11023_v24  ;;  %20031 = vmatprep.mubr.msk.f32.mxu0 %vm20931_vm1, %v20930_v1 }
 0xb21   : > { %20015 = vmatpush3.msra.mxu1 %v11025_v26 }
 0xb22   : > { %20017 = vmatmul.mubr.f32.vlgmr.msra.gmra.mrb[50].mxu1 %v11010_v14  ;;  %20024 = vmatprep.subr.mxu1 %v20930_v1 }
 0xb23   : > { %20025 = vmatpush3.msra.mxu1 %v10945_v20  ;;  %20026 = vmatprep.mubr.msk.f32.mxu1 %vm20931_vm1, %v20930_v1 }
 0xb24   : > { %20034 = vmatprep.subr.mxu1 %v20930_v1  ;;  %20032 = vmatmul.mubr.f32.vlgmr.msra.gmra.mrb[42].mxu0 %v11010_v14 }
 0xb25   : > { %20041 = vmatprep.mubr.f32.mxu0 %v11494_v6 }
 0xb26   : > { %20027 = vmatmul.mubr.f32.vlgmr.msra.gmra.mrb[52].mxu1 %v11012_v16  ;;  %v18778_v16 = vld [vmem:[%s22174_s4 + $0x58] sm:$0xff] }
 0xb27   : > { %20035 = vmatpush3.msra.mxu1 %v10945_v20  ;;  %20036 = vmatprep.mubr.msk.f32.mxu1 %vm20931_vm1, %v20930_v1  ;;  %v11422_v17 = vsel %vm989_vm3, %v18778_v16, 0 }
 0xb28   : > { %20129 = vmatprep.subr.mxu1 %v20930_v1  ;;  %v11500_v18 = vand.u32 4294901760, %v11422_v17 }
 0xb2a   : > { %20037 = vmatmul.mubr.f32.vlgmr.msra.gmra.mrb[54].mxu1 %v11010_v14  ;;  %v11501_v19 = vsub.f32 %v11422_v17, %v11500_v18 }
 0xb2b   : > { %20131 = vmatprep.mubr.msk.f32.mxu1 %vm20931_vm1, %v20930_v1 }
 0xb7a   : > { %v10560_v27 = vpop.f32.mrb[32].mxu0 }
 0xb7b   : > { %v19983_v29 = vpop.f32.mrb[33].mxu0 }
 0xb7e   : > { %v10710_v21 = vpop.f32.mrb[34].mxu0 }
 0xb7f   : > { %v19993_v31 = vpop.f32.mrb[35].mxu0 }
 0xb80   : > { %v18775_v31 = vld [vmem:[%s22174_s4 + $0x40] sm:$0xff] }
 0xb82   : > { %v10636_v23 = vpop.f32.mrb[44].mxu1 }
 0xb83   : > { %v10637_v32 = vadd.f32 %v10636_v23, %v10560_v27  ;;  %v19988_v33 = vpop.f32.mrb[45].mxu1  ;;  %v11914_v23 = vsel %vm989_vm3, %v18775_v31, 0 }
 0xb84   : > { %v10858_v34 = vpop.f32.mrb[36].mxu0  ;;  %v18776_v33 = vld [vmem:[%s22174_s4 + $0x48] sm:$0xff] }
 0xb85   : > { %v10711_v35 = vadd.f32 %v10710_v21, %v10637_v32  ;;  %v20003_v37 = vpop.f32.mrb[37].mxu0  ;;  %v11985_v32 = vand.u32 4294901760, %v11914_v23 }
 0xb86   : > { %v10784_v39 = vpop.f32.mrb[46].mxu1  ;;  %v11917_v37 = vsel %vm989_vm3, %v18776_v33, 0 }
 0xb87   : > { %v10785_v40 = vadd.f32 %v10784_v39, %v10711_v35  ;;  %v19998_v36 = vpop.f32.mrb[47].mxu1  ;;  %v11986_v35 = vsub.f32 %v11914_v23, %v11985_v32 }
 0xb89   : > { %v10859_v41 = vadd.f32 %v10858_v34, %v10785_v40  ;;  %v11995_v40 = vand.u32 4294901760, %v11917_v37  ;;  %v11987_v36 = vand.u32 4294901760, %v11986_v35 }
 0xb8a   : > { %v10930_v28 = vpop.f32.mrb[48].mxu1 }
 0xb8b   : > { %v10931_v43 = vadd.f32 %v10930_v28, %v10859_v41  ;;  %v20008_v44 = vpop.f32.mrb[49].mxu1  ;;  %v11996_v28 = vsub.f32 %v11917_v37, %v11995_v40 }
 0xb8d   : > { %v10934_v46 = vadd.f32 %v10931_v43, %v8650_v11  ;;  %v11397_v11 = vpop.permute.xlu1 %11396  ;;  %v11988_v43 = vsub.f32 %v11986_v35, %v11987_v36 }
 0xbed   : > { %v11016_v47 = vpop.f32.mrb[38].mxu0 }
 0xbee   : > { %v20013_v48 = vpop.f32.mrb[39].mxu0 }
 0xbf1   : > { %v11166_v49 = vpop.f32.mrb[40].mxu0 }
 0xbf2   : > { %v20023_v50 = vpop.f32.mrb[41].mxu0 }
 0xbf5   : > { %v11092_v53 = vpop.f32.mrb[50].mxu1 }
 0xbf6   : > { %v11093_v56 = vadd.f32 %v11092_v53, %v11016_v47  ;;  %v20018_v57 = vpop.f32.mrb[51].mxu1  ;;  %v11989_v47 = vand.u32 4294901760, %v11988_v43 }
 0xbf7   : > { %v11314_v58 = vpop.f32.mrb[42].mxu0 }
 0xbf8   : > { %v11167_v60 = vadd.f32 %v11166_v49, %v11093_v56  ;;  %v20033_v61 = vpop.f32.mrb[43].mxu0 }
 0xbf9   : > { %v11240_v62 = vpop.f32.mrb[52].mxu1 }
 0xbfa   : > { %v11241_v0 = vadd.f32 %v11240_v62, %v11167_v60  ;;  %v20028_v2 = vpop.f32.mrb[53].mxu1 }
 0xbfc   : > { %v11315_v4 = vadd.f32 %v11314_v58, %v11241_v0  ;;  %v18785_v58 = vld [vmem:[%s22178_s8 + $0x30] sm:$0xff] }
 0xbfd   : > { %v11386_v5 = vpop.f32.mrb[54].mxu1  ;;  %v12960_v60 = vsel %vm989_vm3, %v18785_v58, 0 }
 0xbfe   : > { %v11387_v7 = vadd.f32 %v11386_v5, %v11315_v4  ;;  %v20038_v8 = vpop.f32.mrb[55].mxu1  ;;  %v13028_v2 = vand.u32 4294901760, %v12960_v60 }
 0xc00   : > { %v11390_v9 = vadd.f32 %v11387_v7, %v10934_v46  ;;  %v11997_v46 = vand.u32 4294901760, %v11996_v28  ;;  %v13029_v7 = vsub.f32 %v12960_v60, %v13028_v2 }
 0xc02   : > { %v11391_v10 = vadd.f32 %v11390_v9, %v21504_v42  ;;  %v11502_v42 = vand.u32 4294901760, %v11501_v19  ;;  %v11998_v49 = vsub.f32 %v11996_v28, %v11997_v46 }
 0xc04   : > { %v11399_v12 = vmul.f32 %v11397_v11, %v11391_v10  ;;  %v11503_v20 = vsub.f32 %v11501_v19, %v11502_v42  ;;  %v11999_v50 = vand.u32 4294901760, %v11998_v49  ;;  %v13030_v10 = vand.u32 4294901760, %v13029_v7 }
 0xc06   : > { %v11407_v14 = vadd.f32 %v11405_v13, %v11399_v12  ;;  %v11504_v25 = vand.u32 4294901760, %v11503_v20  ;;  %v13031_v11 = vsub.f32 %v13029_v7, %v13030_v10 }
 0xc08   : > { %11415 = vrot.lane.b32.xlu1 %v11407_v14, %s22206_s19  ;;  %v11920_v34 = vand.u32 4294901760, %v11407_v14 }
 0xc0a   : > { %v12007_v39 = vsub.f32 %v11407_v14, %v11920_v34 }
 0xc0c   : > { %12413 = vperm.xlu1 %20897, %v18779_v15   ;;  %v12008_v41 = vand.u32 4294901760, %v12007_v39  ;;  %v13032_v15 = vand.u32 4294901760, %v13031_v11 }
 0xc0e   : > { %v12009_v44 = vsub.f32 %v12007_v39, %v12008_v41 }
 0xc10   : > { %v12010_v48 = vand.u32 4294901760, %v12009_v44 }
 0xc7a   : > { %v21797_v22 = vpop.permute.xlu1 %11415 }
 0xc7b   : > { %v11425_v24 = vand.u32 4294901760, %v21797_v22 }
 0xc7d   : > { %v11512_v26 = vsub.f32 %v21797_v22, %v11425_v24  ;;  %20039 = vmatprep.subr.mxu0 %v11425_v24 }
 0xc7e   : > { %20040 = vmatpush3.msra.mxu0 %v11425_v24 }
 0xc7f   : > { %20042 = vmatmul.mubr.f32.vlgmr.msra.gmra.mrb[44].mxu0 %v11504_v25  ;;  %v11513_v27 = vand.u32 4294901760, %v11512_v26 }
 0xc80   : > { %20046 = vmatprep.mubr.f32.mxu0 %v21785_v54 }
 0xc81   : > { %v11514_v29 = vsub.f32 %v11512_v26, %v11513_v27 }
 0xc83   : > { %v11515_v21 = vand.u32 4294901760, %v11514_v29 }
 0xc85   : > { %20044 = vmatprep.subr.mxu0 %v11515_v21 }
 0xc86   : > { %20045 = vmatpush3.msra.mxu0 %v11515_v21  ;;  %v18782_v21 = vld [vmem:[%s22176_s6 + $0x28] sm:$0xff] }
 0xc87   : > { %20047 = vmatmul.mubr.f32.vlgmr.msra.gmra.mrb[44].mxu0 %v11500_v18  ;;  %20049 = vmatprep.subr.mxu0 %v11512_v26  ;;  %v12442_v31 = vsel %vm989_vm3, %v18782_v21, 0 }
 0xc88   : > { %20050 = vmatpush3.msra.mxu0 %v11512_v26  ;;  %20051 = vmatprep.mubr.f32.mxu0 %v11491_v59  ;;  %v18781_v59 = vld [vmem:[%s22176_s6 + $0x20] sm:$0xff]  ;;  %v12520_v23 = vand.u32 4294901760, %v12442_v31 }
 0xc89   : > { %20054 = vmatprep.subr.mxu0 %v11425_v24  ;;  %v12439_v61 = vsel %vm989_vm3, %v18781_v59, 0 }
 0xc8b   : > { %v12414_v62 = vpop.permute.xlu1 %12413 }
 0xc8f   : > { %20052 = vmatmul.mubr.f32.vlgmr.msra.gmra.mrb[44].mxu0 %v11501_v19 }
 0xc90   : > { %20055 = vmatpush3.msra.mxu0 %v11425_v24  ;;  %20056 = vmatprep.mubr.f32.mxu0 %v11492_v63  ;;  %v21820_v63 = vand.u32 4294901760, %v12439_v61 }
 0xc91   : > { %20059 = vmatprep.subr.mxu0 %v11513_v27 }
 0xc92   : > { %v21823_v3 = vsub.f32 %v12439_v61, %v21820_v63 }
 0xc94   : > { %v12512_v6 = vand.u32 4294901760, %v21823_v3 }
 0xc96   : > { %v12513_v8 = vsub.f32 %v21823_v3, %v12512_v6 }
 0xc97   : > { %20057 = vmatmul.mubr.f32.vlgmr.msra.gmra.mrb[44].mxu0 %v11502_v42 }
 0xc98   : > { %20060 = vmatpush3.msra.mxu0 %v11513_v27  ;;  %20061 = vmatprep.mubr.f32.mxu0 %v21785_v54  ;;  %v12514_v9 = vand.u32 4294901760, %v12513_v8 }
 0xc99   : > { %20064 = vmatprep.subr.mxu0 %v11425_v24 }
 0xc9f   : > { %20062 = vmatmul.mubr.f32.vlgmr.msra.gmra.mrb[44].mxu0 %v11500_v18 }
 0xca0   : > { %20065 = vmatpush3.msra.mxu0 %v11425_v24  ;;  %20066 = vmatprep.mubr.f32.mxu0 %v21785_v54 }
 0xca1   : > { %20069 = vmatprep.subr.mxu0 %v11920_v34 }
 0xca7   : > { %20067 = vmatmul.mubr.f32.vlgmr.msra.gmra.mrb[44].mxu0 %v11500_v18 }
 0xca8   : > { %20070 = vmatpush3.msra.mxu0 %v11920_v34  ;;  %20071 = vmatprep.mubr.f32.mxu0 %v11989_v47 }
 0xca9   : > { %20074 = vmatprep.subr.mxu0 %v12010_v48 }
 0xcaf   : > { %20072 = vmatmul.mubr.f32.vlgmr.msra.gmra.mrb[44].mxu0 %v11999_v50 }
 0xcb0   : > { %20075 = vmatpush3.msra.mxu0 %v12010_v48  ;;  %20076 = vmatprep.mubr.f32.mxu0 %v11985_v32 }
 0xcb1   : > { %20079 = vmatprep.subr.mxu0 %v12007_v39 }
 0xcb7   : > { %20077 = vmatmul.mubr.f32.vlgmr.msra.gmra.mrb[44].mxu0 %v11995_v40 }
 0xcb8   : > { %20080 = vmatpush3.msra.mxu0 %v12007_v39  ;;  %20081 = vmatprep.mubr.f32.mxu0 %v11986_v35 }
 0xcb9   : > { %20084 = vmatprep.subr.mxu0 %v11920_v34 }
 0xcbf   : > { %20082 = vmatmul.mubr.f32.vlgmr.msra.gmra.mrb[44].mxu0 %v11996_v28 }
 0xcc0   : > { %20085 = vmatpush3.msra.mxu0 %v11920_v34  ;;  %20086 = vmatprep.mubr.f32.mxu0 %v11987_v36 }
 0xcc1   : > { %20089 = vmatprep.subr.mxu0 %v12008_v41 }
 0xcc7   : > { %20087 = vmatmul.mubr.f32.vlgmr.msra.gmra.mrb[44].mxu0 %v11997_v46 }
 0xcc8   : > { %20090 = vmatpush3.msra.mxu0 %v12008_v41  ;;  %20091 = vmatprep.mubr.f32.mxu0 %v11985_v32 }
 0xcc9   : > { %20094 = vmatprep.subr.mxu0 %v11920_v34 }
 0xccf   : > { %20092 = vmatmul.mubr.f32.vlgmr.msra.gmra.mrb[44].mxu0 %v11995_v40 }
 0xcd0   : > { %20095 = vmatpush3.msra.mxu0 %v11920_v34  ;;  %20096 = vmatprep.mubr.f32.mxu0 %v11985_v32  ;;  %v12521_v32 = vsub.f32 %v12442_v31, %v12520_v23 }
 0xcd2   : > { %v12522_v33 = vand.u32 4294901760, %v12521_v32 }
 0xcd4   : > { %v12523_v34 = vsub.f32 %v12521_v32, %v12522_v33 }
 0xcd6   : > { %v12524_v36 = vand.u32 4294901760, %v12523_v34 }
 0xcd7   : > { %20097 = vmatmul.mubr.f32.vlgmr.msra.gmra.mrb[44].mxu0 %v11995_v40 }
 0xcd8   : > { %20101 = vmatprep.mubr.f32.mxu0 %v12514_v9 }
 0xdaa   : > { %v20098_v52 = vpop.f32.mrb[44].mxu0 }
 0xdab   : > { %v12422_v53 = vadd.f32 %v20098_v52, %v12419_v51  ;;  %v12398_v54 = vpop.f32.mrb[45].mxu0 }
 0xdac   : > { %v12421_v0 = vadd.f32 %v12414_v62, %v12398_v54 }
 0xdad   : > { %v12424_v56 = vsub.f32 0.0, %v12422_v53 }
 0xdaf   : > { %v12425_v57 = vmul.f32 1.442695, %v12424_v56 }
 0xdb1   : > { %20910 = vpow2.f32 %v12425_v57 }
 0xdb2   : > { %20912 = vtanh.f32 %v12421_v0 }
 0xdbb   : > { %v20911_v4 = vpop.eup %20910 }
 0xdbc   : > { %v12427_v5 = vadd.f32 1.0, %v20911_v4  ;;  %v20913_v12 = vpop.eup %20912 }
 0xdbe   : > { %20914 = vrcp.f32 %v12427_v5 }
 0xdc8   : > { %v20915_v13 = vpop.eup %20914 }
 0xdc9   : > { %v12430_v14 = vmul.f32 %v20915_v13, %v20913_v12 }
 0xdcb   : > { %13862 = vrot.lane.b32.xlu1 %v12430_v14, %s22206_s19  ;;  %12435 = vrot.lane.b32.xlu0 %v12430_v14, %s22213_s24  ;;  %v12963_v16 = vand.u32 4294901760, %v12430_v14  ;;  %v13408_v20 = vsel %vm989_vm3, %v12430_v14, 0 }
 0xdcc   : > { %v13476_v24 = vand.u32 4294901760, %v13408_v20 }
 0xdcd   : > { %20130 = vmatpush3.msra.mxu1 %v12963_v16  ;;  %v13040_v17 = vsub.f32 %v12430_v14, %v12963_v16  ;;  %v18786_v14 = vld [vmem:[%s22179_s9 + $0x10] sm:$0xff] }
 0xdce   : > { %20132 = vmatmul.mubr.f32.vlgmr.msra.gmra.mrb[56].mxu1 %v13032_v15  ;;  %20134 = vmatprep.subr.mxu1 %v20930_v1  ;;  %v13477_v25 = vsub.f32 %v13408_v20, %v13476_v24  ;;  %v18790_v15 = vld [vmem:[%s22181_s11 + $0x10] sm:$0xff]  ;;  %v17701_v20 = vld [vmem:[%s22183_s13] sm:$0xff] }
 0xdcf   : > { %v13041_v18 = vand.u32 4294901760, %v13040_v17  ;;  %20136 = vmatprep.mubr.msk.f32.mxu1 %vm20931_vm1, %v20930_v1 }
 0xdd0   : > { %v13478_v26 = vand.u32 4294901760, %v13477_v25 }
 0xdd1   : > { %v13042_v19 = vsub.f32 %v13040_v17, %v13041_v18 }
 0xdd2   : > { %v13479_v27 = vsub.f32 %v13477_v25, %v13478_v26 }
 0xdd3   : > { %v13043_v42 = vand.u32 4294901760, %v13042_v19  ;;  %v18783_v19 = vld [vmem:[%s22177_s7 + $0x20] sm:$0xff] }
 0xdd4   : > { %v13480_v29 = vand.u32 4294901760, %v13479_v27  ;;  %v18787_v27 = vld [vmem:[%s22178_s8 + $0x38] sm:$0xff] }
 0xdd5   : > { %20135 = vmatpush3.msra.mxu1 %v13043_v42  ;;  %v18799_v42 = vld [vmem:[%s22177_s7 + $0x30] sm:$0xff] }
 0xdd6   : > { %20137 = vmatmul.mubr.f32.vlgmr.msra.gmra.mrb[58].mxu1 %v13028_v2  ;;  %20139 = vmatprep.subr.mxu1 %v20930_v1 }
 0xdd7   : > { %20140 = vmatpush3.msra.mxu1 %v13040_v17  ;;  %20141 = vmatprep.mubr.msk.f32.mxu1 %vm20931_vm1, %v20930_v1  ;;  %v2004_v17 = vld [vmem:[%s22177_s7] sm:$0xff] }
 0xdd8   : > { %20144 = vmatprep.subr.mxu1 %v20930_v1 }
 0xdda   : > { %20142 = vmatmul.mubr.f32.vlgmr.msra.gmra.mrb[60].mxu1 %v13029_v7 }
 0xddb   : > { %20145 = vmatpush3.msra.mxu1 %v12963_v16  ;;  %20146 = vmatprep.mubr.msk.f32.mxu1 %vm20931_vm1, %v20930_v1 }
 0xddc   : > { %20149 = vmatprep.subr.mxu1 %v20930_v1 }
 0xdde   : > { %20147 = vmatmul.mubr.f32.vlgmr.msra.gmra.mrb[62].mxu1 %v13030_v10 }
 0xddf   : > { %20150 = vmatpush3.msra.mxu1 %v13041_v18  ;;  %20151 = vmatprep.mubr.msk.f32.mxu1 %vm20931_vm1, %v20930_v1  ;;  %v18767_v18 = vld [vmem:[%s22177_s7 + $0x10] sm:$0xff] }
 0xde0   : > { %20154 = vmatprep.subr.mxu1 %v20930_v1 }
 0xde2   : > { %20152 = vmatmul.mubr.f32.vlgmr.msra.gmra.mrb[64].mxu1 %v13028_v2 }
 0xde3   : > { %20155 = vmatpush3.msra.mxu1 %v12963_v16  ;;  %20156 = vmatprep.mubr.msk.f32.mxu1 %vm20931_vm1, %v20930_v1  ;;  %v18796_v16 = vld [vmem:[%s22175_s5 + $0x38] sm:$0xff] }
 0xde4   : > { %20159 = vmatprep.subr.mxu1 %v20930_v1 }
 0xde6   : > { %20157 = vmatmul.mubr.f32.vlgmr.msra.gmra.mrb[66].mxu1 %v13028_v2 }
 0xde7   : > { %20160 = vmatpush3.msra.mxu1 %v21161_v30  ;;  %20161 = vmatprep.mubr.msk.f32.mxu1 %vm20931_vm1, %v20930_v1 }
 0xde8   : > { %20164 = vmatprep.subr.mxu1 %v20930_v1 }
 0xdea   : > { %20162 = vmatmul.mubr.f32.vlgmr.msra.gmra.mrb[68].mxu1 %v13480_v29  ;;  %v14782_v29 = vsel %vm989_vm3, %v18787_v27, 0  ;;  %v18793_v27 = vld [vmem:[%s22174_s4 + $0x70] sm:$0xff] }
 0xdeb   : > { %20165 = vmatpush3.msra.mxu1 %v21193_v55  ;;  %20166 = vmatprep.mubr.msk.f32.mxu1 %vm20931_vm1, %v20930_v1  ;;  %v14850_v21 = vand.u32 4294901760, %v14782_v29 }
 0xdec   : > { %20169 = vmatprep.subr.mxu1 %v20930_v1 }
 0xded   : > { %v14851_v31 = vsub.f32 %v14782_v29, %v14850_v21  ;;  %v15715_v29 = vsel %vm989_vm3, %v18793_v27, 0 }
 0xdf2   : > { %20167 = vmatmul.mubr.f32.vlgmr.msra.gmra.mrb[68].mxu1 %v13476_v24 }
 0xdf3   : > { %20170 = vmatpush3.msra.mxu1 %v21177_v38  ;;  %20171 = vmatprep.mubr.msk.f32.mxu1 %vm20931_vm1, %v20930_v1 }
 0xdf4   : > { %20174 = vmatprep.subr.mxu1 %v20930_v1 }
 0xdfa   : > { %20172 = vmatmul.mubr.f32.vlgmr.msra.gmra.mrb[68].mxu1 %v13477_v25 }
 0xdfb   : > { %20175 = vmatpush3.msra.mxu1 %v21161_v30  ;;  %20176 = vmatprep.mubr.msk.f32.mxu1 %vm20931_vm1, %v20930_v1 }
 0xdfc   : > { %20179 = vmatprep.subr.mxu1 %v20930_v1 }
 0xe02   : > { %20177 = vmatmul.mubr.f32.vlgmr.msra.gmra.mrb[68].mxu1 %v13478_v26 }
 0xe03   : > { %20180 = vmatpush3.msra.mxu1 %v21186_v45  ;;  %20181 = vmatprep.mubr.msk.f32.mxu1 %vm20931_vm1, %v20930_v1 }
 0xe04   : > { %20184 = vmatprep.subr.mxu1 %v20930_v1 }
 0xe0a   : > { %20182 = vmatmul.mubr.f32.vlgmr.msra.gmra.mrb[68].mxu1 %v13476_v24 }
 0xe0b   : > { %20185 = vmatpush3.msra.mxu1 %v21161_v30  ;;  %20186 = vmatprep.mubr.msk.f32.mxu1 %vm20931_vm1, %v20930_v1 }
 0xe0c   : > { %20189 = vmatprep.subr.mxu1 %v20930_v1 }
 0xe12   : > { %20187 = vmatmul.mubr.f32.vlgmr.msra.gmra.mrb[68].mxu1 %v13476_v24  ;;  %v18225_v24 = vld [vmem:[%s22185_s15] sm:$0x3f] }
 0xe13   : > { %20190 = vmatpush3.msra.mxu1 %v21161_v30  ;;  %20191 = vmatprep.mubr.msk.f32.mxu1 %vm20931_vm1, %v20930_v1 }
 0xe14   : > { %20194 = vmatprep.subr.mxu1 %v20930_v1 }
 0xe3d   : > { %v13863_v35 = vpop.permute.xlu1 %13862  ;;  %v12436_v37 = vpop.permute.xlu0 %12435 }
 0xe3e   : > { %v13864_v39 = vsel %vm989_vm3, %v13863_v35, 0  ;;  %v12445_v40 = vand.u32 4294901760, %v12436_v37  ;;  %v14321_v51 = vsel %vm989_vm3, %v12436_v37, 0 }
 0xe3f   : > { %v21881_v41 = vand.u32 4294901760, %v13864_v39  ;;  %v14389_v52 = vand.u32 4294901760, %v14321_v51 }
 0xe40   : > { %v12532_v28 = vsub.f32 %v12436_v37, %v12445_v40  ;;  %20099 = vmatprep.subr.mxu0 %v12445_v40 }
 0xe41   : > { %v13933_v43 = vsub.f32 %v13864_v39, %v21881_v41  ;;  %20100 = vmatpush3.msra.mxu0 %v12445_v40  ;;  %v14390_v53 = vsub.f32 %v14321_v51, %v14389_v52 }
 0xe42   : > { %20102 = vmatmul.mubr.f32.vlgmr.msra.gmra.mrb[2].mxu0 %v12524_v36  ;;  %v12533_v44 = vand.u32 4294901760, %v12532_v28 }
 0xe43   : > { %v13934_v46 = vand.u32 4294901760, %v13933_v43  ;;  %20106 = vmatprep.mubr.f32.mxu0 %v21820_v63  ;;  %v14391_v54 = vand.u32 4294901760, %v14390_v53 }
 0xe44   : > { %v12534_v47 = vsub.f32 %v12532_v28, %v12533_v44 }
 0xe45   : > { %v13935_v48 = vsub.f32 %v13933_v43, %v13934_v46  ;;  %v14392_v56 = vsub.f32 %v14390_v53, %v14391_v54 }
 0xe46   : > { %v12535_v49 = vand.u32 4294901760, %v12534_v47 }
 0xe47   : > { %v13936_v50 = vand.u32 4294901760, %v13935_v48  ;;  %v14393_v57 = vand.u32 4294901760, %v14392_v56 }
 0xe48   : > { %20104 = vmatprep.subr.mxu0 %v12535_v49 }
 0xe49   : > { %20105 = vmatpush3.msra.mxu0 %v12535_v49  ;;  %20192 = vmatmul.mubr.f32.vlgmr.msra.gmra.mrb[70].mxu1 %v13936_v50 }
 0xe4a   : > { %20107 = vmatmul.mubr.f32.vlgmr.msra.gmra.mrb[2].mxu0 %v12520_v23  ;;  %20109 = vmatprep.subr.mxu0 %v12532_v28 }
 0xe4b   : > { %20110 = vmatpush3.msra.mxu0 %v12532_v28  ;;  %20195 = vmatpush3.msra.mxu1 %v21193_v55 }
 0xe4c   : > { %20114 = vmatprep.subr.mxu0 %v12445_v40  ;;  %20196 = vmatprep.mubr.msk.f32.mxu1 %vm20931_vm1, %v20930_v1 }
 0xe4d   : > { %20111 = vmatprep.mubr.f32.mxu0 %v21823_v3  ;;  %20199 = vmatprep.subr.mxu1 %v20930_v1 }
 0xe51   : > { %20197 = vmatmul.mubr.f32.vlgmr.msra.gmra.mrb[70].mxu1 %v21881_v41 }
 0xe52   : > { %20112 = vmatmul.mubr.f32.vlgmr.msra.gmra.mrb[2].mxu0 %v12521_v32  ;;  %20200 = vmatpush3.msra.mxu1 %v21177_v38 }
 0xe53   : > { %20115 = vmatpush3.msra.mxu0 %v12445_v40  ;;  %20201 = vmatprep.mubr.msk.f32.mxu1 %vm20931_vm1, %v20930_v1 }
 0xe54   : > { %20119 = vmatprep.subr.mxu0 %v12533_v44  ;;  %20116 = vmatprep.mubr.f32.mxu0 %v12512_v6 }
 0xe55   : > { %20204 = vmatprep.subr.mxu1 %v20930_v1 }
 0xe59   : > { %20202 = vmatmul.mubr.f32.vlgmr.msra.gmra.mrb[70].mxu1 %v13933_v43 }
 0xe5a   : > { %20117 = vmatmul.mubr.f32.vlgmr.msra.gmra.mrb[2].mxu0 %v12522_v33  ;;  %20205 = vmatpush3.msra.mxu1 %v21161_v30  ;;  %v14852_v33 = vand.u32 4294901760, %v14851_v31 }
 0xe5b   : > { %20120 = vmatpush3.msra.mxu0 %v12533_v44  ;;  %20206 = vmatprep.mubr.msk.f32.mxu1 %vm20931_vm1, %v20930_v1 }
 0xe5c   : > { %20124 = vmatprep.subr.mxu0 %v12445_v40  ;;  %20121 = vmatprep.mubr.f32.mxu0 %v21820_v63  ;;  %v14853_v34 = vsub.f32 %v14851_v31, %v14852_v33 }
 0xe5d   : > { %20209 = vmatprep.subr.mxu1 %v20930_v1 }
 0xe5e   : > { %v14854_v37 = vand.u32 4294901760, %v14853_v34 }
 0xe61   : > { %20207 = vmatmul.mubr.f32.vlgmr.msra.gmra.mrb[70].mxu1 %v13934_v46 }
 0xe62   : > { %20122 = vmatmul.mubr.f32.vlgmr.msra.gmra.mrb[2].mxu0 %v12520_v23  ;;  %20210 = vmatpush3.msra.mxu1 %v21186_v45 }
 0xe63   : > { %20125 = vmatpush3.msra.mxu0 %v12445_v40  ;;  %20211 = vmatprep.mubr.msk.f32.mxu1 %vm20931_vm1, %v20930_v1  ;;  %v18789_v40 = vld [vmem:[%s22180_s10 + $0x10] sm:$0xff] }
 0xe64   : > { %20126 = vmatprep.mubr.f32.mxu0 %v21820_v63  ;;  %20219 = vmatprep.subr.mxu0 %v20930_v1 }
 0xe65   : > { %20214 = vmatprep.subr.mxu1 %v20930_v1 }
 0xe69   : > { %20212 = vmatmul.mubr.f32.vlgmr.msra.gmra.mrb[70].mxu1 %v21881_v41 }
 0xe6a   : > { %20127 = vmatmul.mubr.f32.vlgmr.msra.gmra.mrb[2].mxu0 %v12520_v23  ;;  %20215 = vmatpush3.msra.mxu1 %v21161_v30 }
 0xe6b   : > { %20220 = vmatpush3.msra.mxu0 %v21161_v30  ;;  %20221 = vmatprep.mubr.msk.f32.mxu0 %vm20931_vm1, %v20930_v1 }
 0xe6c   : > { %20216 = vmatprep.mubr.msk.f32.mxu1 %vm20931_vm1, %v20930_v1  ;;  %20224 = vmatprep.subr.mxu0 %v20930_v1 }
 0xe6d   : > { %20249 = vmatprep.subr.mxu1 %v20930_v1 }
 0xe6e   : > { %20222 = vmatmul.mubr.f32.vlgmr.msra.gmra.mrb[46].mxu0 %v14393_v57 }
 0xe6f   : > { %20225 = vmatpush3.msra.mxu0 %v21193_v55  ;;  %20226 = vmatprep.mubr.msk.f32.mxu0 %vm20931_vm1, %v20930_v1 }
 0xe70   : > { %20229 = vmatprep.subr.mxu0 %v20930_v1 }
 0xe71   : > { %20217 = vmatmul.mubr.f32.vlgmr.msra.gmra.mrb[70].mxu1 %v21881_v41 }
 0xe72   : > { %20251 = vmatprep.mubr.msk.f32.mxu1 %vm20931_vm1, %v20930_v1 }
 0xe76   : > { %20227 = vmatmul.mubr.f32.vlgmr.msra.gmra.mrb[46].mxu0 %v14389_v52 }
 0xe77   : > { %20230 = vmatpush3.msra.mxu0 %v21177_v38  ;;  %20231 = vmatprep.mubr.msk.f32.mxu0 %vm20931_vm1, %v20930_v1 }
 0xe78   : > { %20234 = vmatprep.subr.mxu0 %v20930_v1 }
 0xe7e   : > { %20232 = vmatmul.mubr.f32.vlgmr.msra.gmra.mrb[46].mxu0 %v14390_v53 }
 0xe7f   : > { %20235 = vmatpush3.msra.mxu0 %v21161_v30  ;;  %20236 = vmatprep.mubr.msk.f32.mxu0 %vm20931_vm1, %v20930_v1 }
 0xe80   : > { %20239 = vmatprep.subr.mxu0 %v20930_v1 }
 0xe86   : > { %20237 = vmatmul.mubr.f32.vlgmr.msra.gmra.mrb[46].mxu0 %v14391_v54 }
 0xe87   : > { %20240 = vmatpush3.msra.mxu0 %v21186_v45  ;;  %20241 = vmatprep.mubr.msk.f32.mxu0 %vm20931_vm1, %v20930_v1 }
 0xe88   : > { %20244 = vmatprep.subr.mxu0 %v20930_v1 }
 0xe8e   : > { %20242 = vmatmul.mubr.f32.vlgmr.msra.gmra.mrb[46].mxu0 %v14389_v52 }
 0xe8f   : > { %20245 = vmatpush3.msra.mxu0 %v21161_v30  ;;  %20246 = vmatprep.mubr.msk.f32.mxu0 %vm20931_vm1, %v20930_v1 }
 0xe90   : > { %20279 = vmatprep.subr.mxu0 %v20930_v1 }
 0xe96   : > { %20247 = vmatmul.mubr.f32.vlgmr.msra.gmra.mrb[46].mxu0 %v14389_v52  ;;  %v18788_v52 = vld [vmem:[%s22178_s8 + $0x40] sm:$0xff] }
 0xe97   : > { %20281 = vmatprep.mubr.msk.f32.mxu0 %vm20931_vm1, %v20930_v1  ;;  %v15238_v53 = vsel %vm989_vm3, %v18788_v52, 0 }
 0xe98   : > { %v15306_v54 = vand.u32 4294901760, %v15238_v53 }
 0xe9a   : > { %v15307_v56 = vsub.f32 %v15238_v53, %v15306_v54 }
 0xe9c   : > { %v15308_v57 = vand.u32 4294901760, %v15307_v56 }
 0xea1   : > { %v21943_v58 = vpop.f32.mrb[56].mxu1 }
 0xea2   : > { %v20133_v59 = vpop.f32.mrb[57].mxu1 }
 0xea9   : > { %v21945_v60 = vpop.f32.mrb[58].mxu1 }
 0xeaa   : > { %v20138_v61 = vpop.f32.mrb[59].mxu1 }
 0xead   : > { %v21947_v62 = vpop.f32.mrb[60].mxu1 }
 0xeae   : > { %v20143_v63 = vpop.f32.mrb[61].mxu1 }
 0xeb1   : > { %v21949_v0 = vpop.f32.mrb[62].mxu1 }
 0xeb2   : > { %v20148_v2 = vpop.f32.mrb[63].mxu1 }
 0xeb5   : > { %v21951_v3 = vpop.f32.mrb[64].mxu1 }
 0xeb6   : > { %v20153_v4 = vpop.f32.mrb[65].mxu1 }
 0xeb9   : > { %v21953_v5 = vpop.f32.mrb[66].mxu1 }
 0xeba   : > { %v20158_v6 = vpop.f32.mrb[67].mxu1 }
 0xee5   : > { %v13852_v7 = vpop.f32.mrb[68].mxu1 }
 0xee6   : > { %13856 = vst.msk [vmem:[#allocation2] sm:$0xff] %vm989_vm3, %v13852_v7  ;;  %13858 = vrot.lane.b32.xlu0 %v13852_v7, %s22207_s17  ;;  %v20188_v8 = vpop.f32.mrb[69].mxu1 }
 0xf44   : > { %v14308_v9 = vpop.f32.mrb[70].mxu1 }
 0xf45   : > { %14317 = vrot.lane.b32.xlu0 %v14308_v9, %s22208_s18  ;;  %14313 = vrot.lane.b32.xlu1 %v14308_v9, %s22209_s23  ;;  %v20218_v10 = vpop.f32.mrb[71].mxu1  ;;  %s18754_s18 = sshll.u32 %s22215_s22, 3 }
 0xf46   : > { %s516_s19 = scalar_lea.vmem %s22186_s16, %s18754_s18 }
 0xf58   : > { %v13859_v11 = vpop.permute.xlu0 %13858 }
 0xf59   : > { %13861 = vst.msk [vmem:[#allocation2] sm:$0xff] %vm3424_vm4, %v13859_v11 }
 0xf69   : > { %v14765_v12 = vpop.f32.mrb[46].mxu0 }
 0xf6a   : > { %v20248_v13 = vpop.f32.mrb[47].mxu0  ;;  %14774 = vrot.lane.b32.xlu0 %v14765_v12, %s22210_s27  ;;  %14770 = vrot.lane.b32.xlu1 %v14765_v12, %s22211_s28 }
 0xf6e   : > { %12956 = vperm.xlu0 %20896, %v18786_v14  }
 0xf72   : > { %15700 = vperm.xlu0 %20896, %v18790_v15  }
 0xf76   : > { %16714 = vperm.xlu0 %20896, %v18796_v16  }
 0xf7a   : > { %2008 = vperm.xlu0 %20896, %v2004_v17  }
 0xf7e   : > { %8185 = vperm.xlu0 %20896, %v18767_v18  }
 0xf82   : > { %12940 = vperm.xlu0 %20896, %v18783_v19  }
 0xf86   : > { %17232 = vperm.xlu0 %20896, %v18799_v42  }
 0xf8a   : > { %17705 = vperm.xlu0 %20896, %v17701_v20  }
 0xf8e   : > { %18228 = vperm.xlu0 %20896, %v18225_v24  }
 0xfb7   : > { %v14318_v25 = vpop.permute.xlu0 %14317  ;;  %v14314_v26 = vpop.permute.xlu1 %14313 }
 0xfb8   : > { %14316 = vst.msk [vmem:[#allocation2] sm:$0xff] %vm3880_vm5, %v14314_v26 }
 0xfb9   : > { %14320 = vst.msk [vmem:[#allocation2] sm:$0xff] %vm3885_vm6, %v14318_v25 }
 0xfdc   : > { %v14775_v23 = vpop.permute.xlu0 %14774  ;;  %v14771_v32 = vpop.permute.xlu1 %14770 }
 0xfdd   : > { %14773 = vst.msk [vmem:[#allocation2] sm:$0xff] %vm4341_vm7, %v14771_v32 }
 0xfde   : > { %14777 = vst.msk [vmem:[#allocation2] sm:$0xff] %vm4346_vm8, %v14775_v23 }
 0xfe5   : > { %v14780_v35 = vld [vmem:[#allocation2] sm:$0xff] }
 0xfe6   : > { %15234 = vrot.lane.b32.xlu1 %v14780_v35, %s20940_s20  ;;  %v14785_v39 = vand.u32 4294901760, %v14780_v35 }
 0xfe8   : > { %v14862_v36 = vsub.f32 %v14780_v35, %v14785_v39  ;;  %20250 = vmatpush3.msra.mxu1 %v14785_v39 }
 0xfe9   : > { %20252 = vmatmul.mubr.f32.vlgmr.msra.gmra.mrb[72].mxu1 %v14854_v37  ;;  %20254 = vmatprep.subr.mxu1 %v20930_v1 }
 0xfea   : > { %15692 = vperm.xlu1 %20897, %v18789_v40   ;;  %v14863_v41 = vand.u32 4294901760, %v14862_v36  ;;  %20256 = vmatprep.mubr.msk.f32.mxu1 %vm20931_vm1, %v20930_v1 }
 0xfec   : > { %v14864_v28 = vsub.f32 %v14862_v36, %v14863_v41 }
 0xfed   : > { %v12957_v43 = vpop.permute.xlu0 %12956 }
 0xfee   : > { %v13035_v44 = vadd.f32 %v21943_v58, %v12957_v43  ;;  %v14865_v46 = vand.u32 4294901760, %v14864_v28  ;;  %v15309_v58 = vsub.f32 %v15307_v56, %v15308_v57 }
 0xff0   : > { %v13111_v47 = vadd.f32 %v21945_v60, %v13035_v44  ;;  %20255 = vmatpush3.msra.mxu1 %v14865_v46  ;;  %v15310_v60 = vand.u32 4294901760, %v15309_v58  ;;  %v18784_v58 = vld [vmem:[%s22177_s7 + $0x28] sm:$0xff] }
 0xff1   : > { %20257 = vmatmul.mubr.f32.vlgmr.msra.gmra.mrb[74].mxu1 %v14850_v21  ;;  %20259 = vmatprep.subr.mxu1 %v20930_v1  ;;  %v15701_v53 = vpop.permute.xlu0 %15700 }
 0xff2   : > { %v13185_v48 = vadd.f32 %v21947_v62, %v13111_v47  ;;  %20260 = vmatpush3.msra.mxu1 %v14862_v36  ;;  %20261 = vmatprep.mubr.msk.f32.mxu1 %vm20931_vm1, %v20930_v1 }
 0xff3   : > { %20264 = vmatprep.subr.mxu1 %v20930_v1 }
 0xff4   : > { %v13259_v49 = vadd.f32 %v21949_v0, %v13185_v48 }
 0xff5   : > { %20262 = vmatmul.mubr.f32.vlgmr.msra.gmra.mrb[76].mxu1 %v14851_v31  ;;  %v22053_v31 = vand.u32 4294901760, %v15715_v29 }
 0xff6   : > { %20265 = vmatpush3.msra.mxu1 %v14785_v39  ;;  %20266 = vmatprep.mubr.msk.f32.mxu1 %vm20931_vm1, %v20930_v1  ;;  %v13333_v50 = vadd.f32 %v21951_v3, %v13259_v49 }
 0xff7   : > { %20269 = vmatprep.subr.mxu1 %v20930_v1  ;;  %v15787_v34 = vsub.f32 %v15715_v29, %v22053_v31 }
 0xff8   : > { %v22017_v51 = vadd.f32 %v21953_v5, %v13333_v50 }
 0xff9   : > { %20267 = vmatmul.mubr.f32.vlgmr.msra.gmra.mrb[78].mxu1 %v14852_v33  ;;  %v15788_v40 = vand.u32 4294901760, %v15787_v34 }
 0xffa   : > { %20270 = vmatpush3.msra.mxu1 %v14863_v41  ;;  %20271 = vmatprep.mubr.msk.f32.mxu1 %vm20931_vm1, %v20930_v1 }
 0xffb   : > { %20274 = vmatprep.subr.mxu1 %v20930_v1  ;;  %v15789_v28 = vsub.f32 %v15787_v34, %v15788_v40 }
 0xffd   : > { %20272 = vmatmul.mubr.f32.vlgmr.msra.gmra.mrb[80].mxu1 %v14850_v21  ;;  %v15790_v46 = vand.u32 4294901760, %v15789_v28 }
 0xffe   : > { %20275 = vmatpush3.msra.mxu1 %v14785_v39  ;;  %20276 = vmatprep.mubr.msk.f32.mxu1 %vm20931_vm1, %v20930_v1 }
 0xfff   : > { %20284 = vmatprep.subr.mxu1 %v20930_v1 }
0x1001   : > { %20277 = vmatmul.mubr.f32.vlgmr.msra.gmra.mrb[82].mxu1 %v14850_v21 }
0x1002   : > { %20286 = vmatprep.mubr.msk.f32.mxu1 %vm20931_vm1, %v20930_v1 }
0x1058   : > { %v15235_v59 = vpop.permute.xlu1 %15234 }
0x1059   : > { %v15241_v61 = vand.u32 4294901760, %v15235_v59 }
0x105b   : > { %v15318_v62 = vsub.f32 %v15235_v59, %v15241_v61  ;;  %20280 = vmatpush3.msra.mxu0 %v15241_v61  ;;  %v18800_v59 = vld [vmem:[%s22177_s7 + $0x38] sm:$0xff] }
0x105c   : > { %20282 = vmatmul.mubr.f32.vlgmr.msra.gmra.mrb[48].mxu0 %v15310_v60  ;;  %20289 = vmatprep.subr.mxu0 %v20930_v1  ;;  %v17702_v60 = vld [vmem:[%s22183_s13 + $0x8] sm:$0xff] }
0x105d   : > { %v15319_v63 = vand.u32 4294901760, %v15318_v62  ;;  %20290 = vmatpush3.msra.mxu0 %v15318_v62  ;;  %20291 = vmatprep.mubr.msk.f32.mxu0 %vm20931_vm1, %v20930_v1 }
0x105e   : > { %20299 = vmatprep.subr.mxu0 %v20930_v1 }
0x105f   : > { %v15320_v0 = vsub.f32 %v15318_v62, %v15319_v63 }
0x1060   : > { %20292 = vmatmul.mubr.f32.vlgmr.msra.gmra.mrb[50].mxu0 %v15307_v56  ;;  %v18795_v56 = vld [vmem:[%s22175_s5 + $0x30] sm:$0xff] }
0x1061   : > { %v15321_v2 = vand.u32 4294901760, %v15320_v0  ;;  %20300 = vmatpush3.msra.mxu0 %v15319_v63  ;;  %20301 = vmatprep.mubr.msk.f32.mxu0 %vm20931_vm1, %v20930_v1 }
0x1063   : > { %20285 = vmatpush3.msra.mxu1 %v15321_v2 }
0x1064   : > { %20287 = vmatmul.mubr.f32.vlgmr.msra.gmra.mrb[84].mxu1 %v15306_v54  ;;  %20294 = vmatprep.subr.mxu1 %v20930_v1 }
0x1065   : > { %20295 = vmatpush3.msra.mxu1 %v15241_v61  ;;  %20296 = vmatprep.mubr.msk.f32.mxu1 %vm20931_vm1, %v20930_v1 }
0x1066   : > { %20304 = vmatprep.subr.mxu1 %v20930_v1  ;;  %20302 = vmatmul.mubr.f32.vlgmr.msra.gmra.mrb[52].mxu0 %v15306_v54 }
0x1067   : > { %20311 = vmatprep.mubr.f32.mxu0 %v15790_v46 }
0x1068   : > { %20297 = vmatmul.mubr.f32.vlgmr.msra.gmra.mrb[86].mxu1 %v15308_v57  ;;  %v2005_v57 = vld [vmem:[%s22177_s7 + $0x8] sm:$0xff] }
0x1069   : > { %20305 = vmatpush3.msra.mxu1 %v15241_v61  ;;  %20306 = vmatprep.mubr.msk.f32.mxu1 %vm20931_vm1, %v20930_v1  ;;  %v18794_v61 = vld [vmem:[%s22174_s4 + $0x78] sm:$0xff] }
0x106a   : > { %20399 = vmatprep.subr.mxu1 %v20930_v1  ;;  %v15718_v62 = vsel %vm989_vm3, %v18794_v61, 0 }
0x106b   : > { %v15796_v63 = vand.u32 4294901760, %v15718_v62 }
0x106c   : > { %20307 = vmatmul.mubr.f32.vlgmr.msra.gmra.mrb[88].mxu1 %v15306_v54 }
0x106d   : > { %20400 = vmatpush3.msra.mxu1 %v21161_v30  ;;  %20401 = vmatprep.mubr.msk.f32.mxu1 %vm20931_vm1, %v20930_v1  ;;  %v15797_v0 = vsub.f32 %v15718_v62, %v15796_v63 }
0x106e   : > { %20404 = vmatprep.subr.mxu1 %v20930_v1 }
0x106f   : > { %v15798_v2 = vand.u32 4294901760, %v15797_v0 }
0x10bc   : > { %v14856_v3 = vpop.f32.mrb[72].mxu1 }
0x10bd   : > { %v20253_v4 = vpop.f32.mrb[73].mxu1 }
0x10c4   : > { %v14932_v5 = vpop.f32.mrb[74].mxu1 }
0x10c5   : > { %v14933_v6 = vadd.f32 %v14932_v5, %v14856_v3  ;;  %v20258_v7 = vpop.f32.mrb[75].mxu1  ;;  %v15799_v3 = vsub.f32 %v15797_v0, %v15798_v2 }
0x10c8   : > { %v15006_v8 = vpop.f32.mrb[76].mxu1 }
0x10c9   : > { %v15007_v9 = vadd.f32 %v15006_v8, %v14933_v6  ;;  %v20263_v10 = vpop.f32.mrb[77].mxu1  ;;  %v15800_v6 = vand.u32 4294901760, %v15799_v3 }
0x10cc   : > { %v15080_v11 = vpop.f32.mrb[78].mxu1 }
0x10cd   : > { %v15081_v12 = vadd.f32 %v15080_v11, %v15007_v9  ;;  %v20268_v13 = vpop.f32.mrb[79].mxu1  ;;  %v18791_v11 = vld [vmem:[%s22174_s4 + $0x60] sm:$0xff] }
0x10d0   : > { %v15154_v14 = vpop.f32.mrb[80].mxu1 }
0x10d1   : > { %v15155_v15 = vadd.f32 %v15154_v14, %v15081_v12  ;;  %v20273_v16 = vpop.f32.mrb[81].mxu1  ;;  %v16210_v12 = vsel %vm989_vm3, %v18791_v11, 0  ;;  %v18792_v14 = vld [vmem:[%s22174_s4 + $0x68] sm:$0xff] }
0x10d2   : > { %v16281_v13 = vand.u32 4294901760, %v16210_v12 }
0x10d4   : > { %v15226_v17 = vpop.f32.mrb[82].mxu1  ;;  %v16282_v16 = vsub.f32 %v16210_v12, %v16281_v13 }
0x10d5   : > { %v15227_v18 = vadd.f32 %v15226_v17, %v15155_v15  ;;  %v20278_v19 = vpop.f32.mrb[83].mxu1  ;;  %v16213_v17 = vsel %vm989_vm3, %v18792_v14, 0 }
0x10d6   : > { %v16291_v19 = vand.u32 4294901760, %v16213_v17 }
0x10d7   : > { %v15230_v42 = vadd.f32 %v15227_v18, %v22017_v51  ;;  %v15693_v51 = vpop.permute.xlu1 %15692 }
0x112f   : > { %v15312_v20 = vpop.f32.mrb[48].mxu0 }
0x1130   : > { %v20283_v24 = vpop.f32.mrb[49].mxu0 }
0x1131   : > { %v16292_v24 = vsub.f32 %v16213_v17, %v16291_v19 }
0x1133   : > { %v15462_v25 = vpop.f32.mrb[50].mxu0  ;;  %v16293_v27 = vand.u32 4294901760, %v16292_v24 }
0x1134   : > { %v20293_v26 = vpop.f32.mrb[51].mxu0 }
0x1137   : > { %v15388_v21 = vpop.f32.mrb[84].mxu1 }
0x1138   : > { %v15389_v23 = vadd.f32 %v15388_v21, %v15312_v20  ;;  %v20288_v32 = vpop.f32.mrb[85].mxu1 }
0x1139   : > { %v15610_v33 = vpop.f32.mrb[52].mxu0 }
0x113a   : > { %v15463_v35 = vadd.f32 %v15462_v25, %v15389_v23  ;;  %v20303_v37 = vpop.f32.mrb[53].mxu0  ;;  %v16294_v23 = vsub.f32 %v16292_v24, %v16293_v27 }
0x113b   : > { %v15536_v39 = vpop.f32.mrb[86].mxu1 }
0x113c   : > { %v15537_v36 = vadd.f32 %v15536_v39, %v15463_v35  ;;  %v20298_v41 = vpop.f32.mrb[87].mxu1  ;;  %v16295_v32 = vand.u32 4294901760, %v16294_v23 }
0x113e   : > { %v15611_v43 = vadd.f32 %v15610_v33, %v15537_v36  ;;  %v16715_v36 = vpop.permute.xlu0 %16714 }
0x113f   : > { %v15682_v44 = vpop.f32.mrb[88].mxu1 }
0x1140   : > { %v15683_v47 = vadd.f32 %v15682_v44, %v15611_v43  ;;  %v20308_v48 = vpop.f32.mrb[89].mxu1 }
0x1142   : > { %v15686_v49 = vadd.f32 %v15683_v47, %v15230_v42  ;;  %v16283_v42 = vand.u32 4294901760, %v16282_v16  ;;  %v18798_v47 = vld [vmem:[%s22176_s6 + $0x38] sm:$0xff] }
0x1144   : > { %v15687_v50 = vadd.f32 %v15686_v49, %v21797_v22  ;;  %v18768_v22 = vld [vmem:[%s22177_s7 + $0x18] sm:$0xff]  ;;  %v16284_v25 = vsub.f32 %v16282_v16, %v16283_v42  ;;  %v16734_v49 = vsel %vm989_vm3, %v18798_v47, 0 }
0x1146   : > { %v15695_v52 = vmul.f32 %v15693_v51, %v15687_v50  ;;  %v16285_v29 = vand.u32 4294901760, %v16284_v25 }
0x1148   : > { %v15703_v54 = vadd.f32 %v15701_v53, %v15695_v52  ;;  %v16812_v52 = vand.u32 4294901760, %v16734_v49 }
0x114a   : > { %15711 = vrot.lane.b32.xlu1 %v15703_v54, %s22213_s24  ;;  %v16216_v15 = vand.u32 4294901760, %v15703_v54 }
0x114c   : > { %v16303_v18 = vsub.f32 %v15703_v54, %v16216_v15  ;;  %v16813_v54 = vsub.f32 %v16734_v49, %v16812_v52 }
0x114e   : > { %16709 = vperm.xlu1 %20897, %v18795_v56   ;;  %v16304_v20 = vand.u32 4294901760, %v16303_v18  ;;  %v16814_v56 = vand.u32 4294901760, %v16813_v54 }
0x1150   : > { %v16305_v26 = vsub.f32 %v16303_v18, %v16304_v20 }
0x1152   : > { %2013 = vperm.xlu1 %20897, %v2005_v57   ;;  %v16306_v21 = vand.u32 4294901760, %v16305_v26 }
0x1156   : > { %8190 = vperm.xlu1 %20897, %v18768_v22   ;;  %v16815_v22 = vsub.f32 %v16813_v54, %v16814_v56 }
0x1158   : > { %v16816_v61 = vand.u32 4294901760, %v16815_v22 }
0x115a   : > { %12945 = vperm.xlu1 %20897, %v18784_v58  }
0x115e   : > { %17237 = vperm.xlu1 %20897, %v18800_v59  }
0x1162   : > { %17710 = vperm.xlu1 %20897, %v17702_v60  }
0x11bc   : > { %v15712_v4 = vpop.permute.xlu1 %15711 }
0x11bd   : > { %v15721_v5 = vand.u32 4294901760, %v15712_v4 }
0x11bf   : > { %v15808_v7 = vsub.f32 %v15712_v4, %v15721_v5  ;;  %20309 = vmatprep.subr.mxu0 %v15721_v5 }
0x11c0   : > { %20310 = vmatpush3.msra.mxu0 %v15721_v5 }
0x11c1   : > { %20312 = vmatmul.mubr.f32.vlgmr.msra.gmra.mrb[54].mxu0 %v15800_v6  ;;  %v15809_v8 = vand.u32 4294901760, %v15808_v7 }
0x11c2   : > { %20316 = vmatprep.mubr.f32.mxu0 %v22053_v31 }
0x11c3   : > { %v15810_v9 = vsub.f32 %v15808_v7, %v15809_v8 }
0x11c5   : > { %v15811_v10 = vand.u32 4294901760, %v15810_v9 }
0x11c7   : > { %20314 = vmatprep.subr.mxu0 %v15811_v10 }
0x11c8   : > { %20315 = vmatpush3.msra.mxu0 %v15811_v10 }
0x11c9   : > { %20317 = vmatmul.mubr.f32.vlgmr.msra.gmra.mrb[54].mxu0 %v15796_v63  ;;  %20319 = vmatprep.subr.mxu0 %v15808_v7 }
0x11ca   : > { %20320 = vmatpush3.msra.mxu0 %v15808_v7  ;;  %20321 = vmatprep.mubr.f32.mxu0 %v15787_v34 }
0x11cb   : > { %20324 = vmatprep.subr.mxu0 %v15721_v5 }
0x11cd   : > { %v16710_v48 = vpop.permute.xlu1 %16709 }
0x11d1   : > { %20322 = vmatmul.mubr.f32.vlgmr.msra.gmra.mrb[54].mxu0 %v15797_v0  ;;  %v2014_v12 = vpop.permute.xlu1 %2013 }
0x11d2   : > { %20325 = vmatpush3.msra.mxu0 %v15721_v5  ;;  %20326 = vmatprep.mubr.f32.mxu0 %v15788_v40 }
0x11d3   : > { %20329 = vmatprep.subr.mxu0 %v15809_v8 }
0x11d5   : > { %v8191_v14 = vpop.permute.xlu1 %8190 }
0x11d9   : > { %20327 = vmatmul.mubr.f32.vlgmr.msra.gmra.mrb[54].mxu0 %v15798_v2 }
0x11da   : > { %20330 = vmatpush3.msra.mxu0 %v15809_v8  ;;  %20331 = vmatprep.mubr.f32.mxu0 %v22053_v31 }
0x11db   : > { %20334 = vmatprep.subr.mxu0 %v15721_v5 }
0x11e1   : > { %20332 = vmatmul.mubr.f32.vlgmr.msra.gmra.mrb[54].mxu0 %v15796_v63 }
0x11e2   : > { %20335 = vmatpush3.msra.mxu0 %v15721_v5  ;;  %20336 = vmatprep.mubr.f32.mxu0 %v22053_v31  ;;  %v18797_v31 = vld [vmem:[%s22176_s6 + $0x30] sm:$0xff] }
0x11e3   : > { %20339 = vmatprep.subr.mxu0 %v16216_v15  ;;  %v16731_v33 = vsel %vm989_vm3, %v18797_v31, 0 }
0x11e4   : > { %v22095_v34 = vand.u32 4294901760, %v16731_v33 }
0x11e6   : > { %v16803_v35 = vsub.f32 %v16731_v33, %v22095_v34 }
0x11e8   : > { %v16804_v37 = vand.u32 4294901760, %v16803_v35 }
0x11e9   : > { %20337 = vmatmul.mubr.f32.vlgmr.msra.gmra.mrb[54].mxu0 %v15796_v63 }
0x11ea   : > { %20340 = vmatpush3.msra.mxu0 %v16216_v15  ;;  %20341 = vmatprep.mubr.f32.mxu0 %v16285_v29  ;;  %v16805_v39 = vsub.f32 %v16803_v35, %v16804_v37 }
0x11eb   : > { %20344 = vmatprep.subr.mxu0 %v16306_v21 }
0x11ec   : > { %v16806_v40 = vand.u32 4294901760, %v16805_v39 }
0x11f1   : > { %20342 = vmatmul.mubr.f32.vlgmr.msra.gmra.mrb[54].mxu0 %v16295_v32 }
0x11f2   : > { %20345 = vmatpush3.msra.mxu0 %v16306_v21  ;;  %20346 = vmatprep.mubr.f32.mxu0 %v16281_v13 }
0x11f3   : > { %20349 = vmatprep.subr.mxu0 %v16303_v18 }
0x11f9   : > { %20347 = vmatmul.mubr.f32.vlgmr.msra.gmra.mrb[54].mxu0 %v16291_v19 }
0x11fa   : > { %20350 = vmatpush3.msra.mxu0 %v16303_v18  ;;  %20351 = vmatprep.mubr.f32.mxu0 %v16282_v16  ;;  %v12946_v18 = vpop.permute.xlu1 %12945 }
0x11fb   : > { %20354 = vmatprep.subr.mxu0 %v16216_v15 }
0x11fe   : > { %v17238_v32 = vpop.permute.xlu1 %17237 }
0x1201   : > { %20352 = vmatmul.mubr.f32.vlgmr.msra.gmra.mrb[54].mxu0 %v16292_v24 }
0x1202   : > { %20355 = vmatpush3.msra.mxu0 %v16216_v15  ;;  %20356 = vmatprep.mubr.f32.mxu0 %v16283_v42 }
0x1203   : > { %20359 = vmatprep.subr.mxu0 %v16304_v20 }
0x1209   : > { %20357 = vmatmul.mubr.f32.vlgmr.msra.gmra.mrb[54].mxu0 %v16293_v27 }
0x120a   : > { %20360 = vmatpush3.msra.mxu0 %v16304_v20  ;;  %20361 = vmatprep.mubr.f32.mxu0 %v16281_v13  ;;  %v20556_v20 = vadd.f32 %v8191_v14, %v2014_v12 }
0x120b   : > { %20364 = vmatprep.subr.mxu0 %v16216_v15 }
0x120c   : > { %v20557_v25 = vadd.f32 %v20556_v20, %v12946_v18 }
0x1211   : > { %20362 = vmatmul.mubr.f32.vlgmr.msra.gmra.mrb[54].mxu0 %v16291_v19 }
0x1212   : > { %20365 = vmatpush3.msra.mxu0 %v16216_v15  ;;  %20366 = vmatprep.mubr.f32.mxu0 %v16281_v13  ;;  %v2009_v13 = vpop.permute.xlu0 %2008  ;;  %v17700_v15 = vld [vmem:[%s22182_s12 + $0x8] sm:$0xff] }
0x1213   : > { %v17718_v17 = vsel %vm17713_vm15, %v17700_v15, 0 }
0x1216   : > { %v8186_v16 = vpop.permute.xlu0 %8185 }
0x1217   : > { %v20559_v24 = vadd.f32 %v8186_v16, %v2009_v13 }
0x1219   : > { %20367 = vmatmul.mubr.f32.vlgmr.msra.gmra.mrb[54].mxu0 %v16291_v19  ;;  %v17797_v19 = vand.u32 4294901760, %v17718_v17 }
0x121a   : > { %20371 = vmatprep.mubr.f32.mxu0 %v16806_v40  ;;  %v12941_v42 = vpop.permute.xlu0 %12940 }
0x121b   : > { %v20560_v26 = vadd.f32 %v20559_v24, %v12941_v42  ;;  %v17798_v29 = vsub.f32 %v17718_v17, %v17797_v19 }
0x121e   : > { %v17233_v33 = vpop.permute.xlu0 %17232 }
0x12ec   : > { %v20368_v41 = vpop.f32.mrb[54].mxu0 }
0x12ed   : > { %v16718_v28 = vadd.f32 %v20368_v41, %v16715_v36  ;;  %v16694_v43 = vpop.f32.mrb[55].mxu0 }
0x12ee   : > { %v16717_v50 = vadd.f32 %v16710_v48, %v16694_v43 }
0x12ef   : > { %v16720_v44 = vsub.f32 0.0, %v16718_v28 }
0x12f1   : > { %v16721_v46 = vmul.f32 1.442695, %v16720_v44 }
0x12f3   : > { %20916 = vpow2.f32 %v16721_v46 }
0x12f4   : > { %20918 = vtanh.f32 %v16717_v50 }
0x12fd   : > { %v20917_v51 = vpop.eup %20916 }
0x12fe   : > { %v16723_v53 = vadd.f32 1.0, %v20917_v51  ;;  %v20919_v57 = vpop.eup %20918 }
0x1300   : > { %20920 = vrcp.f32 %v16723_v53 }
0x130a   : > { %v20921_v58 = vpop.eup %20920 }
0x130b   : > { %v16726_v59 = vmul.f32 %v20921_v58, %v20919_v57 }
0x130d   : > { %v16737_v60 = vand.u32 4294901760, %v16726_v59  ;;  %v17243_v62 = vsel %vm989_vm3, %v16726_v59, 0 }
0x130e   : > { %v17311_v63 = vand.u32 4294901760, %v17243_v62 }
0x130f   : > { %20369 = vmatprep.subr.mxu0 %v16737_v60  ;;  %v16824_v0 = vsub.f32 %v16726_v59, %v16737_v60  ;;  %v17711_v59 = vpop.permute.xlu1 %17710 }
0x1310   : > { %20370 = vmatpush3.msra.mxu0 %v16737_v60  ;;  %v17312_v2 = vsub.f32 %v17243_v62, %v17311_v63  ;;  %v18224_v62 = vld [vmem:[%s22184_s14] sm:$0x3f] }
0x1311   : > { %20372 = vmatmul.mubr.f32.vlgmr.msra.gmra.mrb[2].mxu0 %v16816_v61  ;;  %v16825_v3 = vand.u32 4294901760, %v16824_v0  ;;  %v20948_v61 = vmov 0.0|0.0  }
0x1312   : > { %20376 = vmatprep.mubr.f32.mxu0 %v22095_v34  ;;  %v17313_v4 = vand.u32 4294901760, %v17312_v2 }
0x1313   : > { %v16826_v5 = vsub.f32 %v16824_v0, %v16825_v3 }
0x1314   : > { %v17314_v6 = vsub.f32 %v17312_v2, %v17313_v4 }
0x1315   : > { %v16827_v7 = vand.u32 4294901760, %v16826_v5 }
0x1316   : > { %v17315_v8 = vand.u32 4294901760, %v17314_v6 }
0x1317   : > { %20374 = vmatprep.subr.mxu0 %v16827_v7 }
0x1318   : > { %20375 = vmatpush3.msra.mxu0 %v16827_v7  ;;  %20402 = vmatmul.mubr.f32.vlgmr.msra.gmra.mrb[90].mxu1 %v17315_v8 }
0x1319   : > { %20377 = vmatmul.mubr.f32.vlgmr.msra.gmra.mrb[2].mxu0 %v16812_v52  ;;  %20379 = vmatprep.subr.mxu0 %v16824_v0 }
0x131a   : > { %20380 = vmatpush3.msra.mxu0 %v16824_v0  ;;  %20405 = vmatpush3.msra.mxu1 %v21193_v55 }
0x131b   : > { %20384 = vmatprep.subr.mxu0 %v16737_v60  ;;  %20406 = vmatprep.mubr.msk.f32.mxu1 %vm20931_vm1, %v20930_v1 }
0x131c   : > { %20381 = vmatprep.mubr.f32.mxu0 %v16803_v35  ;;  %20409 = vmatprep.subr.mxu1 %v20930_v1 }
0x1320   : > { %20407 = vmatmul.mubr.f32.vlgmr.msra.gmra.mrb[90].mxu1 %v17311_v63 }
0x1321   : > { %20382 = vmatmul.mubr.f32.vlgmr.msra.gmra.mrb[2].mxu0 %v16813_v54  ;;  %20410 = vmatpush3.msra.mxu1 %v21177_v38  ;;  %v17699_v38 = vld [vmem:[%s22182_s12] sm:$0xff] }
0x1322   : > { %20385 = vmatpush3.msra.mxu0 %v16737_v60  ;;  %20411 = vmatprep.mubr.msk.f32.mxu1 %vm20931_vm1, %v20930_v1 }
0x1323   : > { %20389 = vmatprep.subr.mxu0 %v16825_v3  ;;  %20386 = vmatprep.mubr.f32.mxu0 %v16804_v37  ;;  %v17799_v37 = vand.u32 4294901760, %v17798_v29 }
0x1324   : > { %20414 = vmatprep.subr.mxu1 %v20930_v1 }
0x1325   : > { %v17800_v44 = vsub.f32 %v17798_v29, %v17799_v37 }
0x1327   : > { %v17801_v50 = vand.u32 4294901760, %v17800_v44 }
0x1328   : > { %20412 = vmatmul.mubr.f32.vlgmr.msra.gmra.mrb[90].mxu1 %v17312_v2 }
0x1329   : > { %20387 = vmatmul.mubr.f32.vlgmr.msra.gmra.mrb[2].mxu0 %v16814_v56  ;;  %20415 = vmatpush3.msra.mxu1 %v21161_v30 }
0x132a   : > { %20390 = vmatpush3.msra.mxu0 %v16825_v3  ;;  %20416 = vmatprep.mubr.msk.f32.mxu1 %vm20931_vm1, %v20930_v1 }
0x132b   : > { %20394 = vmatprep.subr.mxu0 %v16737_v60  ;;  %20391 = vmatprep.mubr.f32.mxu0 %v22095_v34 }
0x132c   : > { %20419 = vmatprep.subr.mxu1 %v20930_v1 }
0x1330   : > { %20417 = vmatmul.mubr.f32.vlgmr.msra.gmra.mrb[90].mxu1 %v17313_v4  ;;  %v17706_v4 = vpop.permute.xlu0 %17705 }
0x1331   : > { %20392 = vmatmul.mubr.f32.vlgmr.msra.gmra.mrb[2].mxu0 %v16812_v52  ;;  %20420 = vmatpush3.msra.mxu1 %v21186_v45  ;;  %v17715_v45 = vsel %vm17713_vm15, %v17699_v38, 0 }
0x1332   : > { %20395 = vmatpush3.msra.mxu0 %v16737_v60  ;;  %20421 = vmatprep.mubr.msk.f32.mxu1 %vm20931_vm1, %v20930_v1  ;;  %v22129_v55 = vand.u32 4294901760, %v17715_v45 }
0x1333   : > { %20396 = vmatprep.mubr.f32.mxu0 %v22095_v34  ;;  %20424 = vmatprep.subr.mxu1 %v20930_v1 }
0x1334   : > { %v22132_v9 = vsub.f32 %v17715_v45, %v22129_v55 }
0x1336   : > { %v17789_v10 = vand.u32 4294901760, %v22132_v9 }
0x1338   : > { %20422 = vmatmul.mubr.f32.vlgmr.msra.gmra.mrb[90].mxu1 %v17311_v63 }
0x1339   : > { %20397 = vmatmul.mubr.f32.vlgmr.msra.gmra.mrb[2].mxu0 %v16812_v52  ;;  %20425 = vmatpush3.msra.mxu1 %v21161_v30  ;;  %v17790_v30 = vsub.f32 %v22132_v9, %v17789_v10 }
0x133a   : > { %20426 = vmatprep.mubr.msk.f32.mxu1 %vm20931_vm1, %v20930_v1 }
0x133b   : > { %v17791_v11 = vand.u32 4294901760, %v17790_v30 }
0x1340   : > { %20427 = vmatmul.mubr.f32.vlgmr.msra.gmra.mrb[90].mxu1 %v17311_v63  ;;  %v18232_v63 = vsel %vm17713_vm15, %v18224_v62, 0 }
0x1341   : > { %20433 = vmatprep.mubr.f32.mxu1 %v17791_v11  ;;  %v18301_v0 = vand.u32 4294901760, %v18232_v63 }
0x1343   : > { %v18302_v2 = vsub.f32 %v18232_v63, %v18301_v0 }
0x1345   : > { %v18303_v7 = vand.u32 4294901760, %v18302_v2 }
0x140c   : > { %v20398_v27 = vpop.f32.mrb[2].mxu0 }
0x140d   : > { %v20558_v21 = vadd.f32 %v20557_v25, %v20398_v27  ;;  %v17215_v23 = vpop.f32.mrb[3].mxu0  ;;  %v18229_v25 = vpop.permute.xlu0 %18228 }
0x140e   : > { %v20561_v31 = vadd.f32 %v20560_v26, %v17215_v23 }
0x140f   : > { %v17241_v34 = vadd.f32 %v20558_v21, %v17238_v32 }
0x1410   : > { %v17240_v35 = vadd.f32 %v20561_v31, %v17233_v33 }
0x1411   : > { %v17698_v39 = vmax.f32 %v17241_v34, 0.0 }
0x1412   : > { %v17697_v40 = vmax.f32 %v17240_v35, 0.0 }
0x1413   : > { %v17724_v36 = vand.u32 4294901760, %v17698_v39  ;;  %v17687_v41 = vpop.f32.mrb[90].mxu1 }
0x1414   : > { %v17721_v28 = vand.u32 4294901760, %v17697_v40  ;;  %17691 = vst.msk [vmem:[#allocation2] sm:$0xff] %vm989_vm3, %v17687_v41  ;;  %17693 = vrot.lane.b32.xlu1 %v17687_v41, %s22207_s17  ;;  %v20428_v43 = vpop.f32.mrb[91].mxu1 }
0x1415   : > { %v17816_v46 = vsub.f32 %v17698_v39, %v17724_v36 }
0x1416   : > { %v20513_v47 = vpack.c.bf16 %v17724_v36, %v17721_v28  ;;  %v17809_v48 = vsub.f32 %v17697_v40, %v17721_v28 }
0x1417   : > { %v17817_v49 = vand.u32 4294901760, %v17816_v46 }
0x1418   : > { %20514 = vmatprep.subr.bf16.mxu1 %v20513_v47  ;;  %v17810_v51 = vand.u32 4294901760, %v17809_v48  ;;  %v20521_v52 = vpack.c.bf16 %v17816_v46, %v17809_v48 }
0x1419   : > { %20516 = vmatpush3.bf16.msra.mxu1 %v20513_v47  ;;  %v17818_v53 = vsub.f32 %v17816_v46, %v17817_v49 }
0x141a   : > { %v17811_v54 = vsub.f32 %v17809_v48, %v17810_v51  ;;  %v20529_v56 = vpack.c.bf16 %v17817_v49, %v17810_v51 }
0x141b   : > { %v17819_v57 = vand.u32 4294901760, %v17818_v53 }
0x141c   : > { %20434 = vmatmul.mubr.f32.vlgmr.msra.gmra.mrb[92].mxu1 %v17801_v50  ;;  %v17812_v22 = vand.u32 4294901760, %v17811_v54 }
0x141d   : > { %20440 = vmatprep.mubr.f32.mxu1 %v22129_v55 }
0x141e   : > { %v20517_v58 = vpack.c.bf16 %v17819_v57, %v17812_v22 }
0x1420   : > { %20518 = vmatprep.subr.bf16.mxu1 %v20517_v58 }
0x1421   : > { %20520 = vmatpush3.bf16.msra.mxu1 %v20517_v58 }
0x1422   : > { %20522 = vmatprep.subr.bf16.mxu1 %v20521_v52 }
0x1424   : > { %20441 = vmatmul.mubr.f32.vlgmr.msra.gmra.mrb[92].mxu1 %v17797_v19 }
0x1425   : > { %20524 = vmatpush3.bf16.msra.mxu1 %v20521_v52  ;;  %20447 = vmatprep.mubr.f32.mxu1 %v22132_v9  ;;  %v18304_v9 = vsub.f32 %v18302_v2, %v18303_v7 }
0x1426   : > { %20526 = vmatprep.subr.bf16.mxu1 %v20513_v47 }
0x1427   : > { %v18305_v14 = vand.u32 4294901760, %v18304_v9 }
0x142c   : > { %20448 = vmatmul.mubr.f32.vlgmr.msra.gmra.mrb[92].mxu1 %v17798_v29 }
0x142d   : > { %20528 = vmatpush3.bf16.msra.mxu1 %v20513_v47  ;;  %20454 = vmatprep.mubr.f32.mxu1 %v17789_v10 }
0x142e   : > { %20530 = vmatprep.subr.bf16.mxu1 %v20529_v56 }
0x1434   : > { %20455 = vmatmul.mubr.f32.vlgmr.msra.gmra.mrb[92].mxu1 %v17799_v37 }
0x1435   : > { %20532 = vmatpush3.bf16.msra.mxu1 %v20529_v56  ;;  %20461 = vmatprep.mubr.f32.mxu1 %v22129_v55 }
0x1436   : > { %20534 = vmatprep.subr.bf16.mxu1 %v20513_v47 }
0x143c   : > { %20462 = vmatmul.mubr.f32.vlgmr.msra.gmra.mrb[92].mxu1 %v17797_v19 }
0x143d   : > { %20536 = vmatpush3.bf16.msra.mxu1 %v20513_v47  ;;  %20468 = vmatprep.mubr.f32.mxu1 %v22129_v55 }
0x143e   : > { %20537 = vmatprep.subr.bf16.mxu1 %v20948_v61 }
0x1444   : > { %20469 = vmatmul.mubr.f32.vlgmr.msra.gmra.mrb[92].mxu1 %v17797_v19 }
0x1445   : > { %20475 = vmatprep.mubr.msk.f32.mxu1 %vm20931_vm1, %v20930_v1 }
0x1486   : > { %v17694_v60 = vpop.permute.xlu1 %17693 }
0x1487   : > { %17696 = vst.msk [vmem:[#allocation2] sm:$0xff] %vm3424_vm4, %v17694_v60 }
0x1517   : > { %v20470_v3 = vpop.f32.mrb[92].mxu1 }
0x1518   : > { %v20562_v5 = vadd.f32 %v20470_v3, %v17711_v59  ;;  %v18212_v6 = vpop.f32.mrb[93].mxu1 }
0x1519   : > { %v20563_v8 = vadd.f32 %v18212_v6, %v17706_v4 }
0x151a   : > { %v18223_v38 = vmax.f32 %v20562_v5, 0.0 }
0x151b   : > { %v18222_v45 = vmax.f32 %v20563_v8, 0.0 }
0x151c   : > { %v18238_v55 = vand.u32 4294901760, %v18223_v38 }
0x151d   : > { %v18235_v10 = vand.u32 4294901760, %v18222_v45 }
0x151e   : > { %v18320_v30 = vsub.f32 %v18223_v38, %v18238_v55 }
0x151f   : > { %v20538_v11 = vpack.c.bf16 %v18238_v55, %v18235_v10  ;;  %v18313_v12 = vsub.f32 %v18222_v45, %v18235_v10 }
0x1520   : > { %v18321_v13 = vand.u32 4294901760, %v18320_v30 }
0x1521   : > { %v18314_v15 = vand.u32 4294901760, %v18313_v12  ;;  %20539 = vmatpush3.bf16.msra.mxu1 %v20538_v11  ;;  %v20544_v16 = vpack.c.bf16 %v18320_v30, %v18313_v12 }
0x1522   : > { %v18322_v17 = vsub.f32 %v18320_v30, %v18321_v13  ;;  %20540 = vmatprep.subr.bf16.mxu1 %v20948_v61 }
0x1523   : > { %v18315_v18 = vsub.f32 %v18313_v12, %v18314_v15  ;;  %v20550_v19 = vpack.c.bf16 %v18321_v13, %v18314_v15 }
0x1524   : > { %v18323_v42 = vand.u32 4294901760, %v18322_v17  ;;  %20476 = vmatmul.mubr.f32.vlgmr.msra.gmra.mrb[94].mxu1 %v18305_v14 }
0x1525   : > { %v18316_v20 = vand.u32 4294901760, %v18315_v18  ;;  %20482 = vmatprep.mubr.msk.f32.mxu1 %vm20931_vm1, %v20930_v1 }
0x1527   : > { %v20541_v24 = vpack.c.bf16 %v18323_v42, %v18316_v20 }
0x1529   : > { %20542 = vmatpush3.bf16.msra.mxu1 %v20541_v24 }
0x152a   : > { %20543 = vmatprep.subr.bf16.mxu1 %v20948_v61 }
0x152c   : > { %20483 = vmatmul.mubr.f32.vlgmr.msra.gmra.mrb[94].mxu1 %v18301_v0 }
0x152d   : > { %20545 = vmatpush3.bf16.msra.mxu1 %v20544_v16  ;;  %20489 = vmatprep.mubr.msk.f32.mxu1 %vm20931_vm1, %v20930_v1 }
0x152e   : > { %20546 = vmatprep.subr.bf16.mxu1 %v20948_v61 }
0x1534   : > { %20490 = vmatmul.mubr.f32.vlgmr.msra.gmra.mrb[94].mxu1 %v18302_v2 }
0x1535   : > { %20548 = vmatpush3.bf16.msra.mxu1 %v20538_v11  ;;  %20496 = vmatprep.mubr.msk.f32.mxu1 %vm20931_vm1, %v20930_v1 }
0x1536   : > { %20549 = vmatprep.subr.bf16.mxu1 %v20948_v61 }
0x153c   : > { %20497 = vmatmul.mubr.f32.vlgmr.msra.gmra.mrb[94].mxu1 %v18303_v7 }
0x153d   : > { %20551 = vmatpush3.bf16.msra.mxu1 %v20550_v19  ;;  %20503 = vmatprep.mubr.msk.f32.mxu1 %vm20931_vm1, %v20930_v1 }
0x153e   : > { %20552 = vmatprep.subr.bf16.mxu1 %v20948_v61 }
0x1544   : > { %20504 = vmatmul.mubr.f32.vlgmr.msra.gmra.mrb[94].mxu1 %v18301_v0 }
0x1545   : > { %20554 = vmatpush3.bf16.msra.mxu1 %v20538_v11  ;;  %20510 = vmatprep.mubr.msk.f32.mxu1 %vm20931_vm1, %v20930_v1 }
0x154c   : > { %20511 = vmatmul.mubr.f32.vlgmr.msra.gmra.mrb[94].mxu1 %v18301_v0 }
0x161f   : > { %v18689_v26 = vpop.f32.mrb[94].mxu1 }
0x1620   : > { %v20564_v27 = vadd.f32 %v18689_v26, %v18229_v25  ;;  %v20512_v29 = vpop.f32.mrb[95].mxu1 }
0x1622   : > { %18694 = vst.msk [vmem:[%s516_s19] sm:$0x3f] %vm18693_vm0, %v20564_v27 }
0x1623 PF: > { %s26_s21 = sadd.s32 1, %s20928_s21  }
0x1624   : > { %p23_p4 = scmp.ge.s32.totalorder %s26_s21, 4  }
0x1626   :  { %25 = sbr.rel (!%p23_p4) target bundleno = 3 (0x3), region = 144 }

</bundles_post_ra>
